<compile_context>
chip_gen: v7x
topology: tpu7x:2x2x1
jax: 0.10.0
libtpu: 0.0.40
codegen_flags: <defaults>
</compile_context>

<pallas_src>
import math

import jax
import jax.numpy as jnp
from jax.experimental import pallas as pl
from jax.experimental.pallas import tpu as pltpu


# ----------------------------------------------------------------------------
# Kernel factory (static shapes / layer count baked in)
# ----------------------------------------------------------------------------
def make_fused_lstm_kernel(num_layer, tc, bp, hp, mm_dtype, unroll):
    f32 = jnp.float32

    def kernel(*refs):
        # inputs | outputs | scratch
        x_ref = refs[0]                                    # (Tc*Bp, D) mm
        layer_refs = [refs[1 + 3 * l:1 + 3 * (l + 1)] for l in range(num_layer)]
        base = 1 + 3 * num_layer
        h0_ref, vw_ref, vb_ref = refs[base:base + 3]
        out_ref, hN_ref, cN_ref = refs[base + 3:base + 6]
        gates_sc, hseq_sc, hcar_sc, ccar_sc = refs[base + 6:base + 10]

        # Chunk 0: init per-layer h/c carries.  PyTorch forward uses
        # (hidden, hidden), i.e. c0 == h0 (intentional, matches the module).
        @pl.when(pl.program_id(0) == 0)
        def _():
            hcar_sc[...] = h0_ref[...]
            ccar_sc[...] = h0_ref[...]

        for l in range(num_layer):
            wih_ref, whh_ref, b_ref = layer_refs[l]        # (D_l,4Hp),(Hp,4Hp),(1,4Hp)

            # (1) hoisted input projection for the whole chunk: one well-shaped
            #     (Tc*Bp, D_l) @ (D_l, 4Hp) MXU matmul + fused bias.
            if l == 0:
                x_in = x_ref[...]                          # mm_dtype
            else:
                x_in = hseq_sc[...]                        # prev layer, mm_dtype
            gates_sc[...] = (
                jnp.dot(x_in, wih_ref[...], preferred_element_type=f32)
                + b_ref[...])                              # (Tc*Bp, 4Hp) f32

            # (2) time recurrence inside the chunk; h/c carried in f32 scratch.
            def step(t, carry):
                row = pl.multiple_of(t * bp, bp)
                h_prev = hcar_sc[l]                        # (Bp, Hp) f32
                c_prev = ccar_sc[l]
                g = (gates_sc[pl.ds(row, bp), :]
                     + jnp.dot(h_prev.astype(mm_dtype), whh_ref[...],
                               preferred_element_type=f32))
                # gate order (i, f, o, g): one sigmoid over 3Hp lanes + one tanh
                s = jax.nn.sigmoid(g[:, :3 * hp])
                i_g = s[:, 0 * hp:1 * hp]
                f_g = s[:, 1 * hp:2 * hp]
                o_g = s[:, 2 * hp:3 * hp]
                g_g = jnp.tanh(g[:, 3 * hp:])
                c_new = f_g * c_prev + i_g * g_g
                h_new = o_g * jnp.tanh(c_new)
                hcar_sc[l] = h_new
                ccar_sc[l] = c_new
                hseq_sc[pl.ds(row, bp), :] = h_new.astype(mm_dtype)
                return carry

            jax.lax.fori_loop(0, tc, step, 0, unroll=unroll)

        # (3) fused Linear head on this chunk: (Tc*Bp, Hp) @ (Hp, Op), lane-dense.
        out_ref[...] = (
            jnp.dot(hseq_sc[...], vw_ref[...], preferred_element_type=f32)
            + vb_ref[...])

        # (4) final h/c: cheap (L, Bp, Hp) write; last chunk's value wins.
        hN_ref[...] = hcar_sc[...]
        cN_ref[...] = ccar_sc[...]

    return kernel


# ----------------------------------------------------------------------------
# Helpers
# ----------------------------------------------------------------------------
def _round_up(n, m):
    return ((n + m - 1) // m) * m


def _pad_axis(a, axis, size):
    pad = size - a.shape[axis]
    if pad <= 0:
        return a
    widths = [(0, 0)] * a.ndim
    widths[axis] = (0, pad)
    return jnp.pad(a, widths)


def _vmem_limit_bytes(headroom=8 * 2**20, fallback=64 * 2**20):
    """Per-generation VMEM limit (v5e/v6e 128 MiB, v7x 64 MiB) minus headroom."""
    try:
        info = pltpu.get_tpu_info()
        cap = getattr(info, "vmem_capacity_bytes", None)
        if cap:
            return max(32 * 2**20, int(cap) - headroom)
    except Exception:
        pass
    return fallback


def _resident_bytes(L, D, bp, hp, op, mm_bytes):
    n = 0
    for l in range(L):
        d_l = D if l == 0 else hp
        n += (d_l * 4 * hp + hp * 4 * hp) * mm_bytes + 4 * hp * 4
    n += L * bp * hp * 4                  # h0
    n += hp * op * mm_bytes + op * 4      # head
    n += 4 * L * bp * hp * 4              # h/c carries + hN/cN outputs
    return n


def _pick_time_chunk(T, bp, d, hp, op, mm_bytes, budget):
    """Largest divisor of T whose chunk-scaled buffers fit the VMEM budget."""
    best = 1
    for tc in range(1, T + 1):
        if T % tc:
            continue
        rows = tc * bp
        need = rows * (4 * hp * 4           # gates scratch (f32)
                       + hp * mm_bytes      # hseq scratch (mm dtype)
                       + 2 * d * mm_bytes   # x chunk (double-buffered)
                       + 2 * op * 4)        # out chunk (double-buffered)
        if need <= budget:
            best = tc
    return best


_GATE_PERM = (0, 1, 3, 2)   # PyTorch (i, f, g, o) -> kernel (i, f, o, g)


# ----------------------------------------------------------------------------
# myLSTM forward (mirrors the PyTorch module)
# ----------------------------------------------------------------------------
def my_lstm_forward(params, x, hidden, matmul_dtype=jnp.bfloat16):
    """x: (T, B, input_size); hidden: (num_layer, B, H).

    PyTorch: out, hidden = self.lstm(x, (hidden, hidden)); out = self.V(out)
    Returns (out, (h_n, c_n)).
    """
    T, B, D = x.shape
    L, _, H = hidden.shape
    O = params["V_w"].shape[0]
    mm = matmul_dtype
    mm_bytes = jnp.dtype(mm).itemsize

    bp = _round_up(B, 8)       # full sublanes in every per-step tile
    hp = _round_up(H, 128)     # lane-dense hidden
    op = _round_up(O, 128)     # lane-dense head output (unmasked vst)
    perm = jnp.array(_GATE_PERM)

    def pack_rows(w):          # (4H, C): reorder gates + zero-pad H -> (4hp, C)
        w4 = w.reshape(4, H, w.shape[-1])[perm]
        return _pad_axis(w4, 1, hp).reshape(4 * hp, w.shape[-1])

    # ---- pack arguments -----------------------------------------------------
    args = [_pad_axis(x, 1, bp).reshape(T * bp, D).astype(mm)]       # (T*bp, D)
    for l, p in enumerate(params["lstm"]):
        w_ih = pack_rows(p["w_ih"])                                  # (4hp, D_l)
        if l > 0:
            w_ih = _pad_axis(w_ih, 1, hp)                            # D_l -> hp
        w_hh = _pad_axis(pack_rows(p["w_hh"]), 1, hp)                # (4hp, hp)
        b = _pad_axis((p["b_ih"] + p["b_hh"]).reshape(4, H)[perm], 1, hp)
        args.append(jnp.transpose(w_ih).astype(mm))                  # (D_l, 4hp)
        args.append(jnp.transpose(w_hh).astype(mm))                  # (hp, 4hp)
        args.append(b.reshape(1, 4 * hp).astype(jnp.float32))        # (1, 4hp)
    args.append(_pad_axis(_pad_axis(hidden, 1, bp), 2, hp)
                .astype(jnp.float32))                                # (L, bp, hp)
    vw = _pad_axis(_pad_axis(params["V_w"], 1, hp), 0, op)
    args.append(jnp.transpose(vw).astype(mm))                        # (hp, op)
    args.append(_pad_axis(params["V_b"], 0, op).reshape(1, op)
                .astype(jnp.float32))                                # (1, op)

    # ---- chunking / VMEM budget ---------------------------------------------
    vmem_limit = _vmem_limit_bytes()
    resident = _resident_bytes(L, D, bp, hp, op, mm_bytes)
    budget = max(2 * 2**20, vmem_limit // 2 - resident)
    tc = _pick_time_chunk(T, bp, D, hp, op, mm_bytes, budget)
    n_chunks = T // tc
    unroll = max(1, min(tc, 8))

    def full(shape):
        return pl.BlockSpec(shape, lambda t, _s=shape: (0,) * len(_s))

    in_specs = [pl.BlockSpec((tc * bp, D), lambda t: (t, 0))]
    for l in range(L):
        d_l = D if l == 0 else hp
        in_specs += [full((d_l, 4 * hp)), full((hp, 4 * hp)), full((1, 4 * hp))]
    in_specs += [full((L, bp, hp)), full((hp, op)), full((1, op))]

    out_specs = (pl.BlockSpec((tc * bp, op), lambda t: (t, 0)),
                 full((L, bp, hp)), full((L, bp, hp)))

    out_flat, h_n, c_n = pl.pallas_call(
        make_fused_lstm_kernel(L, tc, bp, hp, mm, unroll),
        grid=(n_chunks,),
        out_shape=(jax.ShapeDtypeStruct((T * bp, op), jnp.float32),
                   jax.ShapeDtypeStruct((L, bp, hp), jnp.float32),
                   jax.ShapeDtypeStruct((L, bp, hp), jnp.float32)),
        in_specs=in_specs,
        out_specs=out_specs,
        scratch_shapes=[
            pltpu.VMEM((tc * bp, 4 * hp), jnp.float32),   # hoisted gates (chunk)
            pltpu.VMEM((tc * bp, hp), mm),                # layer hidden seq (chunk)
            pltpu.VMEM((L, bp, hp), jnp.float32),         # h carry across chunks
            pltpu.VMEM((L, bp, hp), jnp.float32),         # c carry across chunks
        ],
        compiler_params=pltpu.CompilerParams(
            dimension_semantics=("arbitrary",),
            vmem_limit_bytes=int(vmem_limit)),
    )(*args)

    out = out_flat.reshape(T, bp, op)[:, :B, :O]
    return out, (h_n[:, :B, :H], c_n[:, :B, :H])


# ----------------------------------------------------------------------------
# Pure-JAX reference (for correctness check)
# ----------------------------------------------------------------------------
def ref_forward(params, x, hidden):
    def one_layer(seq, w_ih, w_hh, b_ih, b_hh, h0, c0):
        H = h0.shape[-1]

        def step(carry, x_t):
            h, c = carry
            g = x_t @ w_ih.T + b_ih + h @ w_hh.T + b_hh
            i = jax.nn.sigmoid(g[:, 0 * H:1 * H])
            f = jax.nn.sigmoid(g[:, 1 * H:2 * H])
            gg = jnp.tanh(g[:, 2 * H:3 * H])
            o = jax.nn.sigmoid(g[:, 3 * H:4 * H])
            c = f * c + i * gg
            h = o * jnp.tanh(c)
            return (h, c), h

        (hT, cT), outs = jax.lax.scan(step, (h0, c0), seq)
        return outs, hT, cT

    layer_in = x
    h_list, c_list = [], []
    for l, p in enumerate(params["lstm"]):
        layer_in, hT, cT = one_layer(layer_in, p["w_ih"], p["w_hh"],
                                     p["b_ih"], p["b_hh"],
                                     hidden[l], hidden[l])
        h_list.append(hT)
        c_list.append(cT)
    out = layer_in @ params["V_w"].T + params["V_b"]
    return out, (jnp.stack(h_list), jnp.stack(c_list))


# ----------------------------------------------------------------------------
# Deterministic parameter init (PyTorch-style U(-1/sqrt(H), 1/sqrt(H)))
# ----------------------------------------------------------------------------
def init_params(key, input_size, hidden_size, output_size, num_layer):
    k = 1.0 / math.sqrt(hidden_size)
    params = {"lstm": []}
    for l in range(num_layer):
        d_in = input_size if l == 0 else hidden_size
        key, k1, k2, k3, k4 = jax.random.split(key, 5)
        params["lstm"].append({
            "w_ih": jax.random.uniform(k1, (4 * hidden_size, d_in),
                                       jnp.float32, -k, k),
            "w_hh": jax.random.uniform(k2, (4 * hidden_size, hidden_size),
                                       jnp.float32, -k, k),
            "b_ih": jax.random.uniform(k3, (4 * hidden_size,),
                                       jnp.float32, -k, k),
            "b_hh": jax.random.uniform(k4, (4 * hidden_size,),
                                       jnp.float32, -k, k),
        })
    key, k5, k6 = jax.random.split(key, 3)
    params["V_w"] = jax.random.uniform(k5, (output_size, hidden_size),
                                       jnp.float32, -k, k)
    params["V_b"] = jax.random.uniform(k6, (output_size,),
                                       jnp.float32, -k, k)
    return params


if __name__ == "__main__":
    input_size, hidden_size, output_size, num_layer = 16, 32, 8, 2
    seq_len, batch = 8, 2

    key = jax.random.PRNGKey(0)
    kp, kx, kh = jax.random.split(key, 3)
    params = init_params(kp, input_size, hidden_size, output_size, num_layer)

    x = jax.random.normal(kx, (seq_len, batch, input_size), jnp.float32)
    hidden = 0.1 * jax.random.normal(kh, (num_layer, batch, hidden_size),
                                     jnp.float32)

    # pure-JAX reference
    out_r, (h_r, c_r) = ref_forward(params, x, hidden)

    # --- f32-matmul path: tight correctness check ---
    out, (h_n, c_n) = my_lstm_forward(params, x, hidden,
                                      matmul_dtype=jnp.float32)
    jax.block_until_ready((out, h_n, c_n))
    assert out.shape == (seq_len, batch, output_size)
    assert h_n.shape == (num_layer, batch, hidden_size)
    assert c_n.shape == (num_layer, batch, hidden_size)
    assert jnp.allclose(out, out_r, atol=1e-5, rtol=1e-5)
    assert jnp.allclose(h_n, h_r, atol=1e-5, rtol=1e-5)
    assert jnp.allclose(c_n, c_r, atol=1e-5, rtol=1e-5)

    # --- default bf16 MXU path (f32 accumulation, f32 state math): loose check ---
    out_b, (h_b, c_b) = my_lstm_forward(params, x, hidden)
    jax.block_until_ready((out_b, h_b, c_b))
    assert jnp.allclose(out_b, out_r, atol=5e-2, rtol=5e-2)
    assert jnp.allclose(h_b, h_r, atol=5e-2, rtol=5e-2)
    assert jnp.allclose(c_b, c_r, atol=5e-2, rtol=5e-2)

    print("KERNEL_OK")
</pallas_src>

<mosaic_0001>
module attributes {stable_mosaic.version = 11 : i64} {
  func.func @kernel(%arg0: i32, %arg1: memref<64x16xf32, #tpu.memory_space<vmem>>, %arg2: memref<16x512xf32, #tpu.memory_space<vmem>>, %arg3: memref<128x512xf32, #tpu.memory_space<vmem>>, %arg4: memref<1x512xf32, #tpu.memory_space<vmem>>, %arg5: memref<128x512xf32, #tpu.memory_space<vmem>>, %arg6: memref<128x512xf32, #tpu.memory_space<vmem>>, %arg7: memref<1x512xf32, #tpu.memory_space<vmem>>, %arg8: memref<2x8x128xf32, #tpu.memory_space<vmem>>, %arg9: memref<128x128xf32, #tpu.memory_space<vmem>>, %arg10: memref<1x128xf32, #tpu.memory_space<vmem>>, %arg11: memref<64x128xf32, #tpu.memory_space<vmem>>, %arg12: memref<2x8x128xf32, #tpu.memory_space<vmem>>, %arg13: memref<2x8x128xf32, #tpu.memory_space<vmem>>, %arg14: memref<64x512xf32, #tpu.memory_space<vmem>>, %arg15: memref<64x128xf32, #tpu.memory_space<vmem>>, %arg16: memref<2x8x128xf32, #tpu.memory_space<vmem>>, %arg17: memref<2x8x128xf32, #tpu.memory_space<vmem>>) attributes {dimension_semantics = [#tpu.dimension_semantics<arbitrary>], iteration_bounds = array<i64: 1>, scalar_prefetch = 0 : i64, scratch_operands = 4 : i64, tpu.core_type = #tpu.core_type<tc>, window_params = [{transform_indices = @transform_0, window_bounds = array<i64: 64, 16>}, {pipeline_mode = #tpu.pipeline_mode<synchronous>, transform_indices = @transform_1, window_bounds = array<i64: 16, 512>}, {pipeline_mode = #tpu.pipeline_mode<synchronous>, transform_indices = @transform_2, window_bounds = array<i64: 128, 512>}, {pipeline_mode = #tpu.pipeline_mode<synchronous>, transform_indices = @transform_3, window_bounds = array<i64: 1, 512>}, {pipeline_mode = #tpu.pipeline_mode<synchronous>, transform_indices = @transform_4, window_bounds = array<i64: 128, 512>}, {pipeline_mode = #tpu.pipeline_mode<synchronous>, transform_indices = @transform_5, window_bounds = array<i64: 128, 512>}, {pipeline_mode = #tpu.pipeline_mode<synchronous>, transform_indices = @transform_6, window_bounds = array<i64: 1, 512>}, {pipeline_mode = #tpu.pipeline_mode<synchronous>, transform_indices = @transform_7, window_bounds = array<i64: 2, 8, 128>}, {pipeline_mode = #tpu.pipeline_mode<synchronous>, transform_indices = @transform_8, window_bounds = array<i64: 128, 128>}, {pipeline_mode = #tpu.pipeline_mode<synchronous>, transform_indices = @transform_9, window_bounds = array<i64: 1, 128>}, {transform_indices = @transform_10, window_bounds = array<i64: 64, 128>}, {pipeline_mode = #tpu.pipeline_mode<synchronous>, transform_indices = @transform_11, window_bounds = array<i64: 2, 8, 128>}, {pipeline_mode = #tpu.pipeline_mode<synchronous>, transform_indices = @transform_12, window_bounds = array<i64: 2, 8, 128>}]} {
    %c0_i32 = arith.constant 0 : i32
    %0 = arith.cmpi eq, %arg0, %c0_i32 : i32
    %1 = arith.extui %0 : i1 to i32
    %c0_i32_0 = arith.constant 0 : i32
    %2 = arith.cmpi ne, %1, %c0_i32_0 : i32
    scf.if %2 {
      %c0_351 = arith.constant 0 : index
      %c0_352 = arith.constant 0 : index
      %c0_353 = arith.constant 0 : index
      %588 = vector.load %arg8[%c0_351, %c0_352, %c0_353] : memref<2x8x128xf32, #tpu.memory_space<vmem>>, vector<2x8x128xf32>
      %c0_354 = arith.constant 0 : index
      %c0_355 = arith.constant 0 : index
      %c0_356 = arith.constant 0 : index
      %589 = vector.load %arg16[%c0_354, %c0_355, %c0_356] : memref<2x8x128xf32, #tpu.memory_space<vmem>>, vector<2x8x128xf32>
      tpu.vector_store %arg16[%c0_354, %c0_355, %c0_356], %588 {strides = array<i32>} : memref<2x8x128xf32, #tpu.memory_space<vmem>>, vector<2x8x128xf32>,
      %c0_357 = arith.constant 0 : index
      %c0_358 = arith.constant 0 : index
      %c0_359 = arith.constant 0 : index
      %590 = vector.load %arg8[%c0_357, %c0_358, %c0_359] : memref<2x8x128xf32, #tpu.memory_space<vmem>>, vector<2x8x128xf32>
      %c0_360 = arith.constant 0 : index
      %c0_361 = arith.constant 0 : index
      %c0_362 = arith.constant 0 : index
      %591 = vector.load %arg17[%c0_360, %c0_361, %c0_362] : memref<2x8x128xf32, #tpu.memory_space<vmem>>, vector<2x8x128xf32>
      tpu.vector_store %arg17[%c0_360, %c0_361, %c0_362], %590 {strides = array<i32>} : memref<2x8x128xf32, #tpu.memory_space<vmem>>, vector<2x8x128xf32>,
    } else {
    }
    %c0 = arith.constant 0 : index
    %c0_1 = arith.constant 0 : index
    %3 = vector.load %arg1[%c0, %c0_1] : memref<64x16xf32, #tpu.memory_space<vmem>>, vector<64x16xf32>
    %c0_2 = arith.constant 0 : index
    %c0_3 = arith.constant 0 : index
    %4 = vector.load %arg2[%c0_2, %c0_3] : memref<16x512xf32, #tpu.memory_space<vmem>>, vector<16x512xf32>
    %cst = arith.constant dense<0.000000e+00> : vector<64x512xf32>
    %5 = tpu.matmul %3, %4, %cst {dimension_numbers = #tpu.dot_dimension_numbers<[1], [0], [0], [1], [0, 0, 1, 1], [], []>} : vector<64x16xf32>, vector<16x512xf32>, vector<64x512xf32> -> vector<64x512xf32>
    %c0_4 = arith.constant 0 : index
    %c0_5 = arith.constant 0 : index
    %6 = vector.load %arg4[%c0_4, %c0_5] : memref<1x512xf32, #tpu.memory_space<vmem>>, vector<1x512xf32>
    %7 = vector.broadcast %6 : vector<1x512xf32> to vector<64x512xf32>
    %8 = arith.addf %5, %7 : vector<64x512xf32>
    %c0_6 = arith.constant 0 : index
    %c0_7 = arith.constant 0 : index
    %9 = vector.load %arg14[%c0_6, %c0_7] : memref<64x512xf32, #tpu.memory_space<vmem>>, vector<64x512xf32>
    tpu.vector_store %arg14[%c0_6, %c0_7], %8 {strides = array<i32>} : memref<64x512xf32, #tpu.memory_space<vmem>>, vector<64x512xf32>,
    %c0_i32_8 = arith.constant 0 : i32
    %c8_i32 = arith.constant 8 : i32
    %10 = arith.muli %c0_i32_8, %c8_i32 : i32
    %11 = tpu.assume_multiple %10, 8 : i32
    %c0_9 = arith.constant 0 : index
    %c0_10 = arith.constant 0 : index
    %c0_11 = arith.constant 0 : index
    %12 = vector.load %arg16[%c0_9, %c0_10, %c0_11] : memref<2x8x128xf32, #tpu.memory_space<vmem>>, vector<1x8x128xf32>
    %13 = vector.shape_cast %12 : vector<1x8x128xf32> to vector<8x128xf32>
    %c0_12 = arith.constant 0 : index
    %c0_13 = arith.constant 0 : index
    %c0_14 = arith.constant 0 : index
    %14 = vector.load %arg17[%c0_12, %c0_13, %c0_14] : memref<2x8x128xf32, #tpu.memory_space<vmem>>, vector<1x8x128xf32>
    %15 = vector.shape_cast %14 : vector<1x8x128xf32> to vector<8x128xf32>
    %16 = arith.index_cast %11 : i32 to index
    %c0_15 = arith.constant 0 : index
    %17 = vector.load %arg14[%16, %c0_15] : memref<64x512xf32, #tpu.memory_space<vmem>>, vector<8x512xf32>
    %c0_16 = arith.constant 0 : index
    %c0_17 = arith.constant 0 : index
    %18 = vector.load %arg3[%c0_16, %c0_17] : memref<128x512xf32, #tpu.memory_space<vmem>>, vector<128x512xf32>
    %cst_18 = arith.constant dense<0.000000e+00> : vector<8x512xf32>
    %19 = tpu.matmul %13, %18, %cst_18 {dimension_numbers = #tpu.dot_dimension_numbers<[1], [0], [0], [1], [0, 0, 1, 1], [], []>} : vector<8x128xf32>, vector<128x512xf32>, vector<8x512xf32> -> vector<8x512xf32>
    %20 = arith.addf %17, %19 : vector<8x512xf32>
    %21 = vector.extract_strided_slice %20 {offsets = [0, 0], sizes = [8, 384], strides = [1, 1]} : vector<8x512xf32> to vector<8x384xf32>
    %22 = arith.negf %21 : vector<8x384xf32>
    %23 = math.exp %22 : vector<8x384xf32>
    %cst_19 = arith.constant 1.000000e+00 : f32
    %24 = vector.broadcast %cst_19 : f32 to vector<8x384xf32>
    %25 = arith.addf %24, %23 : vector<8x384xf32>
    %26 = arith.divf %24, %25 : vector<8x384xf32>
    %27 = vector.extract_strided_slice %26 {offsets = [0, 0], sizes = [8, 128], strides = [1, 1]} : vector<8x384xf32> to vector<8x128xf32>
    %28 = vector.extract_strided_slice %26 {offsets = [0, 128], sizes = [8, 128], strides = [1, 1]} : vector<8x384xf32> to vector<8x128xf32>
    %29 = vector.extract_strided_slice %26 {offsets = [0, 256], sizes = [8, 128], strides = [1, 1]} : vector<8x384xf32> to vector<8x128xf32>
    %30 = vector.extract_strided_slice %20 {offsets = [0, 384], sizes = [8, 128], strides = [1, 1]} : vector<8x512xf32> to vector<8x128xf32>
    %31 = math.tanh %30 : vector<8x128xf32>
    %32 = arith.mulf %28, %15 : vector<8x128xf32>
    %33 = arith.mulf %27, %31 : vector<8x128xf32>
    %34 = arith.addf %32, %33 : vector<8x128xf32>
    %35 = math.tanh %34 : vector<8x128xf32>
    %36 = arith.mulf %29, %35 : vector<8x128xf32>
    %c0_20 = arith.constant 0 : index
    %c0_21 = arith.constant 0 : index
    %c0_22 = arith.constant 0 : index
    %37 = vector.load %arg16[%c0_20, %c0_21, %c0_22] : memref<2x8x128xf32, #tpu.memory_space<vmem>>, vector<1x8x128xf32>
    %38 = vector.shape_cast %37 : vector<1x8x128xf32> to vector<8x128xf32>
    %39 = vector.shape_cast %36 : vector<8x128xf32> to vector<1x8x128xf32>
    tpu.vector_store %arg16[%c0_20, %c0_21, %c0_22], %39 {strides = array<i32>} : memref<2x8x128xf32, #tpu.memory_space<vmem>>, vector<1x8x128xf32>,
    %c0_23 = arith.constant 0 : index
    %c0_24 = arith.constant 0 : index
    %c0_25 = arith.constant 0 : index
    %40 = vector.load %arg17[%c0_23, %c0_24, %c0_25] : memref<2x8x128xf32, #tpu.memory_space<vmem>>, vector<1x8x128xf32>
    %41 = vector.shape_cast %40 : vector<1x8x128xf32> to vector<8x128xf32>
    %42 = vector.shape_cast %34 : vector<8x128xf32> to vector<1x8x128xf32>
    tpu.vector_store %arg17[%c0_23, %c0_24, %c0_25], %42 {strides = array<i32>} : memref<2x8x128xf32, #tpu.memory_space<vmem>>, vector<1x8x128xf32>,
    %43 = arith.index_cast %11 : i32 to index
    %c0_26 = arith.constant 0 : index
    %44 = vector.load %arg15[%43, %c0_26] : memref<64x128xf32, #tpu.memory_space<vmem>>, vector<8x128xf32>
    tpu.vector_store %arg15[%43, %c0_26], %36 {strides = array<i32>} : memref<64x128xf32, #tpu.memory_space<vmem>>, vector<8x128xf32>,
    %c1_i32 = arith.constant 1 : i32
    %c8_i32_27 = arith.constant 8 : i32
    %45 = arith.muli %c1_i32, %c8_i32_27 : i32
    %46 = tpu.assume_multiple %45, 8 : i32
    %c0_28 = arith.constant 0 : index
    %c0_29 = arith.constant 0 : index
    %c0_30 = arith.constant 0 : index
    %47 = vector.load %arg16[%c0_28, %c0_29, %c0_30] : memref<2x8x128xf32, #tpu.memory_space<vmem>>, vector<1x8x128xf32>
    %48 = vector.shape_cast %47 : vector<1x8x128xf32> to vector<8x128xf32>
    %c0_31 = arith.constant 0 : index
    %c0_32 = arith.constant 0 : index
    %c0_33 = arith.constant 0 : index
    %49 = vector.load %arg17[%c0_31, %c0_32, %c0_33] : memref<2x8x128xf32, #tpu.memory_space<vmem>>, vector<1x8x128xf32>
    %50 = vector.shape_cast %49 : vector<1x8x128xf32> to vector<8x128xf32>
    %51 = arith.index_cast %46 : i32 to index
    %c0_34 = arith.constant 0 : index
    %52 = vector.load %arg14[%51, %c0_34] : memref<64x512xf32, #tpu.memory_space<vmem>>, vector<8x512xf32>
    %c0_35 = arith.constant 0 : index
    %c0_36 = arith.constant 0 : index
    %53 = vector.load %arg3[%c0_35, %c0_36] : memref<128x512xf32, #tpu.memory_space<vmem>>, vector<128x512xf32>
    %cst_37 = arith.constant dense<0.000000e+00> : vector<8x512xf32>
    %54 = tpu.matmul %48, %53, %cst_37 {dimension_numbers = #tpu.dot_dimension_numbers<[1], [0], [0], [1], [0, 0, 1, 1], [], []>} : vector<8x128xf32>, vector<128x512xf32>, vector<8x512xf32> -> vector<8x512xf32>
    %55 = arith.addf %52, %54 : vector<8x512xf32>
    %56 = vector.extract_strided_slice %55 {offsets = [0, 0], sizes = [8, 384], strides = [1, 1]} : vector<8x512xf32> to vector<8x384xf32>
    %57 = arith.negf %56 : vector<8x384xf32>
    %58 = math.exp %57 : vector<8x384xf32>
    %cst_38 = arith.constant 1.000000e+00 : f32
    %59 = vector.broadcast %cst_38 : f32 to vector<8x384xf32>
    %60 = arith.addf %59, %58 : vector<8x384xf32>
    %61 = arith.divf %59, %60 : vector<8x384xf32>
    %62 = vector.extract_strided_slice %61 {offsets = [0, 0], sizes = [8, 128], strides = [1, 1]} : vector<8x384xf32> to vector<8x128xf32>
    %63 = vector.extract_strided_slice %61 {offsets = [0, 128], sizes = [8, 128], strides = [1, 1]} : vector<8x384xf32> to vector<8x128xf32>
    %64 = vector.extract_strided_slice %61 {offsets = [0, 256], sizes = [8, 128], strides = [1, 1]} : vector<8x384xf32> to vector<8x128xf32>
    %65 = vector.extract_strided_slice %55 {offsets = [0, 384], sizes = [8, 128], strides = [1, 1]} : vector<8x512xf32> to vector<8x128xf32>
    %66 = math.tanh %65 : vector<8x128xf32>
    %67 = arith.mulf %63, %50 : vector<8x128xf32>
    %68 = arith.mulf %62, %66 : vector<8x128xf32>
    %69 = arith.addf %67, %68 : vector<8x128xf32>
    %70 = math.tanh %69 : vector<8x128xf32>
    %71 = arith.mulf %64, %70 : vector<8x128xf32>
    %c0_39 = arith.constant 0 : index
    %c0_40 = arith.constant 0 : index
    %c0_41 = arith.constant 0 : index
    %72 = vector.load %arg16[%c0_39, %c0_40, %c0_41] : memref<2x8x128xf32, #tpu.memory_space<vmem>>, vector<1x8x128xf32>
    %73 = vector.shape_cast %72 : vector<1x8x128xf32> to vector<8x128xf32>
    %74 = vector.shape_cast %71 : vector<8x128xf32> to vector<1x8x128xf32>
    tpu.vector_store %arg16[%c0_39, %c0_40, %c0_41], %74 {strides = array<i32>} : memref<2x8x128xf32, #tpu.memory_space<vmem>>, vector<1x8x128xf32>,
    %c0_42 = arith.constant 0 : index
    %c0_43 = arith.constant 0 : index
    %c0_44 = arith.constant 0 : index
    %75 = vector.load %arg17[%c0_42, %c0_43, %c0_44] : memref<2x8x128xf32, #tpu.memory_space<vmem>>, vector<1x8x128xf32>
    %76 = vector.shape_cast %75 : vector<1x8x128xf32> to vector<8x128xf32>
    %77 = vector.shape_cast %69 : vector<8x128xf32> to vector<1x8x128xf32>
    tpu.vector_store %arg17[%c0_42, %c0_43, %c0_44], %77 {strides = array<i32>} : memref<2x8x128xf32, #tpu.memory_space<vmem>>, vector<1x8x128xf32>,
    %78 = arith.index_cast %46 : i32 to index
    %c0_45 = arith.constant 0 : index
    %79 = vector.load %arg15[%78, %c0_45] : memref<64x128xf32, #tpu.memory_space<vmem>>, vector<8x128xf32>
    tpu.vector_store %arg15[%78, %c0_45], %71 {strides = array<i32>} : memref<64x128xf32, #tpu.memory_space<vmem>>, vector<8x128xf32>,
    %c2_i32 = arith.constant 2 : i32
    %c8_i32_46 = arith.constant 8 : i32
    %80 = arith.muli %c2_i32, %c8_i32_46 : i32
    %81 = tpu.assume_multiple %80, 8 : i32
    %c0_47 = arith.constant 0 : index
    %c0_48 = arith.constant 0 : index
    %c0_49 = arith.constant 0 : index
    %82 = vector.load %arg16[%c0_47, %c0_48, %c0_49] : memref<2x8x128xf32, #tpu.memory_space<vmem>>, vector<1x8x128xf32>
    %83 = vector.shape_cast %82 : vector<1x8x128xf32> to vector<8x128xf32>
    %c0_50 = arith.constant 0 : index
    %c0_51 = arith.constant 0 : index
    %c0_52 = arith.constant 0 : index
    %84 = vector.load %arg17[%c0_50, %c0_51, %c0_52] : memref<2x8x128xf32, #tpu.memory_space<vmem>>, vector<1x8x128xf32>
    %85 = vector.shape_cast %84 : vector<1x8x128xf32> to vector<8x128xf32>
    %86 = arith.index_cast %81 : i32 to index
    %c0_53 = arith.constant 0 : index
    %87 = vector.load %arg14[%86, %c0_53] : memref<64x512xf32, #tpu.memory_space<vmem>>, vector<8x512xf32>
    %c0_54 = arith.constant 0 : index
    %c0_55 = arith.constant 0 : index
    %88 = vector.load %arg3[%c0_54, %c0_55] : memref<128x512xf32, #tpu.memory_space<vmem>>, vector<128x512xf32>
    %cst_56 = arith.constant dense<0.000000e+00> : vector<8x512xf32>
    %89 = tpu.matmul %83, %88, %cst_56 {dimension_numbers = #tpu.dot_dimension_numbers<[1], [0], [0], [1], [0, 0, 1, 1], [], []>} : vector<8x128xf32>, vector<128x512xf32>, vector<8x512xf32> -> vector<8x512xf32>
    %90 = arith.addf %87, %89 : vector<8x512xf32>
    %91 = vector.extract_strided_slice %90 {offsets = [0, 0], sizes = [8, 384], strides = [1, 1]} : vector<8x512xf32> to vector<8x384xf32>
    %92 = arith.negf %91 : vector<8x384xf32>
    %93 = math.exp %92 : vector<8x384xf32>
    %cst_57 = arith.constant 1.000000e+00 : f32
    %94 = vector.broadcast %cst_57 : f32 to vector<8x384xf32>
    %95 = arith.addf %94, %93 : vector<8x384xf32>
    %96 = arith.divf %94, %95 : vector<8x384xf32>
    %97 = vector.extract_strided_slice %96 {offsets = [0, 0], sizes = [8, 128], strides = [1, 1]} : vector<8x384xf32> to vector<8x128xf32>
    %98 = vector.extract_strided_slice %96 {offsets = [0, 128], sizes = [8, 128], strides = [1, 1]} : vector<8x384xf32> to vector<8x128xf32>
    %99 = vector.extract_strided_slice %96 {offsets = [0, 256], sizes = [8, 128], strides = [1, 1]} : vector<8x384xf32> to vector<8x128xf32>
    %100 = vector.extract_strided_slice %90 {offsets = [0, 384], sizes = [8, 128], strides = [1, 1]} : vector<8x512xf32> to vector<8x128xf32>
    %101 = math.tanh %100 : vector<8x128xf32>
    %102 = arith.mulf %98, %85 : vector<8x128xf32>
    %103 = arith.mulf %97, %101 : vector<8x128xf32>
    %104 = arith.addf %102, %103 : vector<8x128xf32>
    %105 = math.tanh %104 : vector<8x128xf32>
    %106 = arith.mulf %99, %105 : vector<8x128xf32>
    %c0_58 = arith.constant 0 : index
    %c0_59 = arith.constant 0 : index
    %c0_60 = arith.constant 0 : index
    %107 = vector.load %arg16[%c0_58, %c0_59, %c0_60] : memref<2x8x128xf32, #tpu.memory_space<vmem>>, vector<1x8x128xf32>
    %108 = vector.shape_cast %107 : vector<1x8x128xf32> to vector<8x128xf32>
    %109 = vector.shape_cast %106 : vector<8x128xf32> to vector<1x8x128xf32>
    tpu.vector_store %arg16[%c0_58, %c0_59, %c0_60], %109 {strides = array<i32>} : memref<2x8x128xf32, #tpu.memory_space<vmem>>, vector<1x8x128xf32>,
    %c0_61 = arith.constant 0 : index
    %c0_62 = arith.constant 0 : index
    %c0_63 = arith.constant 0 : index
    %110 = vector.load %arg17[%c0_61, %c0_62, %c0_63] : memref<2x8x128xf32, #tpu.memory_space<vmem>>, vector<1x8x128xf32>
    %111 = vector.shape_cast %110 : vector<1x8x128xf32> to vector<8x128xf32>
    %112 = vector.shape_cast %104 : vector<8x128xf32> to vector<1x8x128xf32>
    tpu.vector_store %arg17[%c0_61, %c0_62, %c0_63], %112 {strides = array<i32>} : memref<2x8x128xf32, #tpu.memory_space<vmem>>, vector<1x8x128xf32>,
    %113 = arith.index_cast %81 : i32 to index
    %c0_64 = arith.constant 0 : index
    %114 = vector.load %arg15[%113, %c0_64] : memref<64x128xf32, #tpu.memory_space<vmem>>, vector<8x128xf32>
    tpu.vector_store %arg15[%113, %c0_64], %106 {strides = array<i32>} : memref<64x128xf32, #tpu.memory_space<vmem>>, vector<8x128xf32>,
    %c3_i32 = arith.constant 3 : i32
    %c8_i32_65 = arith.constant 8 : i32
    %115 = arith.muli %c3_i32, %c8_i32_65 : i32
    %116 = tpu.assume_multiple %115, 8 : i32
    %c0_66 = arith.constant 0 : index
    %c0_67 = arith.constant 0 : index
    %c0_68 = arith.constant 0 : index
    %117 = vector.load %arg16[%c0_66, %c0_67, %c0_68] : memref<2x8x128xf32, #tpu.memory_space<vmem>>, vector<1x8x128xf32>
    %118 = vector.shape_cast %117 : vector<1x8x128xf32> to vector<8x128xf32>
    %c0_69 = arith.constant 0 : index
    %c0_70 = arith.constant 0 : index
    %c0_71 = arith.constant 0 : index
    %119 = vector.load %arg17[%c0_69, %c0_70, %c0_71] : memref<2x8x128xf32, #tpu.memory_space<vmem>>, vector<1x8x128xf32>
    %120 = vector.shape_cast %119 : vector<1x8x128xf32> to vector<8x128xf32>
    %121 = arith.index_cast %116 : i32 to index
    %c0_72 = arith.constant 0 : index
    %122 = vector.load %arg14[%121, %c0_72] : memref<64x512xf32, #tpu.memory_space<vmem>>, vector<8x512xf32>
    %c0_73 = arith.constant 0 : index
    %c0_74 = arith.constant 0 : index
    %123 = vector.load %arg3[%c0_73, %c0_74] : memref<128x512xf32, #tpu.memory_space<vmem>>, vector<128x512xf32>
    %cst_75 = arith.constant dense<0.000000e+00> : vector<8x512xf32>
    %124 = tpu.matmul %118, %123, %cst_75 {dimension_numbers = #tpu.dot_dimension_numbers<[1], [0], [0], [1], [0, 0, 1, 1], [], []>} : vector<8x128xf32>, vector<128x512xf32>, vector<8x512xf32> -> vector<8x512xf32>
    %125 = arith.addf %122, %124 : vector<8x512xf32>
    %126 = vector.extract_strided_slice %125 {offsets = [0, 0], sizes = [8, 384], strides = [1, 1]} : vector<8x512xf32> to vector<8x384xf32>
    %127 = arith.negf %126 : vector<8x384xf32>
    %128 = math.exp %127 : vector<8x384xf32>
    %cst_76 = arith.constant 1.000000e+00 : f32
    %129 = vector.broadcast %cst_76 : f32 to vector<8x384xf32>
    %130 = arith.addf %129, %128 : vector<8x384xf32>
    %131 = arith.divf %129, %130 : vector<8x384xf32>
    %132 = vector.extract_strided_slice %131 {offsets = [0, 0], sizes = [8, 128], strides = [1, 1]} : vector<8x384xf32> to vector<8x128xf32>
    %133 = vector.extract_strided_slice %131 {offsets = [0, 128], sizes = [8, 128], strides = [1, 1]} : vector<8x384xf32> to vector<8x128xf32>
    %134 = vector.extract_strided_slice %131 {offsets = [0, 256], sizes = [8, 128], strides = [1, 1]} : vector<8x384xf32> to vector<8x128xf32>
    %135 = vector.extract_strided_slice %125 {offsets = [0, 384], sizes = [8, 128], strides = [1, 1]} : vector<8x512xf32> to vector<8x128xf32>
    %136 = math.tanh %135 : vector<8x128xf32>
    %137 = arith.mulf %133, %120 : vector<8x128xf32>
    %138 = arith.mulf %132, %136 : vector<8x128xf32>
    %139 = arith.addf %137, %138 : vector<8x128xf32>
    %140 = math.tanh %139 : vector<8x128xf32>
    %141 = arith.mulf %134, %140 : vector<8x128xf32>
    %c0_77 = arith.constant 0 : index
    %c0_78 = arith.constant 0 : index
    %c0_79 = arith.constant 0 : index
    %142 = vector.load %arg16[%c0_77, %c0_78, %c0_79] : memref<2x8x128xf32, #tpu.memory_space<vmem>>, vector<1x8x128xf32>
    %143 = vector.shape_cast %142 : vector<1x8x128xf32> to vector<8x128xf32>
    %144 = vector.shape_cast %141 : vector<8x128xf32> to vector<1x8x128xf32>
    tpu.vector_store %arg16[%c0_77, %c0_78, %c0_79], %144 {strides = array<i32>} : memref<2x8x128xf32, #tpu.memory_space<vmem>>, vector<1x8x128xf32>,
    %c0_80 = arith.constant 0 : index
    %c0_81 = arith.constant 0 : index
    %c0_82 = arith.constant 0 : index
    %145 = vector.load %arg17[%c0_80, %c0_81, %c0_82] : memref<2x8x128xf32, #tpu.memory_space<vmem>>, vector<1x8x128xf32>
    %146 = vector.shape_cast %145 : vector<1x8x128xf32> to vector<8x128xf32>
    %147 = vector.shape_cast %139 : vector<8x128xf32> to vector<1x8x128xf32>
    tpu.vector_store %arg17[%c0_80, %c0_81, %c0_82], %147 {strides = array<i32>} : memref<2x8x128xf32, #tpu.memory_space<vmem>>, vector<1x8x128xf32>,
    %148 = arith.index_cast %116 : i32 to index
    %c0_83 = arith.constant 0 : index
    %149 = vector.load %arg15[%148, %c0_83] : memref<64x128xf32, #tpu.memory_space<vmem>>, vector<8x128xf32>
    tpu.vector_store %arg15[%148, %c0_83], %141 {strides = array<i32>} : memref<64x128xf32, #tpu.memory_space<vmem>>, vector<8x128xf32>,
    %c4_i32 = arith.constant 4 : i32
    %c8_i32_84 = arith.constant 8 : i32
    %150 = arith.muli %c4_i32, %c8_i32_84 : i32
    %151 = tpu.assume_multiple %150, 8 : i32
    %c0_85 = arith.constant 0 : index
    %c0_86 = arith.constant 0 : index
    %c0_87 = arith.constant 0 : index
    %152 = vector.load %arg16[%c0_85, %c0_86, %c0_87] : memref<2x8x128xf32, #tpu.memory_space<vmem>>, vector<1x8x128xf32>
    %153 = vector.shape_cast %152 : vector<1x8x128xf32> to vector<8x128xf32>
    %c0_88 = arith.constant 0 : index
    %c0_89 = arith.constant 0 : index
    %c0_90 = arith.constant 0 : index
    %154 = vector.load %arg17[%c0_88, %c0_89, %c0_90] : memref<2x8x128xf32, #tpu.memory_space<vmem>>, vector<1x8x128xf32>
    %155 = vector.shape_cast %154 : vector<1x8x128xf32> to vector<8x128xf32>
    %156 = arith.index_cast %151 : i32 to index
    %c0_91 = arith.constant 0 : index
    %157 = vector.load %arg14[%156, %c0_91] : memref<64x512xf32, #tpu.memory_space<vmem>>, vector<8x512xf32>
    %c0_92 = arith.constant 0 : index
    %c0_93 = arith.constant 0 : index
    %158 = vector.load %arg3[%c0_92, %c0_93] : memref<128x512xf32, #tpu.memory_space<vmem>>, vector<128x512xf32>
    %cst_94 = arith.constant dense<0.000000e+00> : vector<8x512xf32>
    %159 = tpu.matmul %153, %158, %cst_94 {dimension_numbers = #tpu.dot_dimension_numbers<[1], [0], [0], [1], [0, 0, 1, 1], [], []>} : vector<8x128xf32>, vector<128x512xf32>, vector<8x512xf32> -> vector<8x512xf32>
    %160 = arith.addf %157, %159 : vector<8x512xf32>
    %161 = vector.extract_strided_slice %160 {offsets = [0, 0], sizes = [8, 384], strides = [1, 1]} : vector<8x512xf32> to vector<8x384xf32>
    %162 = arith.negf %161 : vector<8x384xf32>
    %163 = math.exp %162 : vector<8x384xf32>
    %cst_95 = arith.constant 1.000000e+00 : f32
    %164 = vector.broadcast %cst_95 : f32 to vector<8x384xf32>
    %165 = arith.addf %164, %163 : vector<8x384xf32>
    %166 = arith.divf %164, %165 : vector<8x384xf32>
    %167 = vector.extract_strided_slice %166 {offsets = [0, 0], sizes = [8, 128], strides = [1, 1]} : vector<8x384xf32> to vector<8x128xf32>
    %168 = vector.extract_strided_slice %166 {offsets = [0, 128], sizes = [8, 128], strides = [1, 1]} : vector<8x384xf32> to vector<8x128xf32>
    %169 = vector.extract_strided_slice %166 {offsets = [0, 256], sizes = [8, 128], strides = [1, 1]} : vector<8x384xf32> to vector<8x128xf32>
    %170 = vector.extract_strided_slice %160 {offsets = [0, 384], sizes = [8, 128], strides = [1, 1]} : vector<8x512xf32> to vector<8x128xf32>
    %171 = math.tanh %170 : vector<8x128xf32>
    %172 = arith.mulf %168, %155 : vector<8x128xf32>
    %173 = arith.mulf %167, %171 : vector<8x128xf32>
    %174 = arith.addf %172, %173 : vector<8x128xf32>
    %175 = math.tanh %174 : vector<8x128xf32>
    %176 = arith.mulf %169, %175 : vector<8x128xf32>
    %c0_96 = arith.constant 0 : index
    %c0_97 = arith.constant 0 : index
    %c0_98 = arith.constant 0 : index
    %177 = vector.load %arg16[%c0_96, %c0_97, %c0_98] : memref<2x8x128xf32, #tpu.memory_space<vmem>>, vector<1x8x128xf32>
    %178 = vector.shape_cast %177 : vector<1x8x128xf32> to vector<8x128xf32>
    %179 = vector.shape_cast %176 : vector<8x128xf32> to vector<1x8x128xf32>
    tpu.vector_store %arg16[%c0_96, %c0_97, %c0_98], %179 {strides = array<i32>} : memref<2x8x128xf32, #tpu.memory_space<vmem>>, vector<1x8x128xf32>,
    %c0_99 = arith.constant 0 : index
    %c0_100 = arith.constant 0 : index
    %c0_101 = arith.constant 0 : index
    %180 = vector.load %arg17[%c0_99, %c0_100, %c0_101] : memref<2x8x128xf32, #tpu.memory_space<vmem>>, vector<1x8x128xf32>
    %181 = vector.shape_cast %180 : vector<1x8x128xf32> to vector<8x128xf32>
    %182 = vector.shape_cast %174 : vector<8x128xf32> to vector<1x8x128xf32>
    tpu.vector_store %arg17[%c0_99, %c0_100, %c0_101], %182 {strides = array<i32>} : memref<2x8x128xf32, #tpu.memory_space<vmem>>, vector<1x8x128xf32>,
    %183 = arith.index_cast %151 : i32 to index
    %c0_102 = arith.constant 0 : index
    %184 = vector.load %arg15[%183, %c0_102] : memref<64x128xf32, #tpu.memory_space<vmem>>, vector<8x128xf32>
    tpu.vector_store %arg15[%183, %c0_102], %176 {strides = array<i32>} : memref<64x128xf32, #tpu.memory_space<vmem>>, vector<8x128xf32>,
    %c5_i32 = arith.constant 5 : i32
    %c8_i32_103 = arith.constant 8 : i32
    %185 = arith.muli %c5_i32, %c8_i32_103 : i32
    %186 = tpu.assume_multiple %185, 8 : i32
    %c0_104 = arith.constant 0 : index
    %c0_105 = arith.constant 0 : index
    %c0_106 = arith.constant 0 : index
    %187 = vector.load %arg16[%c0_104, %c0_105, %c0_106] : memref<2x8x128xf32, #tpu.memory_space<vmem>>, vector<1x8x128xf32>
    %188 = vector.shape_cast %187 : vector<1x8x128xf32> to vector<8x128xf32>
    %c0_107 = arith.constant 0 : index
    %c0_108 = arith.constant 0 : index
    %c0_109 = arith.constant 0 : index
    %189 = vector.load %arg17[%c0_107, %c0_108, %c0_109] : memref<2x8x128xf32, #tpu.memory_space<vmem>>, vector<1x8x128xf32>
    %190 = vector.shape_cast %189 : vector<1x8x128xf32> to vector<8x128xf32>
    %191 = arith.index_cast %186 : i32 to index
    %c0_110 = arith.constant 0 : index
    %192 = vector.load %arg14[%191, %c0_110] : memref<64x512xf32, #tpu.memory_space<vmem>>, vector<8x512xf32>
    %c0_111 = arith.constant 0 : index
    %c0_112 = arith.constant 0 : index
    %193 = vector.load %arg3[%c0_111, %c0_112] : memref<128x512xf32, #tpu.memory_space<vmem>>, vector<128x512xf32>
    %cst_113 = arith.constant dense<0.000000e+00> : vector<8x512xf32>
    %194 = tpu.matmul %188, %193, %cst_113 {dimension_numbers = #tpu.dot_dimension_numbers<[1], [0], [0], [1], [0, 0, 1, 1], [], []>} : vector<8x128xf32>, vector<128x512xf32>, vector<8x512xf32> -> vector<8x512xf32>
    %195 = arith.addf %192, %194 : vector<8x512xf32>
    %196 = vector.extract_strided_slice %195 {offsets = [0, 0], sizes = [8, 384], strides = [1, 1]} : vector<8x512xf32> to vector<8x384xf32>
    %197 = arith.negf %196 : vector<8x384xf32>
    %198 = math.exp %197 : vector<8x384xf32>
    %cst_114 = arith.constant 1.000000e+00 : f32
    %199 = vector.broadcast %cst_114 : f32 to vector<8x384xf32>
    %200 = arith.addf %199, %198 : vector<8x384xf32>
    %201 = arith.divf %199, %200 : vector<8x384xf32>
    %202 = vector.extract_strided_slice %201 {offsets = [0, 0], sizes = [8, 128], strides = [1, 1]} : vector<8x384xf32> to vector<8x128xf32>
    %203 = vector.extract_strided_slice %201 {offsets = [0, 128], sizes = [8, 128], strides = [1, 1]} : vector<8x384xf32> to vector<8x128xf32>
    %204 = vector.extract_strided_slice %201 {offsets = [0, 256], sizes = [8, 128], strides = [1, 1]} : vector<8x384xf32> to vector<8x128xf32>
    %205 = vector.extract_strided_slice %195 {offsets = [0, 384], sizes = [8, 128], strides = [1, 1]} : vector<8x512xf32> to vector<8x128xf32>
    %206 = math.tanh %205 : vector<8x128xf32>
    %207 = arith.mulf %203, %190 : vector<8x128xf32>
    %208 = arith.mulf %202, %206 : vector<8x128xf32>
    %209 = arith.addf %207, %208 : vector<8x128xf32>
    %210 = math.tanh %209 : vector<8x128xf32>
    %211 = arith.mulf %204, %210 : vector<8x128xf32>
    %c0_115 = arith.constant 0 : index
    %c0_116 = arith.constant 0 : index
    %c0_117 = arith.constant 0 : index
    %212 = vector.load %arg16[%c0_115, %c0_116, %c0_117] : memref<2x8x128xf32, #tpu.memory_space<vmem>>, vector<1x8x128xf32>
    %213 = vector.shape_cast %212 : vector<1x8x128xf32> to vector<8x128xf32>
    %214 = vector.shape_cast %211 : vector<8x128xf32> to vector<1x8x128xf32>
    tpu.vector_store %arg16[%c0_115, %c0_116, %c0_117], %214 {strides = array<i32>} : memref<2x8x128xf32, #tpu.memory_space<vmem>>, vector<1x8x128xf32>,
    %c0_118 = arith.constant 0 : index
    %c0_119 = arith.constant 0 : index
    %c0_120 = arith.constant 0 : index
    %215 = vector.load %arg17[%c0_118, %c0_119, %c0_120] : memref<2x8x128xf32, #tpu.memory_space<vmem>>, vector<1x8x128xf32>
    %216 = vector.shape_cast %215 : vector<1x8x128xf32> to vector<8x128xf32>
    %217 = vector.shape_cast %209 : vector<8x128xf32> to vector<1x8x128xf32>
    tpu.vector_store %arg17[%c0_118, %c0_119, %c0_120], %217 {strides = array<i32>} : memref<2x8x128xf32, #tpu.memory_space<vmem>>, vector<1x8x128xf32>,
    %218 = arith.index_cast %186 : i32 to index
    %c0_121 = arith.constant 0 : index
    %219 = vector.load %arg15[%218, %c0_121] : memref<64x128xf32, #tpu.memory_space<vmem>>, vector<8x128xf32>
    tpu.vector_store %arg15[%218, %c0_121], %211 {strides = array<i32>} : memref<64x128xf32, #tpu.memory_space<vmem>>, vector<8x128xf32>,
    %c6_i32 = arith.constant 6 : i32
    %c8_i32_122 = arith.constant 8 : i32
    %220 = arith.muli %c6_i32, %c8_i32_122 : i32
    %221 = tpu.assume_multiple %220, 8 : i32
    %c0_123 = arith.constant 0 : index
    %c0_124 = arith.constant 0 : index
    %c0_125 = arith.constant 0 : index
    %222 = vector.load %arg16[%c0_123, %c0_124, %c0_125] : memref<2x8x128xf32, #tpu.memory_space<vmem>>, vector<1x8x128xf32>
    %223 = vector.shape_cast %222 : vector<1x8x128xf32> to vector<8x128xf32>
    %c0_126 = arith.constant 0 : index
    %c0_127 = arith.constant 0 : index
    %c0_128 = arith.constant 0 : index
    %224 = vector.load %arg17[%c0_126, %c0_127, %c0_128] : memref<2x8x128xf32, #tpu.memory_space<vmem>>, vector<1x8x128xf32>
    %225 = vector.shape_cast %224 : vector<1x8x128xf32> to vector<8x128xf32>
    %226 = arith.index_cast %221 : i32 to index
    %c0_129 = arith.constant 0 : index
    %227 = vector.load %arg14[%226, %c0_129] : memref<64x512xf32, #tpu.memory_space<vmem>>, vector<8x512xf32>
    %c0_130 = arith.constant 0 : index
    %c0_131 = arith.constant 0 : index
    %228 = vector.load %arg3[%c0_130, %c0_131] : memref<128x512xf32, #tpu.memory_space<vmem>>, vector<128x512xf32>
    %cst_132 = arith.constant dense<0.000000e+00> : vector<8x512xf32>
    %229 = tpu.matmul %223, %228, %cst_132 {dimension_numbers = #tpu.dot_dimension_numbers<[1], [0], [0], [1], [0, 0, 1, 1], [], []>} : vector<8x128xf32>, vector<128x512xf32>, vector<8x512xf32> -> vector<8x512xf32>
    %230 = arith.addf %227, %229 : vector<8x512xf32>
    %231 = vector.extract_strided_slice %230 {offsets = [0, 0], sizes = [8, 384], strides = [1, 1]} : vector<8x512xf32> to vector<8x384xf32>
    %232 = arith.negf %231 : vector<8x384xf32>
    %233 = math.exp %232 : vector<8x384xf32>
    %cst_133 = arith.constant 1.000000e+00 : f32
    %234 = vector.broadcast %cst_133 : f32 to vector<8x384xf32>
    %235 = arith.addf %234, %233 : vector<8x384xf32>
    %236 = arith.divf %234, %235 : vector<8x384xf32>
    %237 = vector.extract_strided_slice %236 {offsets = [0, 0], sizes = [8, 128], strides = [1, 1]} : vector<8x384xf32> to vector<8x128xf32>
    %238 = vector.extract_strided_slice %236 {offsets = [0, 128], sizes = [8, 128], strides = [1, 1]} : vector<8x384xf32> to vector<8x128xf32>
    %239 = vector.extract_strided_slice %236 {offsets = [0, 256], sizes = [8, 128], strides = [1, 1]} : vector<8x384xf32> to vector<8x128xf32>
    %240 = vector.extract_strided_slice %230 {offsets = [0, 384], sizes = [8, 128], strides = [1, 1]} : vector<8x512xf32> to vector<8x128xf32>
    %241 = math.tanh %240 : vector<8x128xf32>
    %242 = arith.mulf %238, %225 : vector<8x128xf32>
    %243 = arith.mulf %237, %241 : vector<8x128xf32>
    %244 = arith.addf %242, %243 : vector<8x128xf32>
    %245 = math.tanh %244 : vector<8x128xf32>
    %246 = arith.mulf %239, %245 : vector<8x128xf32>
    %c0_134 = arith.constant 0 : index
    %c0_135 = arith.constant 0 : index
    %c0_136 = arith.constant 0 : index
    %247 = vector.load %arg16[%c0_134, %c0_135, %c0_136] : memref<2x8x128xf32, #tpu.memory_space<vmem>>, vector<1x8x128xf32>
    %248 = vector.shape_cast %247 : vector<1x8x128xf32> to vector<8x128xf32>
    %249 = vector.shape_cast %246 : vector<8x128xf32> to vector<1x8x128xf32>
    tpu.vector_store %arg16[%c0_134, %c0_135, %c0_136], %249 {strides = array<i32>} : memref<2x8x128xf32, #tpu.memory_space<vmem>>, vector<1x8x128xf32>,
    %c0_137 = arith.constant 0 : index
    %c0_138 = arith.constant 0 : index
    %c0_139 = arith.constant 0 : index
    %250 = vector.load %arg17[%c0_137, %c0_138, %c0_139] : memref<2x8x128xf32, #tpu.memory_space<vmem>>, vector<1x8x128xf32>
    %251 = vector.shape_cast %250 : vector<1x8x128xf32> to vector<8x128xf32>
    %252 = vector.shape_cast %244 : vector<8x128xf32> to vector<1x8x128xf32>
    tpu.vector_store %arg17[%c0_137, %c0_138, %c0_139], %252 {strides = array<i32>} : memref<2x8x128xf32, #tpu.memory_space<vmem>>, vector<1x8x128xf32>,
    %253 = arith.index_cast %221 : i32 to index
    %c0_140 = arith.constant 0 : index
    %254 = vector.load %arg15[%253, %c0_140] : memref<64x128xf32, #tpu.memory_space<vmem>>, vector<8x128xf32>
    tpu.vector_store %arg15[%253, %c0_140], %246 {strides = array<i32>} : memref<64x128xf32, #tpu.memory_space<vmem>>, vector<8x128xf32>,
    %c7_i32 = arith.constant 7 : i32
    %c8_i32_141 = arith.constant 8 : i32
    %255 = arith.muli %c7_i32, %c8_i32_141 : i32
    %256 = tpu.assume_multiple %255, 8 : i32
    %c0_142 = arith.constant 0 : index
    %c0_143 = arith.constant 0 : index
    %c0_144 = arith.constant 0 : index
    %257 = vector.load %arg16[%c0_142, %c0_143, %c0_144] : memref<2x8x128xf32, #tpu.memory_space<vmem>>, vector<1x8x128xf32>
    %258 = vector.shape_cast %257 : vector<1x8x128xf32> to vector<8x128xf32>
    %c0_145 = arith.constant 0 : index
    %c0_146 = arith.constant 0 : index
    %c0_147 = arith.constant 0 : index
    %259 = vector.load %arg17[%c0_145, %c0_146, %c0_147] : memref<2x8x128xf32, #tpu.memory_space<vmem>>, vector<1x8x128xf32>
    %260 = vector.shape_cast %259 : vector<1x8x128xf32> to vector<8x128xf32>
    %261 = arith.index_cast %256 : i32 to index
    %c0_148 = arith.constant 0 : index
    %262 = vector.load %arg14[%261, %c0_148] : memref<64x512xf32, #tpu.memory_space<vmem>>, vector<8x512xf32>
    %c0_149 = arith.constant 0 : index
    %c0_150 = arith.constant 0 : index
    %263 = vector.load %arg3[%c0_149, %c0_150] : memref<128x512xf32, #tpu.memory_space<vmem>>, vector<128x512xf32>
    %cst_151 = arith.constant dense<0.000000e+00> : vector<8x512xf32>
    %264 = tpu.matmul %258, %263, %cst_151 {dimension_numbers = #tpu.dot_dimension_numbers<[1], [0], [0], [1], [0, 0, 1, 1], [], []>} : vector<8x128xf32>, vector<128x512xf32>, vector<8x512xf32> -> vector<8x512xf32>
    %265 = arith.addf %262, %264 : vector<8x512xf32>
    %266 = vector.extract_strided_slice %265 {offsets = [0, 0], sizes = [8, 384], strides = [1, 1]} : vector<8x512xf32> to vector<8x384xf32>
    %267 = arith.negf %266 : vector<8x384xf32>
    %268 = math.exp %267 : vector<8x384xf32>
    %cst_152 = arith.constant 1.000000e+00 : f32
    %269 = vector.broadcast %cst_152 : f32 to vector<8x384xf32>
    %270 = arith.addf %269, %268 : vector<8x384xf32>
    %271 = arith.divf %269, %270 : vector<8x384xf32>
    %272 = vector.extract_strided_slice %271 {offsets = [0, 0], sizes = [8, 128], strides = [1, 1]} : vector<8x384xf32> to vector<8x128xf32>
    %273 = vector.extract_strided_slice %271 {offsets = [0, 128], sizes = [8, 128], strides = [1, 1]} : vector<8x384xf32> to vector<8x128xf32>
    %274 = vector.extract_strided_slice %271 {offsets = [0, 256], sizes = [8, 128], strides = [1, 1]} : vector<8x384xf32> to vector<8x128xf32>
    %275 = vector.extract_strided_slice %265 {offsets = [0, 384], sizes = [8, 128], strides = [1, 1]} : vector<8x512xf32> to vector<8x128xf32>
    %276 = math.tanh %275 : vector<8x128xf32>
    %277 = arith.mulf %273, %260 : vector<8x128xf32>
    %278 = arith.mulf %272, %276 : vector<8x128xf32>
    %279 = arith.addf %277, %278 : vector<8x128xf32>
    %280 = math.tanh %279 : vector<8x128xf32>
    %281 = arith.mulf %274, %280 : vector<8x128xf32>
    %c0_153 = arith.constant 0 : index
    %c0_154 = arith.constant 0 : index
    %c0_155 = arith.constant 0 : index
    %282 = vector.load %arg16[%c0_153, %c0_154, %c0_155] : memref<2x8x128xf32, #tpu.memory_space<vmem>>, vector<1x8x128xf32>
    %283 = vector.shape_cast %282 : vector<1x8x128xf32> to vector<8x128xf32>
    %284 = vector.shape_cast %281 : vector<8x128xf32> to vector<1x8x128xf32>
    tpu.vector_store %arg16[%c0_153, %c0_154, %c0_155], %284 {strides = array<i32>} : memref<2x8x128xf32, #tpu.memory_space<vmem>>, vector<1x8x128xf32>,
    %c0_156 = arith.constant 0 : index
    %c0_157 = arith.constant 0 : index
    %c0_158 = arith.constant 0 : index
    %285 = vector.load %arg17[%c0_156, %c0_157, %c0_158] : memref<2x8x128xf32, #tpu.memory_space<vmem>>, vector<1x8x128xf32>
    %286 = vector.shape_cast %285 : vector<1x8x128xf32> to vector<8x128xf32>
    %287 = vector.shape_cast %279 : vector<8x128xf32> to vector<1x8x128xf32>
    tpu.vector_store %arg17[%c0_156, %c0_157, %c0_158], %287 {strides = array<i32>} : memref<2x8x128xf32, #tpu.memory_space<vmem>>, vector<1x8x128xf32>,
    %288 = arith.index_cast %256 : i32 to index
    %c0_159 = arith.constant 0 : index
    %289 = vector.load %arg15[%288, %c0_159] : memref<64x128xf32, #tpu.memory_space<vmem>>, vector<8x128xf32>
    tpu.vector_store %arg15[%288, %c0_159], %281 {strides = array<i32>} : memref<64x128xf32, #tpu.memory_space<vmem>>, vector<8x128xf32>,
    %c8_i32_160 = arith.constant 8 : i32
    %c0_161 = arith.constant 0 : index
    %c0_162 = arith.constant 0 : index
    %290 = vector.load %arg15[%c0_161, %c0_162] : memref<64x128xf32, #tpu.memory_space<vmem>>, vector<64x128xf32>
    %c0_163 = arith.constant 0 : index
    %c0_164 = arith.constant 0 : index
    %291 = vector.load %arg5[%c0_163, %c0_164] : memref<128x512xf32, #tpu.memory_space<vmem>>, vector<128x512xf32>
    %cst_165 = arith.constant dense<0.000000e+00> : vector<64x512xf32>
    %292 = tpu.matmul %290, %291, %cst_165 {dimension_numbers = #tpu.dot_dimension_numbers<[1], [0], [0], [1], [0, 0, 1, 1], [], []>} : vector<64x128xf32>, vector<128x512xf32>, vector<64x512xf32> -> vector<64x512xf32>
    %c0_166 = arith.constant 0 : index
    %c0_167 = arith.constant 0 : index
    %293 = vector.load %arg7[%c0_166, %c0_167] : memref<1x512xf32, #tpu.memory_space<vmem>>, vector<1x512xf32>
    %294 = vector.broadcast %293 : vector<1x512xf32> to vector<64x512xf32>
    %295 = arith.addf %292, %294 : vector<64x512xf32>
    %c0_168 = arith.constant 0 : index
    %c0_169 = arith.constant 0 : index
    %296 = vector.load %arg14[%c0_168, %c0_169] : memref<64x512xf32, #tpu.memory_space<vmem>>, vector<64x512xf32>
    tpu.vector_store %arg14[%c0_168, %c0_169], %295 {strides = array<i32>} : memref<64x512xf32, #tpu.memory_space<vmem>>, vector<64x512xf32>,
    %c0_i32_170 = arith.constant 0 : i32
    %c8_i32_171 = arith.constant 8 : i32
    %297 = arith.muli %c0_i32_170, %c8_i32_171 : i32
    %298 = tpu.assume_multiple %297, 8 : i32
    %c1 = arith.constant 1 : index
    %c0_172 = arith.constant 0 : index
    %c0_173 = arith.constant 0 : index
    %299 = vector.load %arg16[%c1, %c0_172, %c0_173] : memref<2x8x128xf32, #tpu.memory_space<vmem>>, vector<1x8x128xf32>
    %300 = vector.shape_cast %299 : vector<1x8x128xf32> to vector<8x128xf32>
    %c1_174 = arith.constant 1 : index
    %c0_175 = arith.constant 0 : index
    %c0_176 = arith.constant 0 : index
    %301 = vector.load %arg17[%c1_174, %c0_175, %c0_176] : memref<2x8x128xf32, #tpu.memory_space<vmem>>, vector<1x8x128xf32>
    %302 = vector.shape_cast %301 : vector<1x8x128xf32> to vector<8x128xf32>
    %303 = arith.index_cast %298 : i32 to index
    %c0_177 = arith.constant 0 : index
    %304 = vector.load %arg14[%303, %c0_177] : memref<64x512xf32, #tpu.memory_space<vmem>>, vector<8x512xf32>
    %c0_178 = arith.constant 0 : index
    %c0_179 = arith.constant 0 : index
    %305 = vector.load %arg6[%c0_178, %c0_179] : memref<128x512xf32, #tpu.memory_space<vmem>>, vector<128x512xf32>
    %cst_180 = arith.constant dense<0.000000e+00> : vector<8x512xf32>
    %306 = tpu.matmul %300, %305, %cst_180 {dimension_numbers = #tpu.dot_dimension_numbers<[1], [0], [0], [1], [0, 0, 1, 1], [], []>} : vector<8x128xf32>, vector<128x512xf32>, vector<8x512xf32> -> vector<8x512xf32>
    %307 = arith.addf %304, %306 : vector<8x512xf32>
    %308 = vector.extract_strided_slice %307 {offsets = [0, 0], sizes = [8, 384], strides = [1, 1]} : vector<8x512xf32> to vector<8x384xf32>
    %309 = arith.negf %308 : vector<8x384xf32>
    %310 = math.exp %309 : vector<8x384xf32>
    %cst_181 = arith.constant 1.000000e+00 : f32
    %311 = vector.broadcast %cst_181 : f32 to vector<8x384xf32>
    %312 = arith.addf %311, %310 : vector<8x384xf32>
    %313 = arith.divf %311, %312 : vector<8x384xf32>
    %314 = vector.extract_strided_slice %313 {offsets = [0, 0], sizes = [8, 128], strides = [1, 1]} : vector<8x384xf32> to vector<8x128xf32>
    %315 = vector.extract_strided_slice %313 {offsets = [0, 128], sizes = [8, 128], strides = [1, 1]} : vector<8x384xf32> to vector<8x128xf32>
    %316 = vector.extract_strided_slice %313 {offsets = [0, 256], sizes = [8, 128], strides = [1, 1]} : vector<8x384xf32> to vector<8x128xf32>
    %317 = vector.extract_strided_slice %307 {offsets = [0, 384], sizes = [8, 128], strides = [1, 1]} : vector<8x512xf32> to vector<8x128xf32>
    %318 = math.tanh %317 : vector<8x128xf32>
    %319 = arith.mulf %315, %302 : vector<8x128xf32>
    %320 = arith.mulf %314, %318 : vector<8x128xf32>
    %321 = arith.addf %319, %320 : vector<8x128xf32>
    %322 = math.tanh %321 : vector<8x128xf32>
    %323 = arith.mulf %316, %322 : vector<8x128xf32>
    %c1_182 = arith.constant 1 : index
    %c0_183 = arith.constant 0 : index
    %c0_184 = arith.constant 0 : index
    %324 = vector.load %arg16[%c1_182, %c0_183, %c0_184] : memref<2x8x128xf32, #tpu.memory_space<vmem>>, vector<1x8x128xf32>
    %325 = vector.shape_cast %324 : vector<1x8x128xf32> to vector<8x128xf32>
    %326 = vector.shape_cast %323 : vector<8x128xf32> to vector<1x8x128xf32>
    tpu.vector_store %arg16[%c1_182, %c0_183, %c0_184], %326 {strides = array<i32>} : memref<2x8x128xf32, #tpu.memory_space<vmem>>, vector<1x8x128xf32>,
    %c1_185 = arith.constant 1 : index
    %c0_186 = arith.constant 0 : index
    %c0_187 = arith.constant 0 : index
    %327 = vector.load %arg17[%c1_185, %c0_186, %c0_187] : memref<2x8x128xf32, #tpu.memory_space<vmem>>, vector<1x8x128xf32>
    %328 = vector.shape_cast %327 : vector<1x8x128xf32> to vector<8x128xf32>
    %329 = vector.shape_cast %321 : vector<8x128xf32> to vector<1x8x128xf32>
    tpu.vector_store %arg17[%c1_185, %c0_186, %c0_187], %329 {strides = array<i32>} : memref<2x8x128xf32, #tpu.memory_space<vmem>>, vector<1x8x128xf32>,
    %330 = arith.index_cast %298 : i32 to index
    %c0_188 = arith.constant 0 : index
    %331 = vector.load %arg15[%330, %c0_188] : memref<64x128xf32, #tpu.memory_space<vmem>>, vector<8x128xf32>
    tpu.vector_store %arg15[%330, %c0_188], %323 {strides = array<i32>} : memref<64x128xf32, #tpu.memory_space<vmem>>, vector<8x128xf32>,
    %c1_i32_189 = arith.constant 1 : i32
    %c8_i32_190 = arith.constant 8 : i32
    %332 = arith.muli %c1_i32_189, %c8_i32_190 : i32
    %333 = tpu.assume_multiple %332, 8 : i32
    %c1_191 = arith.constant 1 : index
    %c0_192 = arith.constant 0 : index
    %c0_193 = arith.constant 0 : index
    %334 = vector.load %arg16[%c1_191, %c0_192, %c0_193] : memref<2x8x128xf32, #tpu.memory_space<vmem>>, vector<1x8x128xf32>
    %335 = vector.shape_cast %334 : vector<1x8x128xf32> to vector<8x128xf32>
    %c1_194 = arith.constant 1 : index
    %c0_195 = arith.constant 0 : index
    %c0_196 = arith.constant 0 : index
    %336 = vector.load %arg17[%c1_194, %c0_195, %c0_196] : memref<2x8x128xf32, #tpu.memory_space<vmem>>, vector<1x8x128xf32>
    %337 = vector.shape_cast %336 : vector<1x8x128xf32> to vector<8x128xf32>
    %338 = arith.index_cast %333 : i32 to index
    %c0_197 = arith.constant 0 : index
    %339 = vector.load %arg14[%338, %c0_197] : memref<64x512xf32, #tpu.memory_space<vmem>>, vector<8x512xf32>
    %c0_198 = arith.constant 0 : index
    %c0_199 = arith.constant 0 : index
    %340 = vector.load %arg6[%c0_198, %c0_199] : memref<128x512xf32, #tpu.memory_space<vmem>>, vector<128x512xf32>
    %cst_200 = arith.constant dense<0.000000e+00> : vector<8x512xf32>
    %341 = tpu.matmul %335, %340, %cst_200 {dimension_numbers = #tpu.dot_dimension_numbers<[1], [0], [0], [1], [0, 0, 1, 1], [], []>} : vector<8x128xf32>, vector<128x512xf32>, vector<8x512xf32> -> vector<8x512xf32>
    %342 = arith.addf %339, %341 : vector<8x512xf32>
    %343 = vector.extract_strided_slice %342 {offsets = [0, 0], sizes = [8, 384], strides = [1, 1]} : vector<8x512xf32> to vector<8x384xf32>
    %344 = arith.negf %343 : vector<8x384xf32>
    %345 = math.exp %344 : vector<8x384xf32>
    %cst_201 = arith.constant 1.000000e+00 : f32
    %346 = vector.broadcast %cst_201 : f32 to vector<8x384xf32>
    %347 = arith.addf %346, %345 : vector<8x384xf32>
    %348 = arith.divf %346, %347 : vector<8x384xf32>
    %349 = vector.extract_strided_slice %348 {offsets = [0, 0], sizes = [8, 128], strides = [1, 1]} : vector<8x384xf32> to vector<8x128xf32>
    %350 = vector.extract_strided_slice %348 {offsets = [0, 128], sizes = [8, 128], strides = [1, 1]} : vector<8x384xf32> to vector<8x128xf32>
    %351 = vector.extract_strided_slice %348 {offsets = [0, 256], sizes = [8, 128], strides = [1, 1]} : vector<8x384xf32> to vector<8x128xf32>
    %352 = vector.extract_strided_slice %342 {offsets = [0, 384], sizes = [8, 128], strides = [1, 1]} : vector<8x512xf32> to vector<8x128xf32>
    %353 = math.tanh %352 : vector<8x128xf32>
    %354 = arith.mulf %350, %337 : vector<8x128xf32>
    %355 = arith.mulf %349, %353 : vector<8x128xf32>
    %356 = arith.addf %354, %355 : vector<8x128xf32>
    %357 = math.tanh %356 : vector<8x128xf32>
    %358 = arith.mulf %351, %357 : vector<8x128xf32>
    %c1_202 = arith.constant 1 : index
    %c0_203 = arith.constant 0 : index
    %c0_204 = arith.constant 0 : index
    %359 = vector.load %arg16[%c1_202, %c0_203, %c0_204] : memref<2x8x128xf32, #tpu.memory_space<vmem>>, vector<1x8x128xf32>
    %360 = vector.shape_cast %359 : vector<1x8x128xf32> to vector<8x128xf32>
    %361 = vector.shape_cast %358 : vector<8x128xf32> to vector<1x8x128xf32>
    tpu.vector_store %arg16[%c1_202, %c0_203, %c0_204], %361 {strides = array<i32>} : memref<2x8x128xf32, #tpu.memory_space<vmem>>, vector<1x8x128xf32>,
    %c1_205 = arith.constant 1 : index
    %c0_206 = arith.constant 0 : index
    %c0_207 = arith.constant 0 : index
    %362 = vector.load %arg17[%c1_205, %c0_206, %c0_207] : memref<2x8x128xf32, #tpu.memory_space<vmem>>, vector<1x8x128xf32>
    %363 = vector.shape_cast %362 : vector<1x8x128xf32> to vector<8x128xf32>
    %364 = vector.shape_cast %356 : vector<8x128xf32> to vector<1x8x128xf32>
    tpu.vector_store %arg17[%c1_205, %c0_206, %c0_207], %364 {strides = array<i32>} : memref<2x8x128xf32, #tpu.memory_space<vmem>>, vector<1x8x128xf32>,
    %365 = arith.index_cast %333 : i32 to index
    %c0_208 = arith.constant 0 : index
    %366 = vector.load %arg15[%365, %c0_208] : memref<64x128xf32, #tpu.memory_space<vmem>>, vector<8x128xf32>
    tpu.vector_store %arg15[%365, %c0_208], %358 {strides = array<i32>} : memref<64x128xf32, #tpu.memory_space<vmem>>, vector<8x128xf32>,
    %c2_i32_209 = arith.constant 2 : i32
    %c8_i32_210 = arith.constant 8 : i32
    %367 = arith.muli %c2_i32_209, %c8_i32_210 : i32
    %368 = tpu.assume_multiple %367, 8 : i32
    %c1_211 = arith.constant 1 : index
    %c0_212 = arith.constant 0 : index
    %c0_213 = arith.constant 0 : index
    %369 = vector.load %arg16[%c1_211, %c0_212, %c0_213] : memref<2x8x128xf32, #tpu.memory_space<vmem>>, vector<1x8x128xf32>
    %370 = vector.shape_cast %369 : vector<1x8x128xf32> to vector<8x128xf32>
    %c1_214 = arith.constant 1 : index
    %c0_215 = arith.constant 0 : index
    %c0_216 = arith.constant 0 : index
    %371 = vector.load %arg17[%c1_214, %c0_215, %c0_216] : memref<2x8x128xf32, #tpu.memory_space<vmem>>, vector<1x8x128xf32>
    %372 = vector.shape_cast %371 : vector<1x8x128xf32> to vector<8x128xf32>
    %373 = arith.index_cast %368 : i32 to index
    %c0_217 = arith.constant 0 : index
    %374 = vector.load %arg14[%373, %c0_217] : memref<64x512xf32, #tpu.memory_space<vmem>>, vector<8x512xf32>
    %c0_218 = arith.constant 0 : index
    %c0_219 = arith.constant 0 : index
    %375 = vector.load %arg6[%c0_218, %c0_219] : memref<128x512xf32, #tpu.memory_space<vmem>>, vector<128x512xf32>
    %cst_220 = arith.constant dense<0.000000e+00> : vector<8x512xf32>
    %376 = tpu.matmul %370, %375, %cst_220 {dimension_numbers = #tpu.dot_dimension_numbers<[1], [0], [0], [1], [0, 0, 1, 1], [], []>} : vector<8x128xf32>, vector<128x512xf32>, vector<8x512xf32> -> vector<8x512xf32>
    %377 = arith.addf %374, %376 : vector<8x512xf32>
    %378 = vector.extract_strided_slice %377 {offsets = [0, 0], sizes = [8, 384], strides = [1, 1]} : vector<8x512xf32> to vector<8x384xf32>
    %379 = arith.negf %378 : vector<8x384xf32>
    %380 = math.exp %379 : vector<8x384xf32>
    %cst_221 = arith.constant 1.000000e+00 : f32
    %381 = vector.broadcast %cst_221 : f32 to vector<8x384xf32>
    %382 = arith.addf %381, %380 : vector<8x384xf32>
    %383 = arith.divf %381, %382 : vector<8x384xf32>
    %384 = vector.extract_strided_slice %383 {offsets = [0, 0], sizes = [8, 128], strides = [1, 1]} : vector<8x384xf32> to vector<8x128xf32>
    %385 = vector.extract_strided_slice %383 {offsets = [0, 128], sizes = [8, 128], strides = [1, 1]} : vector<8x384xf32> to vector<8x128xf32>
    %386 = vector.extract_strided_slice %383 {offsets = [0, 256], sizes = [8, 128], strides = [1, 1]} : vector<8x384xf32> to vector<8x128xf32>
    %387 = vector.extract_strided_slice %377 {offsets = [0, 384], sizes = [8, 128], strides = [1, 1]} : vector<8x512xf32> to vector<8x128xf32>
    %388 = math.tanh %387 : vector<8x128xf32>
    %389 = arith.mulf %385, %372 : vector<8x128xf32>
    %390 = arith.mulf %384, %388 : vector<8x128xf32>
    %391 = arith.addf %389, %390 : vector<8x128xf32>
    %392 = math.tanh %391 : vector<8x128xf32>
    %393 = arith.mulf %386, %392 : vector<8x128xf32>
    %c1_222 = arith.constant 1 : index
    %c0_223 = arith.constant 0 : index
    %c0_224 = arith.constant 0 : index
    %394 = vector.load %arg16[%c1_222, %c0_223, %c0_224] : memref<2x8x128xf32, #tpu.memory_space<vmem>>, vector<1x8x128xf32>
    %395 = vector.shape_cast %394 : vector<1x8x128xf32> to vector<8x128xf32>
    %396 = vector.shape_cast %393 : vector<8x128xf32> to vector<1x8x128xf32>
    tpu.vector_store %arg16[%c1_222, %c0_223, %c0_224], %396 {strides = array<i32>} : memref<2x8x128xf32, #tpu.memory_space<vmem>>, vector<1x8x128xf32>,
    %c1_225 = arith.constant 1 : index
    %c0_226 = arith.constant 0 : index
    %c0_227 = arith.constant 0 : index
    %397 = vector.load %arg17[%c1_225, %c0_226, %c0_227] : memref<2x8x128xf32, #tpu.memory_space<vmem>>, vector<1x8x128xf32>
    %398 = vector.shape_cast %397 : vector<1x8x128xf32> to vector<8x128xf32>
    %399 = vector.shape_cast %391 : vector<8x128xf32> to vector<1x8x128xf32>
    tpu.vector_store %arg17[%c1_225, %c0_226, %c0_227], %399 {strides = array<i32>} : memref<2x8x128xf32, #tpu.memory_space<vmem>>, vector<1x8x128xf32>,
    %400 = arith.index_cast %368 : i32 to index
    %c0_228 = arith.constant 0 : index
    %401 = vector.load %arg15[%400, %c0_228] : memref<64x128xf32, #tpu.memory_space<vmem>>, vector<8x128xf32>
    tpu.vector_store %arg15[%400, %c0_228], %393 {strides = array<i32>} : memref<64x128xf32, #tpu.memory_space<vmem>>, vector<8x128xf32>,
    %c3_i32_229 = arith.constant 3 : i32
    %c8_i32_230 = arith.constant 8 : i32
    %402 = arith.muli %c3_i32_229, %c8_i32_230 : i32
    %403 = tpu.assume_multiple %402, 8 : i32
    %c1_231 = arith.constant 1 : index
    %c0_232 = arith.constant 0 : index
    %c0_233 = arith.constant 0 : index
    %404 = vector.load %arg16[%c1_231, %c0_232, %c0_233] : memref<2x8x128xf32, #tpu.memory_space<vmem>>, vector<1x8x128xf32>
    %405 = vector.shape_cast %404 : vector<1x8x128xf32> to vector<8x128xf32>
    %c1_234 = arith.constant 1 : index
    %c0_235 = arith.constant 0 : index
    %c0_236 = arith.constant 0 : index
    %406 = vector.load %arg17[%c1_234, %c0_235, %c0_236] : memref<2x8x128xf32, #tpu.memory_space<vmem>>, vector<1x8x128xf32>
    %407 = vector.shape_cast %406 : vector<1x8x128xf32> to vector<8x128xf32>
    %408 = arith.index_cast %403 : i32 to index
    %c0_237 = arith.constant 0 : index
    %409 = vector.load %arg14[%408, %c0_237] : memref<64x512xf32, #tpu.memory_space<vmem>>, vector<8x512xf32>
    %c0_238 = arith.constant 0 : index
    %c0_239 = arith.constant 0 : index
    %410 = vector.load %arg6[%c0_238, %c0_239] : memref<128x512xf32, #tpu.memory_space<vmem>>, vector<128x512xf32>
    %cst_240 = arith.constant dense<0.000000e+00> : vector<8x512xf32>
    %411 = tpu.matmul %405, %410, %cst_240 {dimension_numbers = #tpu.dot_dimension_numbers<[1], [0], [0], [1], [0, 0, 1, 1], [], []>} : vector<8x128xf32>, vector<128x512xf32>, vector<8x512xf32> -> vector<8x512xf32>
    %412 = arith.addf %409, %411 : vector<8x512xf32>
    %413 = vector.extract_strided_slice %412 {offsets = [0, 0], sizes = [8, 384], strides = [1, 1]} : vector<8x512xf32> to vector<8x384xf32>
    %414 = arith.negf %413 : vector<8x384xf32>
    %415 = math.exp %414 : vector<8x384xf32>
    %cst_241 = arith.constant 1.000000e+00 : f32
    %416 = vector.broadcast %cst_241 : f32 to vector<8x384xf32>
    %417 = arith.addf %416, %415 : vector<8x384xf32>
    %418 = arith.divf %416, %417 : vector<8x384xf32>
    %419 = vector.extract_strided_slice %418 {offsets = [0, 0], sizes = [8, 128], strides = [1, 1]} : vector<8x384xf32> to vector<8x128xf32>
    %420 = vector.extract_strided_slice %418 {offsets = [0, 128], sizes = [8, 128], strides = [1, 1]} : vector<8x384xf32> to vector<8x128xf32>
    %421 = vector.extract_strided_slice %418 {offsets = [0, 256], sizes = [8, 128], strides = [1, 1]} : vector<8x384xf32> to vector<8x128xf32>
    %422 = vector.extract_strided_slice %412 {offsets = [0, 384], sizes = [8, 128], strides = [1, 1]} : vector<8x512xf32> to vector<8x128xf32>
    %423 = math.tanh %422 : vector<8x128xf32>
    %424 = arith.mulf %420, %407 : vector<8x128xf32>
    %425 = arith.mulf %419, %423 : vector<8x128xf32>
    %426 = arith.addf %424, %425 : vector<8x128xf32>
    %427 = math.tanh %426 : vector<8x128xf32>
    %428 = arith.mulf %421, %427 : vector<8x128xf32>
    %c1_242 = arith.constant 1 : index
    %c0_243 = arith.constant 0 : index
    %c0_244 = arith.constant 0 : index
    %429 = vector.load %arg16[%c1_242, %c0_243, %c0_244] : memref<2x8x128xf32, #tpu.memory_space<vmem>>, vector<1x8x128xf32>
    %430 = vector.shape_cast %429 : vector<1x8x128xf32> to vector<8x128xf32>
    %431 = vector.shape_cast %428 : vector<8x128xf32> to vector<1x8x128xf32>
    tpu.vector_store %arg16[%c1_242, %c0_243, %c0_244], %431 {strides = array<i32>} : memref<2x8x128xf32, #tpu.memory_space<vmem>>, vector<1x8x128xf32>,
    %c1_245 = arith.constant 1 : index
    %c0_246 = arith.constant 0 : index
    %c0_247 = arith.constant 0 : index
    %432 = vector.load %arg17[%c1_245, %c0_246, %c0_247] : memref<2x8x128xf32, #tpu.memory_space<vmem>>, vector<1x8x128xf32>
    %433 = vector.shape_cast %432 : vector<1x8x128xf32> to vector<8x128xf32>
    %434 = vector.shape_cast %426 : vector<8x128xf32> to vector<1x8x128xf32>
    tpu.vector_store %arg17[%c1_245, %c0_246, %c0_247], %434 {strides = array<i32>} : memref<2x8x128xf32, #tpu.memory_space<vmem>>, vector<1x8x128xf32>,
    %435 = arith.index_cast %403 : i32 to index
    %c0_248 = arith.constant 0 : index
    %436 = vector.load %arg15[%435, %c0_248] : memref<64x128xf32, #tpu.memory_space<vmem>>, vector<8x128xf32>
    tpu.vector_store %arg15[%435, %c0_248], %428 {strides = array<i32>} : memref<64x128xf32, #tpu.memory_space<vmem>>, vector<8x128xf32>,
    %c4_i32_249 = arith.constant 4 : i32
    %c8_i32_250 = arith.constant 8 : i32
    %437 = arith.muli %c4_i32_249, %c8_i32_250 : i32
    %438 = tpu.assume_multiple %437, 8 : i32
    %c1_251 = arith.constant 1 : index
    %c0_252 = arith.constant 0 : index
    %c0_253 = arith.constant 0 : index
    %439 = vector.load %arg16[%c1_251, %c0_252, %c0_253] : memref<2x8x128xf32, #tpu.memory_space<vmem>>, vector<1x8x128xf32>
    %440 = vector.shape_cast %439 : vector<1x8x128xf32> to vector<8x128xf32>
    %c1_254 = arith.constant 1 : index
    %c0_255 = arith.constant 0 : index
    %c0_256 = arith.constant 0 : index
    %441 = vector.load %arg17[%c1_254, %c0_255, %c0_256] : memref<2x8x128xf32, #tpu.memory_space<vmem>>, vector<1x8x128xf32>
    %442 = vector.shape_cast %441 : vector<1x8x128xf32> to vector<8x128xf32>
    %443 = arith.index_cast %438 : i32 to index
    %c0_257 = arith.constant 0 : index
    %444 = vector.load %arg14[%443, %c0_257] : memref<64x512xf32, #tpu.memory_space<vmem>>, vector<8x512xf32>
    %c0_258 = arith.constant 0 : index
    %c0_259 = arith.constant 0 : index
    %445 = vector.load %arg6[%c0_258, %c0_259] : memref<128x512xf32, #tpu.memory_space<vmem>>, vector<128x512xf32>
    %cst_260 = arith.constant dense<0.000000e+00> : vector<8x512xf32>
    %446 = tpu.matmul %440, %445, %cst_260 {dimension_numbers = #tpu.dot_dimension_numbers<[1], [0], [0], [1], [0, 0, 1, 1], [], []>} : vector<8x128xf32>, vector<128x512xf32>, vector<8x512xf32> -> vector<8x512xf32>
    %447 = arith.addf %444, %446 : vector<8x512xf32>
    %448 = vector.extract_strided_slice %447 {offsets = [0, 0], sizes = [8, 384], strides = [1, 1]} : vector<8x512xf32> to vector<8x384xf32>
    %449 = arith.negf %448 : vector<8x384xf32>
    %450 = math.exp %449 : vector<8x384xf32>
    %cst_261 = arith.constant 1.000000e+00 : f32
    %451 = vector.broadcast %cst_261 : f32 to vector<8x384xf32>
    %452 = arith.addf %451, %450 : vector<8x384xf32>
    %453 = arith.divf %451, %452 : vector<8x384xf32>
    %454 = vector.extract_strided_slice %453 {offsets = [0, 0], sizes = [8, 128], strides = [1, 1]} : vector<8x384xf32> to vector<8x128xf32>
    %455 = vector.extract_strided_slice %453 {offsets = [0, 128], sizes = [8, 128], strides = [1, 1]} : vector<8x384xf32> to vector<8x128xf32>
    %456 = vector.extract_strided_slice %453 {offsets = [0, 256], sizes = [8, 128], strides = [1, 1]} : vector<8x384xf32> to vector<8x128xf32>
    %457 = vector.extract_strided_slice %447 {offsets = [0, 384], sizes = [8, 128], strides = [1, 1]} : vector<8x512xf32> to vector<8x128xf32>
    %458 = math.tanh %457 : vector<8x128xf32>
    %459 = arith.mulf %455, %442 : vector<8x128xf32>
    %460 = arith.mulf %454, %458 : vector<8x128xf32>
    %461 = arith.addf %459, %460 : vector<8x128xf32>
    %462 = math.tanh %461 : vector<8x128xf32>
    %463 = arith.mulf %456, %462 : vector<8x128xf32>
    %c1_262 = arith.constant 1 : index
    %c0_263 = arith.constant 0 : index
    %c0_264 = arith.constant 0 : index
    %464 = vector.load %arg16[%c1_262, %c0_263, %c0_264] : memref<2x8x128xf32, #tpu.memory_space<vmem>>, vector<1x8x128xf32>
    %465 = vector.shape_cast %464 : vector<1x8x128xf32> to vector<8x128xf32>
    %466 = vector.shape_cast %463 : vector<8x128xf32> to vector<1x8x128xf32>
    tpu.vector_store %arg16[%c1_262, %c0_263, %c0_264], %466 {strides = array<i32>} : memref<2x8x128xf32, #tpu.memory_space<vmem>>, vector<1x8x128xf32>,
    %c1_265 = arith.constant 1 : index
    %c0_266 = arith.constant 0 : index
    %c0_267 = arith.constant 0 : index
    %467 = vector.load %arg17[%c1_265, %c0_266, %c0_267] : memref<2x8x128xf32, #tpu.memory_space<vmem>>, vector<1x8x128xf32>
    %468 = vector.shape_cast %467 : vector<1x8x128xf32> to vector<8x128xf32>
    %469 = vector.shape_cast %461 : vector<8x128xf32> to vector<1x8x128xf32>
    tpu.vector_store %arg17[%c1_265, %c0_266, %c0_267], %469 {strides = array<i32>} : memref<2x8x128xf32, #tpu.memory_space<vmem>>, vector<1x8x128xf32>,
    %470 = arith.index_cast %438 : i32 to index
    %c0_268 = arith.constant 0 : index
    %471 = vector.load %arg15[%470, %c0_268] : memref<64x128xf32, #tpu.memory_space<vmem>>, vector<8x128xf32>
    tpu.vector_store %arg15[%470, %c0_268], %463 {strides = array<i32>} : memref<64x128xf32, #tpu.memory_space<vmem>>, vector<8x128xf32>,
    %c5_i32_269 = arith.constant 5 : i32
    %c8_i32_270 = arith.constant 8 : i32
    %472 = arith.muli %c5_i32_269, %c8_i32_270 : i32
    %473 = tpu.assume_multiple %472, 8 : i32
    %c1_271 = arith.constant 1 : index
    %c0_272 = arith.constant 0 : index
    %c0_273 = arith.constant 0 : index
    %474 = vector.load %arg16[%c1_271, %c0_272, %c0_273] : memref<2x8x128xf32, #tpu.memory_space<vmem>>, vector<1x8x128xf32>
    %475 = vector.shape_cast %474 : vector<1x8x128xf32> to vector<8x128xf32>
    %c1_274 = arith.constant 1 : index
    %c0_275 = arith.constant 0 : index
    %c0_276 = arith.constant 0 : index
    %476 = vector.load %arg17[%c1_274, %c0_275, %c0_276] : memref<2x8x128xf32, #tpu.memory_space<vmem>>, vector<1x8x128xf32>
    %477 = vector.shape_cast %476 : vector<1x8x128xf32> to vector<8x128xf32>
    %478 = arith.index_cast %473 : i32 to index
    %c0_277 = arith.constant 0 : index
    %479 = vector.load %arg14[%478, %c0_277] : memref<64x512xf32, #tpu.memory_space<vmem>>, vector<8x512xf32>
    %c0_278 = arith.constant 0 : index
    %c0_279 = arith.constant 0 : index
    %480 = vector.load %arg6[%c0_278, %c0_279] : memref<128x512xf32, #tpu.memory_space<vmem>>, vector<128x512xf32>
    %cst_280 = arith.constant dense<0.000000e+00> : vector<8x512xf32>
    %481 = tpu.matmul %475, %480, %cst_280 {dimension_numbers = #tpu.dot_dimension_numbers<[1], [0], [0], [1], [0, 0, 1, 1], [], []>} : vector<8x128xf32>, vector<128x512xf32>, vector<8x512xf32> -> vector<8x512xf32>
    %482 = arith.addf %479, %481 : vector<8x512xf32>
    %483 = vector.extract_strided_slice %482 {offsets = [0, 0], sizes = [8, 384], strides = [1, 1]} : vector<8x512xf32> to vector<8x384xf32>
    %484 = arith.negf %483 : vector<8x384xf32>
    %485 = math.exp %484 : vector<8x384xf32>
    %cst_281 = arith.constant 1.000000e+00 : f32
    %486 = vector.broadcast %cst_281 : f32 to vector<8x384xf32>
    %487 = arith.addf %486, %485 : vector<8x384xf32>
    %488 = arith.divf %486, %487 : vector<8x384xf32>
    %489 = vector.extract_strided_slice %488 {offsets = [0, 0], sizes = [8, 128], strides = [1, 1]} : vector<8x384xf32> to vector<8x128xf32>
    %490 = vector.extract_strided_slice %488 {offsets = [0, 128], sizes = [8, 128], strides = [1, 1]} : vector<8x384xf32> to vector<8x128xf32>
    %491 = vector.extract_strided_slice %488 {offsets = [0, 256], sizes = [8, 128], strides = [1, 1]} : vector<8x384xf32> to vector<8x128xf32>
    %492 = vector.extract_strided_slice %482 {offsets = [0, 384], sizes = [8, 128], strides = [1, 1]} : vector<8x512xf32> to vector<8x128xf32>
    %493 = math.tanh %492 : vector<8x128xf32>
    %494 = arith.mulf %490, %477 : vector<8x128xf32>
    %495 = arith.mulf %489, %493 : vector<8x128xf32>
    %496 = arith.addf %494, %495 : vector<8x128xf32>
    %497 = math.tanh %496 : vector<8x128xf32>
    %498 = arith.mulf %491, %497 : vector<8x128xf32>
    %c1_282 = arith.constant 1 : index
    %c0_283 = arith.constant 0 : index
    %c0_284 = arith.constant 0 : index
    %499 = vector.load %arg16[%c1_282, %c0_283, %c0_284] : memref<2x8x128xf32, #tpu.memory_space<vmem>>, vector<1x8x128xf32>
    %500 = vector.shape_cast %499 : vector<1x8x128xf32> to vector<8x128xf32>
    %501 = vector.shape_cast %498 : vector<8x128xf32> to vector<1x8x128xf32>
    tpu.vector_store %arg16[%c1_282, %c0_283, %c0_284], %501 {strides = array<i32>} : memref<2x8x128xf32, #tpu.memory_space<vmem>>, vector<1x8x128xf32>,
    %c1_285 = arith.constant 1 : index
    %c0_286 = arith.constant 0 : index
    %c0_287 = arith.constant 0 : index
    %502 = vector.load %arg17[%c1_285, %c0_286, %c0_287] : memref<2x8x128xf32, #tpu.memory_space<vmem>>, vector<1x8x128xf32>
    %503 = vector.shape_cast %502 : vector<1x8x128xf32> to vector<8x128xf32>
    %504 = vector.shape_cast %496 : vector<8x128xf32> to vector<1x8x128xf32>
    tpu.vector_store %arg17[%c1_285, %c0_286, %c0_287], %504 {strides = array<i32>} : memref<2x8x128xf32, #tpu.memory_space<vmem>>, vector<1x8x128xf32>,
    %505 = arith.index_cast %473 : i32 to index
    %c0_288 = arith.constant 0 : index
    %506 = vector.load %arg15[%505, %c0_288] : memref<64x128xf32, #tpu.memory_space<vmem>>, vector<8x128xf32>
    tpu.vector_store %arg15[%505, %c0_288], %498 {strides = array<i32>} : memref<64x128xf32, #tpu.memory_space<vmem>>, vector<8x128xf32>,
    %c6_i32_289 = arith.constant 6 : i32
    %c8_i32_290 = arith.constant 8 : i32
    %507 = arith.muli %c6_i32_289, %c8_i32_290 : i32
    %508 = tpu.assume_multiple %507, 8 : i32
    %c1_291 = arith.constant 1 : index
    %c0_292 = arith.constant 0 : index
    %c0_293 = arith.constant 0 : index
    %509 = vector.load %arg16[%c1_291, %c0_292, %c0_293] : memref<2x8x128xf32, #tpu.memory_space<vmem>>, vector<1x8x128xf32>
    %510 = vector.shape_cast %509 : vector<1x8x128xf32> to vector<8x128xf32>
    %c1_294 = arith.constant 1 : index
    %c0_295 = arith.constant 0 : index
    %c0_296 = arith.constant 0 : index
    %511 = vector.load %arg17[%c1_294, %c0_295, %c0_296] : memref<2x8x128xf32, #tpu.memory_space<vmem>>, vector<1x8x128xf32>
    %512 = vector.shape_cast %511 : vector<1x8x128xf32> to vector<8x128xf32>
    %513 = arith.index_cast %508 : i32 to index
    %c0_297 = arith.constant 0 : index
    %514 = vector.load %arg14[%513, %c0_297] : memref<64x512xf32, #tpu.memory_space<vmem>>, vector<8x512xf32>
    %c0_298 = arith.constant 0 : index
    %c0_299 = arith.constant 0 : index
    %515 = vector.load %arg6[%c0_298, %c0_299] : memref<128x512xf32, #tpu.memory_space<vmem>>, vector<128x512xf32>
    %cst_300 = arith.constant dense<0.000000e+00> : vector<8x512xf32>
    %516 = tpu.matmul %510, %515, %cst_300 {dimension_numbers = #tpu.dot_dimension_numbers<[1], [0], [0], [1], [0, 0, 1, 1], [], []>} : vector<8x128xf32>, vector<128x512xf32>, vector<8x512xf32> -> vector<8x512xf32>
    %517 = arith.addf %514, %516 : vector<8x512xf32>
    %518 = vector.extract_strided_slice %517 {offsets = [0, 0], sizes = [8, 384], strides = [1, 1]} : vector<8x512xf32> to vector<8x384xf32>
    %519 = arith.negf %518 : vector<8x384xf32>
    %520 = math.exp %519 : vector<8x384xf32>
    %cst_301 = arith.constant 1.000000e+00 : f32
    %521 = vector.broadcast %cst_301 : f32 to vector<8x384xf32>
    %522 = arith.addf %521, %520 : vector<8x384xf32>
    %523 = arith.divf %521, %522 : vector<8x384xf32>
    %524 = vector.extract_strided_slice %523 {offsets = [0, 0], sizes = [8, 128], strides = [1, 1]} : vector<8x384xf32> to vector<8x128xf32>
    %525 = vector.extract_strided_slice %523 {offsets = [0, 128], sizes = [8, 128], strides = [1, 1]} : vector<8x384xf32> to vector<8x128xf32>
    %526 = vector.extract_strided_slice %523 {offsets = [0, 256], sizes = [8, 128], strides = [1, 1]} : vector<8x384xf32> to vector<8x128xf32>
    %527 = vector.extract_strided_slice %517 {offsets = [0, 384], sizes = [8, 128], strides = [1, 1]} : vector<8x512xf32> to vector<8x128xf32>
    %528 = math.tanh %527 : vector<8x128xf32>
    %529 = arith.mulf %525, %512 : vector<8x128xf32>
    %530 = arith.mulf %524, %528 : vector<8x128xf32>
    %531 = arith.addf %529, %530 : vector<8x128xf32>
    %532 = math.tanh %531 : vector<8x128xf32>
    %533 = arith.mulf %526, %532 : vector<8x128xf32>
    %c1_302 = arith.constant 1 : index
    %c0_303 = arith.constant 0 : index
    %c0_304 = arith.constant 0 : index
    %534 = vector.load %arg16[%c1_302, %c0_303, %c0_304] : memref<2x8x128xf32, #tpu.memory_space<vmem>>, vector<1x8x128xf32>
    %535 = vector.shape_cast %534 : vector<1x8x128xf32> to vector<8x128xf32>
    %536 = vector.shape_cast %533 : vector<8x128xf32> to vector<1x8x128xf32>
    tpu.vector_store %arg16[%c1_302, %c0_303, %c0_304], %536 {strides = array<i32>} : memref<2x8x128xf32, #tpu.memory_space<vmem>>, vector<1x8x128xf32>,
    %c1_305 = arith.constant 1 : index
    %c0_306 = arith.constant 0 : index
    %c0_307 = arith.constant 0 : index
    %537 = vector.load %arg17[%c1_305, %c0_306, %c0_307] : memref<2x8x128xf32, #tpu.memory_space<vmem>>, vector<1x8x128xf32>
    %538 = vector.shape_cast %537 : vector<1x8x128xf32> to vector<8x128xf32>
    %539 = vector.shape_cast %531 : vector<8x128xf32> to vector<1x8x128xf32>
    tpu.vector_store %arg17[%c1_305, %c0_306, %c0_307], %539 {strides = array<i32>} : memref<2x8x128xf32, #tpu.memory_space<vmem>>, vector<1x8x128xf32>,
    %540 = arith.index_cast %508 : i32 to index
    %c0_308 = arith.constant 0 : index
    %541 = vector.load %arg15[%540, %c0_308] : memref<64x128xf32, #tpu.memory_space<vmem>>, vector<8x128xf32>
    tpu.vector_store %arg15[%540, %c0_308], %533 {strides = array<i32>} : memref<64x128xf32, #tpu.memory_space<vmem>>, vector<8x128xf32>,
    %c7_i32_309 = arith.constant 7 : i32
    %c8_i32_310 = arith.constant 8 : i32
    %542 = arith.muli %c7_i32_309, %c8_i32_310 : i32
    %543 = tpu.assume_multiple %542, 8 : i32
    %c1_311 = arith.constant 1 : index
    %c0_312 = arith.constant 0 : index
    %c0_313 = arith.constant 0 : index
    %544 = vector.load %arg16[%c1_311, %c0_312, %c0_313] : memref<2x8x128xf32, #tpu.memory_space<vmem>>, vector<1x8x128xf32>
    %545 = vector.shape_cast %544 : vector<1x8x128xf32> to vector<8x128xf32>
    %c1_314 = arith.constant 1 : index
    %c0_315 = arith.constant 0 : index
    %c0_316 = arith.constant 0 : index
    %546 = vector.load %arg17[%c1_314, %c0_315, %c0_316] : memref<2x8x128xf32, #tpu.memory_space<vmem>>, vector<1x8x128xf32>
    %547 = vector.shape_cast %546 : vector<1x8x128xf32> to vector<8x128xf32>
    %548 = arith.index_cast %543 : i32 to index
    %c0_317 = arith.constant 0 : index
    %549 = vector.load %arg14[%548, %c0_317] : memref<64x512xf32, #tpu.memory_space<vmem>>, vector<8x512xf32>
    %c0_318 = arith.constant 0 : index
    %c0_319 = arith.constant 0 : index
    %550 = vector.load %arg6[%c0_318, %c0_319] : memref<128x512xf32, #tpu.memory_space<vmem>>, vector<128x512xf32>
    %cst_320 = arith.constant dense<0.000000e+00> : vector<8x512xf32>
    %551 = tpu.matmul %545, %550, %cst_320 {dimension_numbers = #tpu.dot_dimension_numbers<[1], [0], [0], [1], [0, 0, 1, 1], [], []>} : vector<8x128xf32>, vector<128x512xf32>, vector<8x512xf32> -> vector<8x512xf32>
    %552 = arith.addf %549, %551 : vector<8x512xf32>
    %553 = vector.extract_strided_slice %552 {offsets = [0, 0], sizes = [8, 384], strides = [1, 1]} : vector<8x512xf32> to vector<8x384xf32>
    %554 = arith.negf %553 : vector<8x384xf32>
    %555 = math.exp %554 : vector<8x384xf32>
    %cst_321 = arith.constant 1.000000e+00 : f32
    %556 = vector.broadcast %cst_321 : f32 to vector<8x384xf32>
    %557 = arith.addf %556, %555 : vector<8x384xf32>
    %558 = arith.divf %556, %557 : vector<8x384xf32>
    %559 = vector.extract_strided_slice %558 {offsets = [0, 0], sizes = [8, 128], strides = [1, 1]} : vector<8x384xf32> to vector<8x128xf32>
    %560 = vector.extract_strided_slice %558 {offsets = [0, 128], sizes = [8, 128], strides = [1, 1]} : vector<8x384xf32> to vector<8x128xf32>
    %561 = vector.extract_strided_slice %558 {offsets = [0, 256], sizes = [8, 128], strides = [1, 1]} : vector<8x384xf32> to vector<8x128xf32>
    %562 = vector.extract_strided_slice %552 {offsets = [0, 384], sizes = [8, 128], strides = [1, 1]} : vector<8x512xf32> to vector<8x128xf32>
    %563 = math.tanh %562 : vector<8x128xf32>
    %564 = arith.mulf %560, %547 : vector<8x128xf32>
    %565 = arith.mulf %559, %563 : vector<8x128xf32>
    %566 = arith.addf %564, %565 : vector<8x128xf32>
    %567 = math.tanh %566 : vector<8x128xf32>
    %568 = arith.mulf %561, %567 : vector<8x128xf32>
    %c1_322 = arith.constant 1 : index
    %c0_323 = arith.constant 0 : index
    %c0_324 = arith.constant 0 : index
    %569 = vector.load %arg16[%c1_322, %c0_323, %c0_324] : memref<2x8x128xf32, #tpu.memory_space<vmem>>, vector<1x8x128xf32>
    %570 = vector.shape_cast %569 : vector<1x8x128xf32> to vector<8x128xf32>
    %571 = vector.shape_cast %568 : vector<8x128xf32> to vector<1x8x128xf32>
    tpu.vector_store %arg16[%c1_322, %c0_323, %c0_324], %571 {strides = array<i32>} : memref<2x8x128xf32, #tpu.memory_space<vmem>>, vector<1x8x128xf32>,
    %c1_325 = arith.constant 1 : index
    %c0_326 = arith.constant 0 : index
    %c0_327 = arith.constant 0 : index
    %572 = vector.load %arg17[%c1_325, %c0_326, %c0_327] : memref<2x8x128xf32, #tpu.memory_space<vmem>>, vector<1x8x128xf32>
    %573 = vector.shape_cast %572 : vector<1x8x128xf32> to vector<8x128xf32>
    %574 = vector.shape_cast %566 : vector<8x128xf32> to vector<1x8x128xf32>
    tpu.vector_store %arg17[%c1_325, %c0_326, %c0_327], %574 {strides = array<i32>} : memref<2x8x128xf32, #tpu.memory_space<vmem>>, vector<1x8x128xf32>,
    %575 = arith.index_cast %543 : i32 to index
    %c0_328 = arith.constant 0 : index
    %576 = vector.load %arg15[%575, %c0_328] : memref<64x128xf32, #tpu.memory_space<vmem>>, vector<8x128xf32>
    tpu.vector_store %arg15[%575, %c0_328], %568 {strides = array<i32>} : memref<64x128xf32, #tpu.memory_space<vmem>>, vector<8x128xf32>,
    %c8_i32_329 = arith.constant 8 : i32
    %c0_330 = arith.constant 0 : index
    %c0_331 = arith.constant 0 : index
    %577 = vector.load %arg15[%c0_330, %c0_331] : memref<64x128xf32, #tpu.memory_space<vmem>>, vector<64x128xf32>
    %c0_332 = arith.constant 0 : index
    %c0_333 = arith.constant 0 : index
    %578 = vector.load %arg9[%c0_332, %c0_333] : memref<128x128xf32, #tpu.memory_space<vmem>>, vector<128x128xf32>
    %cst_334 = arith.constant dense<0.000000e+00> : vector<64x128xf32>
    %579 = tpu.matmul %577, %578, %cst_334 {dimension_numbers = #tpu.dot_dimension_numbers<[1], [0], [0], [1], [0, 0, 1, 1], [], []>} : vector<64x128xf32>, vector<128x128xf32>, vector<64x128xf32> -> vector<64x128xf32>
    %c0_335 = arith.constant 0 : index
    %c0_336 = arith.constant 0 : index
    %580 = vector.load %arg10[%c0_335, %c0_336] : memref<1x128xf32, #tpu.memory_space<vmem>>, vector<1x128xf32>
    %581 = vector.broadcast %580 : vector<1x128xf32> to vector<64x128xf32>
    %582 = arith.addf %579, %581 : vector<64x128xf32>
    %c0_337 = arith.constant 0 : index
    %c0_338 = arith.constant 0 : index
    %583 = vector.load %arg11[%c0_337, %c0_338] : memref<64x128xf32, #tpu.memory_space<vmem>>, vector<64x128xf32>
    tpu.vector_store %arg11[%c0_337, %c0_338], %582 {strides = array<i32>} : memref<64x128xf32, #tpu.memory_space<vmem>>, vector<64x128xf32>,
    %c0_339 = arith.constant 0 : index
    %c0_340 = arith.constant 0 : index
    %c0_341 = arith.constant 0 : index
    %584 = vector.load %arg16[%c0_339, %c0_340, %c0_341] : memref<2x8x128xf32, #tpu.memory_space<vmem>>, vector<2x8x128xf32>
    %c0_342 = arith.constant 0 : index
    %c0_343 = arith.constant 0 : index
    %c0_344 = arith.constant 0 : index
    %585 = vector.load %arg12[%c0_342, %c0_343, %c0_344] : memref<2x8x128xf32, #tpu.memory_space<vmem>>, vector<2x8x128xf32>
    tpu.vector_store %arg12[%c0_342, %c0_343, %c0_344], %584 {strides = array<i32>} : memref<2x8x128xf32, #tpu.memory_space<vmem>>, vector<2x8x128xf32>,
    %c0_345 = arith.constant 0 : index
    %c0_346 = arith.constant 0 : index
    %c0_347 = arith.constant 0 : index
    %586 = vector.load %arg17[%c0_345, %c0_346, %c0_347] : memref<2x8x128xf32, #tpu.memory_space<vmem>>, vector<2x8x128xf32>
    %c0_348 = arith.constant 0 : index
    %c0_349 = arith.constant 0 : index
    %c0_350 = arith.constant 0 : index
    %587 = vector.load %arg13[%c0_348, %c0_349, %c0_350] : memref<2x8x128xf32, #tpu.memory_space<vmem>>, vector<2x8x128xf32>
    tpu.vector_store %arg13[%c0_348, %c0_349, %c0_350], %586 {strides = array<i32>} : memref<2x8x128xf32, #tpu.memory_space<vmem>>, vector<2x8x128xf32>,
    return
  }
  func.func @transform_0(%arg0: i32) -> (i32, i32) {
    %c0_i32 = arith.constant 0 : i32
    %c0_i32_0 = arith.constant 0 : i32
    return %arg0, %c0_i32 : i32, i32
  }
  func.func @transform_1(%arg0: i32) -> (i32, i32) {
    %c0_i32 = arith.constant 0 : i32
    %c0_i32_0 = arith.constant 0 : i32
    %c0_i32_1 = arith.constant 0 : i32
    return %c0_i32, %c0_i32_0 : i32, i32
  }
  func.func @transform_2(%arg0: i32) -> (i32, i32) {
    %c0_i32 = arith.constant 0 : i32
    %c0_i32_0 = arith.constant 0 : i32
    %c0_i32_1 = arith.constant 0 : i32
    return %c0_i32, %c0_i32_0 : i32, i32
  }
  func.func @transform_3(%arg0: i32) -> (i32, i32) {
    %c0_i32 = arith.constant 0 : i32
    %c0_i32_0 = arith.constant 0 : i32
    %c0_i32_1 = arith.constant 0 : i32
    return %c0_i32, %c0_i32_0 : i32, i32
  }
  func.func @transform_4(%arg0: i32) -> (i32, i32) {
    %c0_i32 = arith.constant 0 : i32
    %c0_i32_0 = arith.constant 0 : i32
    %c0_i32_1 = arith.constant 0 : i32
    return %c0_i32, %c0_i32_0 : i32, i32
  }
  func.func @transform_5(%arg0: i32) -> (i32, i32) {
    %c0_i32 = arith.constant 0 : i32
    %c0_i32_0 = arith.constant 0 : i32
    %c0_i32_1 = arith.constant 0 : i32
    return %c0_i32, %c0_i32_0 : i32, i32
  }
  func.func @transform_6(%arg0: i32) -> (i32, i32) {
    %c0_i32 = arith.constant 0 : i32
    %c0_i32_0 = arith.constant 0 : i32
    %c0_i32_1 = arith.constant 0 : i32
    return %c0_i32, %c0_i32_0 : i32, i32
  }
  func.func @transform_7(%arg0: i32) -> (i32, i32, i32) {
    %c0_i32 = arith.constant 0 : i32
    %c0_i32_0 = arith.constant 0 : i32
    %c0_i32_1 = arith.constant 0 : i32
    %c0_i32_2 = arith.constant 0 : i32
    return %c0_i32, %c0_i32_0, %c0_i32_1 : i32, i32, i32
  }
  func.func @transform_8(%arg0: i32) -> (i32, i32) {
    %c0_i32 = arith.constant 0 : i32
    %c0_i32_0 = arith.constant 0 : i32
    %c0_i32_1 = arith.constant 0 : i32
    return %c0_i32, %c0_i32_0 : i32, i32
  }
  func.func @transform_9(%arg0: i32) -> (i32, i32) {
    %c0_i32 = arith.constant 0 : i32
    %c0_i32_0 = arith.constant 0 : i32
    %c0_i32_1 = arith.constant 0 : i32
    return %c0_i32, %c0_i32_0 : i32, i32
  }
  func.func @transform_10(%arg0: i32) -> (i32, i32) {
    %c0_i32 = arith.constant 0 : i32
    %c0_i32_0 = arith.constant 0 : i32
    return %arg0, %c0_i32 : i32, i32
  }
  func.func @transform_11(%arg0: i32) -> (i32, i32, i32) {
    %c0_i32 = arith.constant 0 : i32
    %c0_i32_0 = arith.constant 0 : i32
    %c0_i32_1 = arith.constant 0 : i32
    %c0_i32_2 = arith.constant 0 : i32
    return %c0_i32, %c0_i32_0, %c0_i32_1 : i32, i32, i32
  }
  func.func @transform_12(%arg0: i32) -> (i32, i32, i32) {
    %c0_i32 = arith.constant 0 : i32
    %c0_i32_0 = arith.constant 0 : i32
    %c0_i32_1 = arith.constant 0 : i32
    %c0_i32_2 = arith.constant 0 : i32
    return %c0_i32, %c0_i32_0, %c0_i32_1 : i32, i32, i32
  }
}

</mosaic_0001>

<bundles_post_ra>
// kernel: tpu_custom_call.1
= control target key start
LH: loop header
LB: loop body
LE: loop exit
PB: predicated region body
PF: predicated region fallthrough
CT: control target
= control target key end

     0   :  { %18 = vsyncpa [#allocation7], 0  ;;  %s8324_s0 = inlined_call_operand.hbm [shape: f32[64,16], index: 0, kind: input, shape index: {}]   ;;  %s8325_s1 = inlined_call_operand.hbm [shape: f32[16,512], index: 1, kind: input, shape index: {}]   ;;  %s8326_s2 = inlined_call_operand.hbm [shape: f32[128,512], index: 2, kind: input, shape index: {}]   ;;  %s8327_s3 = inlined_call_operand.hbm [shape: f32[1,512], index: 3, kind: input, shape index: {}]   ;;  %s8328_s4 = inlined_call_operand.hbm [shape: f32[128,512], index: 4, kind: input, shape index: {}]   ;;  %s8329_s5 = inlined_call_operand.hbm [shape: f32[128,512], index: 5, kind: input, shape index: {}]   ;;  %s8330_s6 = inlined_call_operand.hbm [shape: f32[1,512], index: 6, kind: input, shape index: {}]   ;;  %s8331_s7 = inlined_call_operand.hbm [shape: f32[2,8,128], index: 7, kind: input, shape index: {}]   ;;  %s8332_s8 = inlined_call_operand.hbm [shape: f32[128,128], index: 8, kind: input, shape index: {}]   ;;  %s8333_s9 = inlined_call_operand.hbm [shape: f32[1,128], index: 9, kind: input, shape index: {}]   ;;  %s8334_s10 = inlined_call_operand.hbm [shape: f32[64,128], index: 10, kind: output, shape index: {0}]   ;;  %s8335_s11 = inlined_call_operand.hbm [shape: f32[2,8,128], index: 11, kind: output, shape index: {1}]   ;;  %s8336_s12 = inlined_call_operand.hbm [shape: f32[2,8,128], index: 12, kind: output, shape index: {2}]  }
   0x1   :  { %19 = vsyncpa [#allocation10], 0 }
   0x2   :  { %20 = vsyncpa [#allocation13], 0 }
   0x3   :  { %21 = vsyncpa [#allocation16], 0 }
   0x4   :  { %22 = vsyncpa [#allocation19], 0 }
   0x5   :  { %23 = vsyncpa [#allocation22], 0 }
   0x6   :  { %24 = vsyncpa [#allocation8], 0 }
   0x7   :  { %25 = vsyncpa [#allocation25], 0  ;;  %s6953_s21 = smov [#allocation9]   ;;  %s6651_s25 = scalar_lea.hbm %s8325_s1, 1024 }
   0x8   :  { %s43_s22 = sshll.u32 %s6953_s21, 4  ;;  %p6652_p0 = scmp.ne.s32.totalorder %s8325_s1, %s6651_s25  ;;  %s44_s22 = int_to_ptr.vmem [resolvable:$true] %s43_s22 }
   0x9   :  { %p6655_p1 = scmp.lt.u32.totalorder %s6651_s25, %s8325_s1 }
   0xb   :  { %p6657_p2 = pnand %p6655_p1, %p6652_p0 }
   0xd   :  { %6660 = shalt.err (!%p6657_p2)
}
   0xe   :  { %s6661_s30 = scalar_lea.vmem %s44_s22, 1024  ;;  %p6666_p4 = scmp.lt.s32.totalorder %s44_s22, %s44_s22 }
   0xf   :  { %p6662_p3 = scmp.ne.s32.totalorder %s44_s22, %s6661_s30  ;;  %p6667_p5 = scmp.lt.s32.totalorder %s6661_s30, %s6661_s30 }
  0x11   :  { %p6668_p6 = por %p6667_p5, %p6666_p4 }
  0x13   :  { %p6669_p7 = pnand %p6668_p6, %p6662_p3 }
  0x15   :  { %6672 = shalt.err (!%p6669_p7)
}
  0x16   :  { %s6954_s13 = smov 512   ;;  %s6955_s14 = smov 32  }
  0x17   :  { %49 = dma.hbm_to_vmem [thread:$0]  %s8325_s1, 1024, %s44_s22, [#allocation10], %s6954_s13, %s6954_s13, %s6955_s14  }
  0x18   :  { %s6956_s17 = smov [#allocation12]   ;;  %s6957_s19 = smov [#allocation15]  }
  0x19   :  { %s68_s18 = sshll.u32 %s6956_s17, 4  ;;  %s89_s20 = sshll.u32 %s6957_s19, 4  ;;  %s69_s18 = int_to_ptr.vmem [resolvable:$true] %s68_s18  ;;  %s90_s20 = int_to_ptr.vmem [resolvable:$true] %s89_s20 }
  0x1a   :  { %s6673_s24 = scalar_lea.hbm %s8327_s3, 64 }
  0x1b   :  { %p6674_p8 = scmp.ne.s32.totalorder %s8327_s3, %s6673_s24  ;;  %p6677_p9 = scmp.lt.u32.totalorder %s6673_s24, %s8327_s3 }
  0x1d   :  { %p6679_p10 = pnand %p6677_p9, %p6674_p8 }
  0x1f   :  { %6682 = shalt.err (!%p6679_p10)
}
  0x20   :  { %s6683_s1 = scalar_lea.vmem %s69_s18, 64  ;;  %p6688_p12 = scmp.lt.s32.totalorder %s69_s18, %s69_s18 }
  0x21   :  { %p6684_p11 = scmp.ne.s32.totalorder %s69_s18, %s6683_s1  ;;  %p6689_p13 = scmp.lt.s32.totalorder %s6683_s1, %s6683_s1 }
  0x23   :  { %p6690_p0 = por %p6689_p13, %p6688_p12 }
  0x25   :  { %p6691_p1 = pnand %p6690_p0, %p6684_p11 }
  0x27   :  { %6694 = shalt.err (!%p6691_p1)
}
  0x28   :  { %71 = dma.hbm_to_vmem [thread:$0]  %s8327_s3, 64, %s69_s18, [#allocation13]  }
  0x29   :  { %s6695_s16 = scalar_lea.hbm %s8329_s5, 8192 }
  0x2a   :  { %p6696_p2 = scmp.ne.s32.totalorder %s8329_s5, %s6695_s16  ;;  %p6699_p3 = scmp.lt.u32.totalorder %s6695_s16, %s8329_s5 }
  0x2c   :  { %p6701_p4 = pnand %p6699_p3, %p6696_p2 }
  0x2e   :  { %6704 = shalt.err (!%p6701_p4)
}
  0x2f   :  { %s6705_s24 = scalar_lea.vmem %s90_s20, 8192  ;;  %p6710_p6 = scmp.lt.s32.totalorder %s90_s20, %s90_s20 }
  0x30   :  { %p6706_p5 = scmp.ne.s32.totalorder %s90_s20, %s6705_s24  ;;  %p6711_p7 = scmp.lt.s32.totalorder %s6705_s24, %s6705_s24 }
  0x32   :  { %p6712_p8 = por %p6711_p7, %p6710_p6 }
  0x34   :  { %p6713_p9 = pnand %p6712_p8, %p6706_p5 }
  0x36   :  { %6716 = shalt.err (!%p6713_p9)
}
  0x37   :  { %95 = dma.hbm_to_vmem [thread:$0]  %s8329_s5, 8192, %s90_s20, [#allocation16], %s6954_s13, %s6954_s13, %s6955_s14  }
  0x38   :  { %s6958_s25 = smov [#allocation18]   ;;  %s6959_s27 = smov [#allocation6]  }
  0x39   :  { %s111_s26 = sshll.u32 %s6958_s25, 4  ;;  %s31_s28 = sshll.u32 %s6959_s27, 4  ;;  %s112_s26 = int_to_ptr.vmem [resolvable:$true] %s111_s26  ;;  %s32_s28 = int_to_ptr.vmem [resolvable:$true] %s31_s28 }
  0x3a   :  { %s6717_s29 = scalar_lea.hbm %s8331_s7, 256 }
  0x3b   :  { %p6718_p10 = scmp.ne.s32.totalorder %s8331_s7, %s6717_s29  ;;  %p6721_p11 = scmp.lt.u32.totalorder %s6717_s29, %s8331_s7 }
  0x3d   :  { %p6723_p12 = pnand %p6721_p11, %p6718_p10 }
  0x3f   :  { %6726 = shalt.err (!%p6723_p12)
}
  0x40   :  { %s6727_s5 = scalar_lea.vmem %s112_s26, 256  ;;  %p6732_p0 = scmp.lt.s32.totalorder %s112_s26, %s112_s26 }
  0x41   :  { %p6728_p13 = scmp.ne.s32.totalorder %s112_s26, %s6727_s5  ;;  %p6733_p1 = scmp.lt.s32.totalorder %s6727_s5, %s6727_s5 }
  0x43   :  { %p6734_p2 = por %p6733_p1, %p6732_p0 }
  0x45   :  { %p6735_p3 = pnand %p6734_p2, %p6728_p13 }
  0x47   :  { %6738 = shalt.err (!%p6735_p3)
}
  0x48   :  { %s6960_s20 = smov 128   ;;  %s6961_s19 = smov 8  }
  0x49   :  { %117 = dma.hbm_to_vmem [thread:$0]  %s8331_s7, 256, %s112_s26, [#allocation19], %s6960_s20, %s6960_s20, %s6961_s19  }
  0x4a   :  { %s6739_s18 = scalar_lea.hbm %s8324_s0, 1024 }
  0x4b   :  { %p6740_p4 = scmp.ne.s32.totalorder %s8324_s0, %s6739_s18  ;;  %p6743_p5 = scmp.lt.u32.totalorder %s6739_s18, %s8324_s0 }
  0x4d   :  { %p6745_p6 = pnand %p6743_p5, %p6740_p4 }
  0x4f   :  { %6748 = shalt.err (!%p6745_p6)
}
  0x50   :  { %s6749_s29 = scalar_lea.vmem %s32_s28, 1024  ;;  %p6754_p8 = scmp.lt.s32.totalorder %s32_s28, %s32_s28 }
  0x51   :  { %p6750_p7 = scmp.ne.s32.totalorder %s32_s28, %s6749_s29  ;;  %p6755_p9 = scmp.lt.s32.totalorder %s6749_s29, %s6749_s29 }
  0x53   :  { %p6756_p10 = por %p6755_p9, %p6754_p8 }
  0x55   :  { %p6757_p11 = pnand %p6756_p10, %p6750_p7 }
  0x57   :  { %6760 = shalt.err (!%p6757_p11)
}
  0x58   :  { %37 = dma.hbm_to_vmem [thread:$0]  %s8324_s0, 1024, %s32_s28, [#allocation7], %s6960_s20, %s6960_s20, %s6961_s19  }
  0x59   :  { %s6962_s30 = smov [#allocation11]   ;;  %s6963_s16 = smov [#allocation14]  }
  0x5a   :  { %s55_s15 = sshll.u32 %s6962_s30, 4  ;;  %s77_s17 = sshll.u32 %s6963_s16, 4  ;;  %s56_s15 = int_to_ptr.vmem [resolvable:$true] %s55_s15  ;;  %s78_s17 = int_to_ptr.vmem [resolvable:$true] %s77_s17 }
  0x5b   :  { %s6761_s23 = scalar_lea.hbm %s8326_s2, 8192 }
  0x5c   :  { %p6762_p12 = scmp.ne.s32.totalorder %s8326_s2, %s6761_s23  ;;  %p6765_p13 = scmp.lt.u32.totalorder %s6761_s23, %s8326_s2 }
  0x5e   :  { %p6767_p0 = pnand %p6765_p13, %p6762_p12 }
  0x60   :  { %6770 = shalt.err (!%p6767_p0)
}
  0x61   :  { %s6771_s0 = scalar_lea.vmem %s56_s15, 8192  ;;  %p6776_p2 = scmp.lt.s32.totalorder %s56_s15, %s56_s15 }
  0x62   :  { %p6772_p1 = scmp.ne.s32.totalorder %s56_s15, %s6771_s0  ;;  %p6777_p3 = scmp.lt.s32.totalorder %s6771_s0, %s6771_s0 }
  0x64   :  { %p6778_p4 = por %p6777_p3, %p6776_p2 }
  0x66   :  { %p6779_p5 = pnand %p6778_p4, %p6772_p1 }
  0x68   :  { %6782 = shalt.err (!%p6779_p5)
}
  0x69   :  { %61 = dma.hbm_to_vmem [thread:$0]  %s8326_s2, 8192, %s56_s15, [#allocation10], %s6954_s13, %s6954_s13, %s6955_s14  }
  0x6a   :  { %s6783_s29 = scalar_lea.hbm %s8328_s4, 8192 }
  0x6b   :  { %p6784_p6 = scmp.ne.s32.totalorder %s8328_s4, %s6783_s29  ;;  %p6787_p7 = scmp.lt.u32.totalorder %s6783_s29, %s8328_s4 }
  0x6d   :  { %p6789_p8 = pnand %p6787_p7, %p6784_p6 }
  0x6f   :  { %6792 = shalt.err (!%p6789_p8)
}
  0x70   :  { %s6793_s5 = scalar_lea.vmem %s78_s17, 8192  ;;  %p6798_p10 = scmp.lt.s32.totalorder %s78_s17, %s78_s17 }
  0x71   :  { %p6794_p9 = scmp.ne.s32.totalorder %s78_s17, %s6793_s5  ;;  %p6799_p11 = scmp.lt.s32.totalorder %s6793_s5, %s6793_s5 }
  0x73   :  { %p6800_p12 = por %p6799_p11, %p6798_p10 }
  0x75   :  { %p6801_p13 = pnand %p6800_p12, %p6794_p9 }
  0x77   :  { %6804 = shalt.err (!%p6801_p13)
}
  0x78   :  { %83 = dma.hbm_to_vmem [thread:$0]  %s8328_s4, 8192, %s78_s17, [#allocation13], %s6954_s13, %s6954_s13, %s6955_s14  }
  0x79   :  { %s6964_s21 = smov [#allocation17]   ;;  %s6965_s24 = smov [#allocation20]  }
  0x7a   :  { %s102_s23 = sshll.u32 %s6964_s21, 4  ;;  %s123_s3 = sshll.u32 %s6965_s24, 4  ;;  %s103_s23 = int_to_ptr.vmem [resolvable:$true] %s102_s23  ;;  %s124_s3 = int_to_ptr.vmem [resolvable:$true] %s123_s3 }
  0x7b   :  { %s6805_s0 = scalar_lea.hbm %s8330_s6, 64 }
  0x7c   :  { %p6806_p0 = scmp.ne.s32.totalorder %s8330_s6, %s6805_s0  ;;  %p6809_p1 = scmp.lt.u32.totalorder %s6805_s0, %s8330_s6 }
  0x7e   :  { %p6811_p2 = pnand %p6809_p1, %p6806_p0 }
  0x80   :  { %6814 = shalt.err (!%p6811_p2)
}
  0x81   :  { %s6815_s4 = scalar_lea.vmem %s103_s23, 64  ;;  %p6820_p4 = scmp.lt.s32.totalorder %s103_s23, %s103_s23 }
  0x82   :  { %p6816_p3 = scmp.ne.s32.totalorder %s103_s23, %s6815_s4  ;;  %p6821_p5 = scmp.lt.s32.totalorder %s6815_s4, %s6815_s4 }
  0x84   :  { %p6822_p6 = por %p6821_p5, %p6820_p4 }
  0x86   :  { %p6823_p7 = pnand %p6822_p6, %p6816_p3 }
  0x88   :  { %6826 = shalt.err (!%p6823_p7)
}
  0x89   :  { %105 = dma.hbm_to_vmem [thread:$0]  %s8330_s6, 64, %s103_s23, [#allocation16]  }
  0x8a   :  { %s6827_s7 = scalar_lea.hbm %s8332_s8, 2048 }
  0x8b   :  { %p6828_p8 = scmp.ne.s32.totalorder %s8332_s8, %s6827_s7  ;;  %p6831_p9 = scmp.lt.u32.totalorder %s6827_s7, %s8332_s8 }
  0x8d   :  { %p6833_p10 = pnand %p6831_p9, %p6828_p8 }
  0x8f   :  { %6836 = shalt.err (!%p6833_p10)
}
  0x90   :  { %s6837_s2 = scalar_lea.vmem %s124_s3, 2048  ;;  %p6842_p12 = scmp.lt.s32.totalorder %s124_s3, %s124_s3 }
  0x91   :  { %p6838_p11 = scmp.ne.s32.totalorder %s124_s3, %s6837_s2  ;;  %p6843_p13 = scmp.lt.s32.totalorder %s6837_s2, %s6837_s2 }
  0x93   :  { %p6844_p0 = por %p6843_p13, %p6842_p12 }
  0x95   :  { %p6845_p1 = pnand %p6844_p0, %p6838_p11 }
  0x97   :  { %6848 = shalt.err (!%p6845_p1)
}
  0x98   :  { %129 = dma.hbm_to_vmem [thread:$0]  %s8332_s8, 2048, %s124_s3, [#allocation19], %s6960_s20, %s6960_s20, %s6961_s19  }
  0x99   :  { %s6966_s21 = smov [#allocation21]   ;;  %s6849_s25 = scalar_lea.hbm %s8333_s9, 16 }
  0x9a   :  { %s136_s23 = sshll.u32 %s6966_s21, 4  ;;  %p6850_p2 = scmp.ne.s32.totalorder %s8333_s9, %s6849_s25  ;;  %s137_s23 = int_to_ptr.vmem [resolvable:$true] %s136_s23 }
  0x9b   :  { %p6853_p3 = scmp.lt.u32.totalorder %s6849_s25, %s8333_s9 }
  0x9d   :  { %p6855_p4 = pnand %p6853_p3, %p6850_p2 }
  0x9f   :  { %6858 = shalt.err (!%p6855_p4)
}
  0xa0   :  { %s6859_s22 = scalar_lea.vmem %s137_s23, 16  ;;  %s6863_s8 = scalar_lea.vmem %s137_s23, 32 }
  0xa1   :  { %p6860_p5 = scmp.ne.s32.totalorder %s137_s23, %s6859_s22  ;;  %p6864_p6 = scmp.lt.s32.totalorder %s137_s23, %s137_s23 }
  0xa2   :  { %p6865_p7 = scmp.lt.s32.totalorder %s6863_s8, %s6859_s22 }
  0xa4   :  { %p6866_p8 = por %p6865_p7, %p6864_p6 }
  0xa6   :  { %p6867_p9 = pnand %p6866_p8, %p6860_p5 }
  0xa8   :  { %6870 = shalt.err (!%p6867_p9)
}
  0xa9   :  { %139 = dma.hbm_to_vmem [thread:$0]  %s8333_s9, 16, %s137_s23, [#allocation22]  }
  0xaa   :  { %6937 = dma.done.wait [#allocation7], 1024  }
  0xab   :  { %6938 = vsyncadd [#allocation7], 4294966272 }
  0xac   :  { %6939 = dma.done.wait [#allocation10], 9216  }
  0xad   :  { %6940 = vsyncadd [#allocation10], 4294958080 }
  0xae   :  { %6941 = dma.done.wait [#allocation13], 8256  }
  0xaf   :  { %6942 = vsyncadd [#allocation13], 4294959040 }
  0xb0   :  { %6943 = dma.done.wait [#allocation16], 8256  }
  0xb1   :  { %6944 = vsyncadd [#allocation16], 4294959040 }
  0xb2   :  { %6945 = dma.done.wait [#allocation19], 2304  }
  0xb3   :  { %6946 = vsyncadd [#allocation19], 4294964992 }
  0xb4   :  { %6947 = dma.done.wait [#allocation22], 16  }
  0xb5   :  { %6948 = vsyncadd [#allocation22], 4294967280  ;;  %v6967_v0 = vmov 0.0   ;;  %v193_v1 = vld [vmem:[#allocation9 + $0x18] sm:$0xff]  ;;  %v192_v3 = vld [vmem:[#allocation9 + $0x10] sm:$0xff]  ;;  %vm220_vm0 = vcmask 130048  }
  0xb6   :  { %422 = vmatprep.mubr.f32.mxu1 %v6967_v0  ;;  %309 = vmatprep.mubr.f32.mxu0 %v6967_v0  ;;  %v197_v2 = vld [vmem:[#allocation9 + $0x38] sm:$0xff]  ;;  %v196_v5 = vld [vmem:[#allocation9 + $0x30] sm:$0xff]  ;;  %v513_v6 = vld [vmem:[#allocation11 + $0x8] sm:$0xff]  ;;  %s6968_s9 = smov [#allocation24]  }
  0xb7   :  { %v5125_v4 = vpack.c.bf16 %v197_v2, %v193_v1  ;;  %v5127_v7 = vpack.c.bf16 %v196_v5, %v192_v3  ;;  %v517_v8 = vld [vmem:[#allocation11 + $0x28] sm:$0xff]  ;;  %v512_v9 = vld [vmem:[#allocation11] sm:$0xff]  ;;  %v7200_v28 = vld [vmem:[#allocation6 + $0x10] sm:$0xff]  ;;  %s4945_s13 = sshll.u32 %s6968_s9, 4  ;;  %s4946_s13 = int_to_ptr.vmem [resolvable:$true] %s4945_s13 }
  0xb8   :  { %v516_v10 = vld [vmem:[#allocation11 + $0x20] sm:$0xff]  ;;  %v7179_v11 = vpack.c.bf16 %v517_v8, %v513_v6  ;;  %v521_v12 = vld [vmem:[#allocation11 + $0x48] sm:$0xff]  ;;  %v7211_v41 = vld [vmem:[#allocation6 + $0x18] sm:$0xff]  ;;  %s6871_s14 = scalar_lea.vmem %s4946_s13, 256  ;;  %p6876_p11 = scmp.lt.s32.totalorder %s4946_s13, %s4946_s13 }
  0xb9   :  { %5126 = vmatprep.subr.bf16.mxu1 %v5125_v4  ;;  %v525_v13 = vld [vmem:[#allocation11 + $0x68] sm:$0xff]  ;;  %v182_v14 = vld [vmem:[#allocation6] sm:$0xff]  ;;  %v7181_v15 = vpack.c.bf16 %v516_v10, %v512_v9  ;;  %v188_v62 = vld [vmem:[#allocation6 + $0x30] sm:$0xff]  ;;  %p6872_p10 = scmp.ne.s32.totalorder %s4946_s13, %s6871_s14  ;;  %p6877_p12 = scmp.lt.s32.totalorder %s6871_s14, %s6871_s14 }
  0xba   :  { %5128 = vmatpush1.bf16.msra.mxu1 %v5127_v7  ;;  %v7184_v16 = vpack.c.bf16 %v525_v13, %v521_v12  ;;  %v520_v17 = vld [vmem:[#allocation11 + $0x40] sm:$0xff]  ;;  %v529_v19 = vld [vmem:[#allocation11 + $0x88] sm:$0xff]  ;;  %v515_v4 = vld [vmem:[#allocation11 + $0x18] sm:$0xff] }
  0xbb   :  { %5130 = vmatprep.subr.bf16.mxu1 %v7179_v11  ;;  %v524_v18 = vld [vmem:[#allocation11 + $0x60] sm:$0xff]  ;;  %v533_v20 = vld [vmem:[#allocation11 + $0xa8] sm:$0xff]  ;;  %v519_v5 = vld [vmem:[#allocation11 + $0x38] sm:$0xff]  ;;  %p6878_p13 = por %p6877_p12, %p6876_p11 }
  0xbc   :  { %v7189_v21 = vld [vmem:[#allocation6 + $0x8] sm:$0xff]  ;;  %v7191_v22 = vpack.c.bf16 %v524_v18, %v520_v17  ;;  %v7194_v23 = vpack.c.bf16 %v533_v20, %v529_v19  ;;  %v528_v24 = vld [vmem:[#allocation11 + $0x80] sm:$0xff]  ;;  %v189_v6 = vld [vmem:[#allocation6 + $0x38] sm:$0xff]  ;;  %v7270_v8 = vpack.c.bf16 %v519_v5, %v515_v4 }
  0xbd   :  { %4996 = vmatmul.mubr.msk.f32.vlgmr.msra.gmra.mrb[0].mxu1 %vm220_vm0, %v182_v14  ;;  %v532_v25 = vld [vmem:[#allocation11 + $0xa0] sm:$0xff]  ;;  %v537_v26 = vld [vmem:[#allocation11 + $0xc8] sm:$0xff]  ;;  %v514_v9 = vld [vmem:[#allocation11 + $0x10] sm:$0xff]  ;;  %p6879_p0 = pnand %p6878_p13, %p6872_p10 }
  0xbe   :  { %5132 = vmatpush1.bf16.msra.mxu1 %v7181_v15  ;;  %428 = vmatprep.mubr.f32.mxu1 %v6967_v0  ;;  %v541_v27 = vld [vmem:[#allocation11 + $0xe8] sm:$0xff]  ;;  %v7202_v29 = vpack.c.bf16 %v532_v25, %v528_v24  ;;  %v536_v30 = vld [vmem:[#allocation11 + $0xc0] sm:$0xff]  ;;  %v518_v10 = vld [vmem:[#allocation11 + $0x30] sm:$0xff] }
  0xbf   :  { %5134 = vmatprep.subr.bf16.mxu1 %v7184_v16  ;;  %v540_v31 = vld [vmem:[#allocation11 + $0xe0] sm:$0xff]  ;;  %v7205_v32 = vpack.c.bf16 %v541_v27, %v537_v26  ;;  %v191_v33 = vld [vmem:[#allocation9 + $0x8] sm:$0xff]  ;;  %v523_v12 = vld [vmem:[#allocation11 + $0x58] sm:$0xff]  ;;  %v7282_v17 = vpack.c.bf16 %v518_v10, %v514_v9 }
  0xc0   :  { %v195_v34 = vld [vmem:[#allocation9 + $0x28] sm:$0xff]  ;;  %v190_v35 = vld [vmem:[#allocation9] sm:$0xff]  ;;  %v7213_v42 = vpack.c.bf16 %v540_v31, %v536_v30  ;;  %v527_v13 = vld [vmem:[#allocation11 + $0x78] sm:$0xff] }
  0xc1   :  { %4997 = vmatmul.mubr.msk.f32.gmra.mrb[2].mxu1 %vm220_vm0, %v7189_v21  ;;  %v545_v36 = vld [vmem:[#allocation11 + $0x108] sm:$0xff]  ;;  %v5121_v38 = vpack.c.bf16 %v195_v34, %v191_v33  ;;  %v194_v39 = vld [vmem:[#allocation9 + $0x20] sm:$0xff]  ;;  %v7285_v18 = vpack.c.bf16 %v527_v13, %v523_v12  ;;  %v522_v19 = vld [vmem:[#allocation11 + $0x50] sm:$0xff] }
  0xc2   :  { %5136 = vmatpush1.bf16.msra.mxu1 %v7191_v22  ;;  %434 = vmatprep.mubr.f32.mxu1 %v6967_v0  ;;  %v549_v37 = vld [vmem:[#allocation11 + $0x128] sm:$0xff]  ;;  %v5123_v40 = vpack.c.bf16 %v194_v39, %v190_v35  ;;  %v544_v44 = vld [vmem:[#allocation11 + $0x100] sm:$0xff]  ;;  %v526_v20 = vld [vmem:[#allocation11 + $0x70] sm:$0xff] }
  0xc3   :  { %5138 = vmatprep.subr.bf16.mxu1 %v7194_v23  ;;  %v7216_v43 = vpack.c.bf16 %v549_v37, %v545_v36  ;;  %v548_v45 = vld [vmem:[#allocation11 + $0x120] sm:$0xff]  ;;  %5122 = vmatprep.subr.bf16.mxu0 %v5121_v38  ;;  %v553_v46 = vld [vmem:[#allocation11 + $0x148] sm:$0xff]  ;;  %v535_v24 = vld [vmem:[#allocation11 + $0xb8] sm:$0xff]  ;;  %v7294_v25 = vpack.c.bf16 %v526_v20, %v522_v19 }
  0xc4   :  { %v557_v47 = vld [vmem:[#allocation11 + $0x168] sm:$0xff]  ;;  %5124 = vmatpush1.bf16.msra.mxu0 %v5123_v40  ;;  %v7223_v48 = vld [vmem:[#allocation6 + $0x20] sm:$0xff]  ;;  %v7225_v49 = vpack.c.bf16 %v548_v45, %v544_v44  ;;  %v530_v27 = vld [vmem:[#allocation11 + $0x90] sm:$0xff] }
  0xc5   :  { %4998 = vmatmul.mubr.msk.f32.gmra.mrb[4].mxu1 %vm220_vm0, %v7200_v28  ;;  %5194 = vmatprep.subr.bf16.mxu0 %v7179_v11  ;;  %v7228_v50 = vpack.c.bf16 %v557_v47, %v553_v46  ;;  %v552_v51 = vld [vmem:[#allocation11 + $0x140] sm:$0xff]  ;;  %v561_v53 = vld [vmem:[#allocation11 + $0x188] sm:$0xff]  ;;  %v539_v30 = vld [vmem:[#allocation11 + $0xd8] sm:$0xff] }
  0xc6   :  { %5140 = vmatpush1.bf16.msra.mxu1 %v7202_v29  ;;  %440 = vmatprep.mubr.f32.mxu1 %v6967_v0  ;;  %v556_v52 = vld [vmem:[#allocation11 + $0x160] sm:$0xff]  ;;  %v565_v54 = vld [vmem:[#allocation11 + $0x1a8] sm:$0xff]  ;;  %v543_v31 = vld [vmem:[#allocation11 + $0xf8] sm:$0xff] }
  0xc7   :  { %5142 = vmatprep.subr.bf16.mxu1 %v7205_v32  ;;  %4988 = vmatmul.mubr.msk.f32.vlgmr.msra.gmra.mrb[0].mxu0 %vm220_vm0, %v182_v14  ;;  %v7238_v55 = vld [vmem:[#allocation6 + $0x28] sm:$0xff]  ;;  %v7240_v56 = vpack.c.bf16 %v556_v52, %v552_v51  ;;  %v7243_v57 = vpack.c.bf16 %v565_v54, %v561_v53  ;;  %v560_v58 = vld [vmem:[#allocation11 + $0x180] sm:$0xff]  ;;  %v7309_v34 = vpack.c.bf16 %v543_v31, %v539_v30  ;;  %v538_v35 = vld [vmem:[#allocation11 + $0xd0] sm:$0xff] }
  0xc8   :  { %5196 = vmatpush1.bf16.msra.mxu0 %v7181_v15  ;;  %315 = vmatprep.mubr.f32.mxu0 %v6967_v0  ;;  %v564_v59 = vld [vmem:[#allocation11 + $0x1a0] sm:$0xff]  ;;  %v569_v60 = vld [vmem:[#allocation11 + $0x1c8] sm:$0xff]  ;;  %v542_v36 = vld [vmem:[#allocation11 + $0xf0] sm:$0xff] }
  0xc9   :  { %4999 = vmatmul.mubr.msk.f32.gmra.mrb[6].mxu1 %vm220_vm0, %v7211_v41  ;;  %5198 = vmatprep.subr.bf16.mxu0 %v7184_v16  ;;  %v573_v61 = vld [vmem:[#allocation11 + $0x1e8] sm:$0xff]  ;;  %v7254_v63 = vpack.c.bf16 %v564_v59, %v560_v58  ;;  %v568_v2 = vld [vmem:[#allocation11 + $0x1c0] sm:$0xff]  ;;  %v547_v37 = vld [vmem:[#allocation11 + $0x118] sm:$0xff]  ;;  %v7316_v39 = vpack.c.bf16 %v542_v36, %v538_v35 }
  0xca   :  { %5144 = vmatpush1.bf16.msra.mxu1 %v7213_v42  ;;  %446 = vmatprep.mubr.f32.mxu1 %v6967_v0  ;;  %v7257_v1 = vpack.c.bf16 %v573_v61, %v569_v60  ;;  %v572_v3 = vld [vmem:[#allocation11 + $0x1e0] sm:$0xff]  ;;  %v7280_v14 = vld [vmem:[#allocation18] sm:$0xff]  ;;  %v551_v38 = vld [vmem:[#allocation11 + $0x138] sm:$0xff] }
  0xcb   :  { %5146 = vmatprep.subr.bf16.mxu1 %v7216_v43  ;;  %4989 = vmatmul.mubr.msk.f32.gmra.mrb[2].mxu0 %vm220_vm0, %v7189_v21  ;;  %v7267_v7 = vpack.c.bf16 %v572_v3, %v568_v2  ;;  %v531_v21 = vld [vmem:[#allocation11 + $0x98] sm:$0xff]  ;;  %v7319_v40 = vpack.c.bf16 %v551_v38, %v547_v37  ;;  %v550_v44 = vld [vmem:[#allocation11 + $0x130] sm:$0xff]  ;;  %v198_v19 = vld [vmem:[#allocation12] sm:$0xf] }
  0xcc   :  { %5200 = vmatpush1.bf16.msra.mxu0 %v7191_v22  ;;  %321 = vmatprep.mubr.f32.mxu0 %v6967_v0  ;;  %v7298_v26 = vpack.c.bf16 %v535_v24, %v531_v21  ;;  %v555_v45 = vld [vmem:[#allocation11 + $0x158] sm:$0xff]  ;;  %v554_v51 = vld [vmem:[#allocation11 + $0x150] sm:$0xff] }
  0xcd   :  { %5000 = vmatmul.mubr.msk.f32.gmra.mrb[8].mxu1 %vm220_vm0, %v7223_v48  ;;  %5202 = vmatprep.subr.bf16.mxu0 %v7194_v23  ;;  %v559_v46 = vld [vmem:[#allocation11 + $0x178] sm:$0xff]  ;;  %v558_v52 = vld [vmem:[#allocation11 + $0x170] sm:$0xff] }
  0xce   :  { %5148 = vmatpush1.bf16.msra.mxu1 %v7225_v49  ;;  %452 = vmatprep.mubr.f32.mxu1 %v6967_v0  ;;  %v563_v53 = vld [vmem:[#allocation11 + $0x198] sm:$0xff]  ;;  %v566_v59 = vld [vmem:[#allocation11 + $0x1b0] sm:$0xff] }
  0xcf   :  { %5150 = vmatprep.subr.bf16.mxu1 %v7228_v50  ;;  %4990 = vmatmul.mubr.msk.f32.gmra.mrb[4].mxu0 %vm220_vm0, %v7200_v28  ;;  %v534_v28 = vld [vmem:[#allocation11 + $0xb0] sm:$0xff]  ;;  %v567_v54 = vld [vmem:[#allocation11 + $0x1b8] sm:$0xff] }
  0xd0   :  { %5204 = vmatpush1.bf16.msra.mxu0 %v7202_v29  ;;  %327 = vmatprep.mubr.f32.mxu0 %v6967_v0  ;;  %v7306_v33 = vpack.c.bf16 %v534_v28, %v530_v27  ;;  %v7335_v58 = vpack.c.bf16 %v567_v54, %v563_v53  ;;  %v571_v60 = vld [vmem:[#allocation11 + $0x1d8] sm:$0xff]  ;;  %v570_v3 = vld [vmem:[#allocation11 + $0x1d0] sm:$0xff] }
  0xd1   :  { %5001 = vmatmul.mubr.msk.f32.gmra.mrb[10].mxu1 %vm220_vm0, %v7238_v55  ;;  %5206 = vmatprep.subr.bf16.mxu0 %v7205_v32  ;;  %v575_v61 = vld [vmem:[#allocation11 + $0x1f8] sm:$0xff]  ;;  %v574_v4 = vld [vmem:[#allocation11 + $0x1f0] sm:$0xff] }
  0xd2   :  { %5152 = vmatpush1.bf16.msra.mxu1 %v7240_v56  ;;  %458 = vmatprep.mubr.f32.mxu1 %v6967_v0  ;;  %v7341_v2 = vpack.c.bf16 %v575_v61, %v571_v60  ;;  %v7344_v5 = vpack.c.bf16 %v574_v4, %v570_v3 }
  0xd3   :  { %5154 = vmatprep.subr.bf16.mxu1 %v7243_v57  ;;  %4991 = vmatmul.mubr.msk.f32.gmra.mrb[6].mxu0 %vm220_vm0, %v7211_v41  ;;  %v546_v41 = vld [vmem:[#allocation11 + $0x110] sm:$0xff] }
  0xd4   :  { %5208 = vmatpush1.bf16.msra.mxu0 %v7213_v42  ;;  %333 = vmatprep.mubr.f32.mxu0 %v6967_v0  ;;  %v7326_v47 = vpack.c.bf16 %v550_v44, %v546_v41 }
  0xd5   :  { %5002 = vmatmul.mubr.msk.f32.gmra.mrb[12].mxu1 %vm220_vm0, %v188_v62  ;;  %5210 = vmatprep.subr.bf16.mxu0 %v7216_v43 }
  0xd6   :  { %5156 = vmatpush1.bf16.msra.mxu1 %v7254_v63  ;;  %464 = vmatprep.mubr.f32.mxu1 %v6967_v0 }
  0xd7   :  { %5158 = vmatprep.subr.bf16.mxu1 %v7257_v1  ;;  %4992 = vmatmul.mubr.msk.f32.gmra.mrb[8].mxu0 %vm220_vm0, %v7223_v48  ;;  %v7329_v48 = vpack.c.bf16 %v559_v46, %v555_v45 }
  0xd8   :  { %5212 = vmatpush1.bf16.msra.mxu0 %v7225_v49  ;;  %339 = vmatprep.mubr.f32.mxu0 %v6967_v0 }
  0xd9   :  { %5003 = vmatmul.mubr.msk.f32.gmra.mrb[14].mxu1 %vm220_vm0, %v189_v6  ;;  %5214 = vmatprep.subr.bf16.mxu0 %v7228_v50 }
  0xda   :  { %5160 = vmatpush1.bf16.msra.mxu1 %v7267_v7  ;;  %640 = vmatprep.mubr.f32.mxu1 %v6967_v0 }
  0xdb   :  { %5162 = vmatprep.subr.bf16.mxu1 %v7270_v8  ;;  %4993 = vmatmul.mubr.msk.f32.gmra.mrb[10].mxu0 %vm220_vm0, %v7238_v55  ;;  %v7332_v55 = vpack.c.bf16 %v558_v52, %v554_v51 }
  0xdc   :  { %5216 = vmatpush1.bf16.msra.mxu0 %v7240_v56  ;;  %345 = vmatprep.mubr.f32.mxu0 %v6967_v0 }
  0xdd   :  { %641 = vmatmul.mubr.f32.vlgmr.msra.gmra.mrb[16].mxu1 %v7280_v14  ;;  %5218 = vmatprep.subr.bf16.mxu0 %v7243_v57 }
  0xde   :  { %5164 = vmatpush1.bf16.msra.mxu1 %v7282_v17  ;;  %711 = vmatprep.mubr.f32.mxu1 %v6967_v0 }
  0xdf   :  { %5166 = vmatprep.subr.bf16.mxu1 %v7285_v18  ;;  %4994 = vmatmul.mubr.msk.f32.gmra.mrb[12].mxu0 %vm220_vm0, %v188_v62 }
  0xe0   :  { %5220 = vmatpush1.bf16.msra.mxu0 %v7254_v63  ;;  %351 = vmatprep.mubr.f32.mxu0 %v6967_v0 }
  0xe1   :  { %5222 = vmatprep.subr.bf16.mxu0 %v7257_v1 }
  0xe2   :  { %5168 = vmatpush1.bf16.msra.mxu1 %v7294_v25 }
  0xe3   :  { %5170 = vmatprep.subr.bf16.mxu1 %v7298_v26  ;;  %4995 = vmatmul.mubr.msk.f32.gmra.mrb[14].mxu0 %vm220_vm0, %v189_v6  ;;  %v200_v6 = vlaneseq }
  0xe4   :  { %5224 = vmatpush1.bf16.msra.mxu0 %v7267_v7  ;;  %886 = vmatprep.mubr.f32.mxu0 %v6967_v0 }
  0xe5   :  { %5258 = vmatprep.subr.bf16.mxu0 %v7179_v11  ;;  %v562_v11 = vld [vmem:[#allocation11 + $0x190] sm:$0xff]  ;;  %v7367_v12 = vshrl.u32 %v200_v6, 7 }
  0xe6   :  { %5172 = vmatpush1.bf16.msra.mxu1 %v7306_v33  ;;  %v7338_v62 = vpack.c.bf16 %v566_v59, %v562_v11 }
  0xe7   :  { %5174 = vmatprep.subr.bf16.mxu1 %v7309_v34  ;;  %v202_v13 = vsub.s32 0, %v7367_v12  ;;  %v206_v20 = vsub.s32 1, %v7367_v12  ;;  %v210_v41 = vsub.s32 2, %v7367_v12  ;;  %v214_v44 = vsub.s32 3, %v7367_v12 }
  0xe9   :  { %v7373_v21 = vrot.slane %v198_v19, %v202_v13  ;;  %v7377_v24 = vrot.slane %v198_v19, %v206_v20  ;;  %v7385_v51 = vrot.slane %v198_v19, %v210_v41  ;;  %v7389_v53 = vrot.slane %v198_v19, %v214_v44 }
  0xea   :  { %5176 = vmatpush1.bf16.msra.mxu1 %v7316_v39 }
  0xeb   :  { %5178 = vmatprep.subr.bf16.mxu1 %v7319_v40 }
  0xee   :  { %5180 = vmatpush1.bf16.msra.mxu1 %v7326_v47 }
  0xef   :  { %5182 = vmatprep.subr.bf16.mxu1 %v7329_v48 }
  0xf2   :  { %5184 = vmatpush1.bf16.msra.mxu1 %v7332_v55 }
  0xf3   :  { %5186 = vmatprep.subr.bf16.mxu1 %v7335_v58 }
  0xf6   :  { %5188 = vmatpush1.bf16.msra.mxu1 %v7338_v62 }
  0xf7   :  { %5190 = vmatprep.subr.bf16.mxu1 %v7341_v2 }
  0xfa   :  { %5192 = vmatpush1.bf16.msra.mxu1 %v7344_v5 }
  0xfb   :  { %5226 = vmatprep.subr.bf16.mxu1 %v7270_v8 }
  0xfd   :  { %712 = vmatmul.mubr.f32.vlgmr.msra.gmra.mrb[0].mxu1 %v7280_v14 }
  0xfe   :  { %5228 = vmatpush1.bf16.msra.mxu1 %v7282_v17  ;;  %957 = vmatprep.mubr.f32.mxu1 %v6967_v0 }
  0xff   :  { %5230 = vmatprep.subr.bf16.mxu1 %v7285_v18 }
 0x102   :  { %5232 = vmatpush1.bf16.msra.mxu1 %v7294_v25 }
 0x103   :  { %5234 = vmatprep.subr.bf16.mxu1 %v7298_v26 }
 0x106   :  { %5236 = vmatpush1.bf16.msra.mxu1 %v7306_v33 }
 0x107   :  { %5238 = vmatprep.subr.bf16.mxu1 %v7309_v34 }
 0x10a   :  { %5240 = vmatpush1.bf16.msra.mxu1 %v7316_v39 }
 0x10b   :  { %5242 = vmatprep.subr.bf16.mxu1 %v7319_v40 }
 0x10e   :  { %5244 = vmatpush1.bf16.msra.mxu1 %v7326_v47 }
 0x10f   :  { %5246 = vmatprep.subr.bf16.mxu1 %v7329_v48 }
 0x112   :  { %5248 = vmatpush1.bf16.msra.mxu1 %v7332_v55 }
 0x113   :  { %5250 = vmatprep.subr.bf16.mxu1 %v7335_v58 }
 0x116   :  { %5252 = vmatpush1.bf16.msra.mxu1 %v7338_v62 }
 0x117   :  { %5254 = vmatprep.subr.bf16.mxu1 %v7341_v2 }
 0x11a   :  { %5256 = vmatpush1.bf16.msra.mxu1 %v7344_v5 }
 0x11b   :  { %5290 = vmatprep.subr.bf16.mxu1 %v7270_v8 }
 0x19a   :  { %v311_v9 = vpop.f32.mrb[0].mxu0 }
 0x19b   :  { %v313_v10 = vpop.f32.mrb[1].mxu0  ;;  %v312_v27 = vadd.f32 %v311_v9, %v7373_v21 }
 0x19c   :  { %v314_v28 = vadd.f32 %v313_v10, %v7377_v24 }
 0x1b0   :  { %v642_v30 = vpop.f32.mrb[16].mxu1 }
 0x1b1   :  { %v718_v31 = vadd.f32 %v642_v30, %v312_v27  ;;  %v644_v35 = vpop.f32.mrb[17].mxu1 }
 0x1b2   :  { %v719_v36 = vadd.f32 %v644_v35, %v314_v28 }
 0x1b3   :  { %v5004_v38 = vmul.f32 -1.442695, %v718_v31 }
 0x1b4   :  { %v5005_v37 = vmul.f32 -1.442695, %v719_v36 }
 0x1b6   :  { %6395 = vpow2.f32 %v5005_v37 }
 0x1b7   :  { %6397 = vpow2.f32 %v5004_v38 }
 0x1c0   :  { %v6396_v45 = vpop.eup %6395 }
 0x1c1   :  { %v6398_v46 = vpop.eup %6397  ;;  %v732_v52 = vadd.f32 1.0, %v6396_v45 }
 0x1c2   :  { %v731_v54 = vadd.f32 1.0, %v6398_v46 }
 0x1c3   :  { %6399 = vrcp.f32 %v732_v52 }
 0x1c4   :  { %6401 = vrcp.f32 %v731_v54 }
 0x1cd   :  { %v6400_v4 = vpop.eup %6399 }
 0x1ce   :  { %v6402_v6 = vpop.eup %6401  ;;  %v741_v27 = vmul.f32 %v6400_v4, %v7280_v14 }
 0x1d0   :  { %v713_v11 = vpop.f32.mrb[0].mxu1 }
 0x1d1   :  { %v6267_v59 = vadd.f32 %v713_v11, %v7385_v51  ;;  %v715_v60 = vpop.f32.mrb[1].mxu1 }
 0x1d2   :  { %v6268_v61 = vadd.f32 %v715_v60, %v7389_v53 }
 0x1d3   :  { %v5006_v3 = vmul.f32 -1.442695, %v6267_v59 }
 0x1d4   :  { %6403 = vtanh.f32 %v6268_v61  ;;  %v1268_v61 = vld [vmem:[#allocation11 + $0x80] sm:$0xff] }
 0x1d5   :  { %6405 = vpow2.f32 %v5006_v3  ;;  %v1272_v3 = vld [vmem:[#allocation11 + $0xa0] sm:$0xff] }
 0x1d6   :  { %v7477_v4 = vpack.c.bf16 %v1272_v3, %v1268_v61 }
 0x1de   :  { %v6404_v9 = vpop.eup %6403 }
 0x1df   :  { %v6406_v10 = vpop.eup %6405  ;;  %v742_v19 = vmul.f32 %v6404_v9, %v6402_v6  ;;  %v1277_v6 = vld [vmem:[#allocation11 + $0xc8] sm:$0xff] }
 0x1e0   :  { %v733_v28 = vadd.f32 1.0, %v6406_v10  ;;  %v1281_v9 = vld [vmem:[#allocation11 + $0xe8] sm:$0xff] }
 0x1e1   :  { %v7394_v30 = vadd.f32 %v742_v19, %v741_v27  ;;  %v7481_v10 = vpack.c.bf16 %v1281_v9, %v1277_v6  ;;  %v1276_v27 = vld [vmem:[#allocation11 + $0xc0] sm:$0xff] }
 0x1e2   :  { %6407 = vrcp.f32 %v733_v28  ;;  %v1280_v19 = vld [vmem:[#allocation11 + $0xe0] sm:$0xff] }
 0x1e3   :  { %6409 = vtanh.f32 %v7394_v30  ;;  %v7483_v28 = vpack.c.bf16 %v1280_v19, %v1276_v27 }
 0x1ec   :  { %v6408_v31 = vpop.eup %6407 }
 0x1ed   :  { %v6410_v35 = vpop.eup %6409 }
 0x1ee   :  { %v7397_v36 = vmul.f32 %v6410_v35, %v6408_v31  ;;  %v1289_v31 = vld [vmem:[#allocation11 + $0x128] sm:$0xff] }
 0x1f0   :  { %887 = vmatmul.mubr.f32.vlgmr.msra.gmra.mrb[2].mxu0 %v7397_v36  ;;  %958 = vmatmul.mubr.f32.vlgmr.msra.gmra.mrb[2].mxu1 %v7397_v36 }
 0x1f1   :  { %5260 = vmatpush1.bf16.msra.mxu0 %v7181_v15  ;;  %5292 = vmatpush1.bf16.msra.mxu1 %v7282_v17 }
 0x1f2   :  { %5262 = vmatprep.subr.bf16.mxu0 %v7184_v16  ;;  %5294 = vmatprep.subr.bf16.mxu1 %v7285_v18 }
 0x1f3   :  { %1133 = vmatprep.mubr.f32.mxu0 %v6967_v0  ;;  %1204 = vmatprep.mubr.f32.mxu1 %v6967_v0 }
 0x1f5   :  { %5264 = vmatpush1.bf16.msra.mxu0 %v7191_v22  ;;  %5296 = vmatpush1.bf16.msra.mxu1 %v7294_v25 }
 0x1f6   :  { %5266 = vmatprep.subr.bf16.mxu0 %v7194_v23  ;;  %5298 = vmatprep.subr.bf16.mxu1 %v7298_v26 }
 0x1f9   :  { %5268 = vmatpush1.bf16.msra.mxu0 %v7202_v29  ;;  %5300 = vmatpush1.bf16.msra.mxu1 %v7306_v33 }
 0x1fa   :  { %5270 = vmatprep.subr.bf16.mxu0 %v7205_v32  ;;  %5302 = vmatprep.subr.bf16.mxu1 %v7309_v34 }
 0x1fd   :  { %5272 = vmatpush1.bf16.msra.mxu0 %v7213_v42  ;;  %5304 = vmatpush1.bf16.msra.mxu1 %v7316_v39 }
 0x1fe   :  { %5274 = vmatprep.subr.bf16.mxu0 %v7216_v43  ;;  %5306 = vmatprep.subr.bf16.mxu1 %v7319_v40 }
 0x201   :  { %5276 = vmatpush1.bf16.msra.mxu0 %v7225_v49  ;;  %5308 = vmatpush1.bf16.msra.mxu1 %v7326_v47 }
 0x202   :  { %5278 = vmatprep.subr.bf16.mxu0 %v7228_v50  ;;  %5310 = vmatprep.subr.bf16.mxu1 %v7329_v48 }
 0x205   :  { %5280 = vmatpush1.bf16.msra.mxu0 %v7240_v56  ;;  %5312 = vmatpush1.bf16.msra.mxu1 %v7332_v55 }
 0x206   :  { %5282 = vmatprep.subr.bf16.mxu0 %v7243_v57  ;;  %5314 = vmatprep.subr.bf16.mxu1 %v7335_v58 }
 0x209   :  { %5284 = vmatpush1.bf16.msra.mxu0 %v7254_v63  ;;  %5316 = vmatpush1.bf16.msra.mxu1 %v7338_v62 }
 0x20a   :  { %5286 = vmatprep.subr.bf16.mxu0 %v7257_v1  ;;  %5318 = vmatprep.subr.bf16.mxu1 %v7341_v2 }
 0x20d   :  { %5288 = vmatpush1.bf16.msra.mxu0 %v7267_v7  ;;  %5320 = vmatpush1.bf16.msra.mxu1 %v7344_v5 }
 0x20e   :  { %5354 = vmatprep.subr.bf16.mxu1 %v7270_v8 }
 0x2c3   :  { %v888_v15 = vpop.f32.mrb[2].mxu0  ;;  %v959_v16 = vpop.f32.mrb[2].mxu1 }
 0x2c4   :  { %v6253_v22 = vadd.f32 %v888_v15, %v7373_v21  ;;  %v890_v23 = vpop.f32.mrb[3].mxu0  ;;  %v961_v29 = vpop.f32.mrb[3].mxu1  ;;  %v6269_v49 = vadd.f32 %v959_v16, %v7385_v51  ;;  %v1284_v15 = vld [vmem:[#allocation11 + $0x100] sm:$0xff] }
 0x2c5   :  { %v6254_v32 = vadd.f32 %v890_v23, %v7377_v24  ;;  %v6270_v50 = vadd.f32 %v961_v29, %v7389_v53  ;;  %v1288_v16 = vld [vmem:[#allocation11 + $0x120] sm:$0xff]  ;;  %v1293_v23 = vld [vmem:[#allocation11 + $0x148] sm:$0xff] }
 0x2c6   :  { %v5007_v42 = vmul.f32 -1.442695, %v6253_v22  ;;  %v5009_v56 = vmul.f32 -1.442695, %v6269_v49  ;;  %v7489_v22 = vpack.c.bf16 %v1288_v16, %v1284_v15  ;;  %v1297_v29 = vld [vmem:[#allocation11 + $0x168] sm:$0xff] }
 0x2c7   :  { %v5008_v43 = vmul.f32 -1.442695, %v6254_v32  ;;  %v7493_v32 = vpack.c.bf16 %v1297_v29, %v1293_v23 }
 0x2c8   :  { %6411 = vpow2.f32 %v5007_v42  ;;  %v1292_v42 = vld [vmem:[#allocation11 + $0x140] sm:$0xff] }
 0x2c9   :  { %6413 = vpow2.f32 %v5008_v43  ;;  %v1296_v43 = vld [vmem:[#allocation11 + $0x160] sm:$0xff] }
 0x2ca   :  { %6415 = vtanh.f32 %v6270_v50  ;;  %v7495_v49 = vpack.c.bf16 %v1296_v43, %v1292_v42  ;;  %v1301_v50 = vld [vmem:[#allocation11 + $0x188] sm:$0xff]  ;;  %v1506_v43 = vld [vmem:[#allocation11 + $0x38] sm:$0xff] }
 0x2cb   :  { %6417 = vpow2.f32 %v5009_v56  ;;  %v1305_v56 = vld [vmem:[#allocation11 + $0x1a8] sm:$0xff] }
 0x2d2   :  { %v6412_v57 = vpop.eup %6411 }
 0x2d3   :  { %v977_v63 = vadd.f32 1.0, %v6412_v57  ;;  %v6414_v1 = vpop.eup %6413  ;;  %v1300_v57 = vld [vmem:[#allocation11 + $0x180] sm:$0xff] }
 0x2d4   :  { %v978_v7 = vadd.f32 1.0, %v6414_v1  ;;  %v6416_v8 = vpop.eup %6415  ;;  %v1304_v1 = vld [vmem:[#allocation11 + $0x1a0] sm:$0xff] }
 0x2d5   :  { %6419 = vrcp.f32 %v977_v63  ;;  %v6418_v14 = vpop.eup %6417  ;;  %v7498_v63 = vpack.c.bf16 %v1305_v56, %v1301_v50  ;;  %v1501_v56 = vld [vmem:[#allocation11 + $0x10] sm:$0xff] }
 0x2d6   :  { %6421 = vrcp.f32 %v978_v7  ;;  %v979_v46 = vadd.f32 1.0, %v6418_v14  ;;  %v1309_v7 = vld [vmem:[#allocation11 + $0x1c8] sm:$0xff]  ;;  %v7501_v14 = vpack.c.bf16 %v1304_v1, %v1300_v57  ;;  %v1505_v57 = vld [vmem:[#allocation11 + $0x30] sm:$0xff] }
 0x2d7   :  { %v7544_v1 = vpack.c.bf16 %v1505_v57, %v1501_v56  ;;  %v1550_v56 = vld [vmem:[#allocation11 + $0x198] sm:$0xff] }
 0x2d8   :  { %6423 = vrcp.f32 %v979_v46  ;;  %v1554_v57 = vld [vmem:[#allocation11 + $0x1b8] sm:$0xff] }
 0x2df   :  { %v6420_v37 = vpop.eup %6419 }
 0x2e0   :  { %v988_v38 = vmul.f32 %v6420_v37, %v6416_v8  ;;  %v6422_v45 = vpop.eup %6421  ;;  %v1313_v8 = vld [vmem:[#allocation11 + $0x1e8] sm:$0xff] }
 0x2e1   :  { %v987_v52 = vmul.f32 %v6422_v45, %v7394_v30  ;;  %v1285_v30 = vld [vmem:[#allocation11 + $0x108] sm:$0xff]  ;;  %v7504_v37 = vpack.c.bf16 %v1313_v8, %v1309_v7  ;;  %v1312_v45 = vld [vmem:[#allocation11 + $0x1e0] sm:$0xff]  ;;  %v1510_v7 = vld [vmem:[#allocation11 + $0x58] sm:$0xff] }
 0x2e2   :  { %v6424_v11 = vpop.eup %6423  ;;  %v7487_v35 = vpack.c.bf16 %v1289_v31, %v1285_v30  ;;  %v1514_v8 = vld [vmem:[#allocation11 + $0x78] sm:$0xff] }
 0x2e3   :  { %v7439_v54 = vadd.f32 %v988_v38, %v987_v52  ;;  %v1308_v38 = vld [vmem:[#allocation11 + $0x1c0] sm:$0xff] }
 0x2e4   :  { %v7507_v46 = vpack.c.bf16 %v1312_v45, %v1308_v38  ;;  %v7548_v38 = vpack.c.bf16 %v1514_v8, %v1510_v7  ;;  %v1509_v45 = vld [vmem:[#allocation11 + $0x50] sm:$0xff]  ;;  %v7577_v8 = vpack.c.bf16 %v1554_v57, %v1550_v56 }
 0x2e5   :  { %6425 = vtanh.f32 %v7439_v54  ;;  %v1549_v7 = vld [vmem:[#allocation11 + $0x190] sm:$0xff] }
 0x2ef   :  { %v6426_v59 = vpop.eup %6425 }
 0x2f0   :  { %v7442_v60 = vmul.f32 %v6426_v59, %v6424_v11 }
 0x2f2   :  { %1134 = vmatmul.mubr.f32.vlgmr.msra.gmra.mrb[4].mxu0 %v7442_v60  ;;  %1205 = vmatmul.mubr.f32.vlgmr.msra.gmra.mrb[4].mxu1 %v7442_v60 }
 0x2f3   :  { %5356 = vmatpush1.bf16.msra.mxu1 %v7282_v17  ;;  %1380 = vmatprep.mubr.f32.mxu0 %v6967_v0  ;;  %v1253_v17 = vld [vmem:[#allocation11 + $0x8] sm:$0xff] }
 0x2f4   :  { %5358 = vmatprep.subr.bf16.mxu1 %v7285_v18  ;;  %1451 = vmatprep.mubr.f32.mxu1 %v6967_v0  ;;  %v1257_v18 = vld [vmem:[#allocation11 + $0x28] sm:$0xff] }
 0x2f7   :  { %5360 = vmatpush1.bf16.msra.mxu1 %v7294_v25  ;;  %v7463_v25 = vpack.c.bf16 %v1257_v18, %v1253_v17 }
 0x2f8   :  { %5362 = vmatprep.subr.bf16.mxu1 %v7298_v26  ;;  %v1252_v26 = vld [vmem:[#allocation11] sm:$0xff] }
 0x2f9   :  { %5322 = vmatprep.subr.bf16.mxu0 %v7463_v25 }
 0x2fb   :  { %5364 = vmatpush1.bf16.msra.mxu1 %v7306_v33  ;;  %v1256_v33 = vld [vmem:[#allocation11 + $0x20] sm:$0xff] }
 0x2fc   :  { %5366 = vmatprep.subr.bf16.mxu1 %v7309_v34  ;;  %v7465_v34 = vpack.c.bf16 %v1256_v33, %v1252_v26 }
 0x2fe   :  { %5324 = vmatpush1.bf16.msra.mxu0 %v7465_v34 }
 0x2ff   :  { %5368 = vmatpush1.bf16.msra.mxu1 %v7316_v39  ;;  %v1261_v39 = vld [vmem:[#allocation11 + $0x48] sm:$0xff] }
 0x300   :  { %5370 = vmatprep.subr.bf16.mxu1 %v7319_v40  ;;  %v1265_v40 = vld [vmem:[#allocation11 + $0x68] sm:$0xff] }
 0x303   :  { %5372 = vmatpush1.bf16.msra.mxu1 %v7326_v47  ;;  %v7469_v47 = vpack.c.bf16 %v1265_v40, %v1261_v39 }
 0x304   :  { %5374 = vmatprep.subr.bf16.mxu1 %v7329_v48  ;;  %v1260_v48 = vld [vmem:[#allocation11 + $0x40] sm:$0xff] }
 0x305   :  { %5326 = vmatprep.subr.bf16.mxu0 %v7469_v47 }
 0x307   :  { %5376 = vmatpush1.bf16.msra.mxu1 %v7332_v55  ;;  %v1264_v55 = vld [vmem:[#allocation11 + $0x60] sm:$0xff] }
 0x308   :  { %5378 = vmatprep.subr.bf16.mxu1 %v7335_v58  ;;  %v7471_v58 = vpack.c.bf16 %v1264_v55, %v1260_v48 }
 0x30a   :  { %5328 = vmatpush1.bf16.msra.mxu0 %v7471_v58 }
 0x30b   :  { %5380 = vmatpush1.bf16.msra.mxu1 %v7338_v62  ;;  %v1269_v62 = vld [vmem:[#allocation11 + $0x88] sm:$0xff] }
 0x30c   :  { %5382 = vmatprep.subr.bf16.mxu1 %v7341_v2  ;;  %v1273_v2 = vld [vmem:[#allocation11 + $0xa8] sm:$0xff] }
 0x30f   :  { %5384 = vmatpush1.bf16.msra.mxu1 %v7344_v5  ;;  %v7475_v5 = vpack.c.bf16 %v1273_v2, %v1269_v62 }
 0x311   :  { %5330 = vmatprep.subr.bf16.mxu0 %v7475_v5 }
 0x312   :  { %5332 = vmatpush1.bf16.msra.mxu0 %v7477_v4 }
 0x313   :  { %5334 = vmatprep.subr.bf16.mxu0 %v7481_v10 }
 0x316   :  { %5336 = vmatpush1.bf16.msra.mxu0 %v7483_v28 }
 0x317   :  { %5338 = vmatprep.subr.bf16.mxu0 %v7487_v35 }
 0x31a   :  { %5340 = vmatpush1.bf16.msra.mxu0 %v7489_v22 }
 0x31b   :  { %5342 = vmatprep.subr.bf16.mxu0 %v7493_v32 }
 0x31e   :  { %5344 = vmatpush1.bf16.msra.mxu0 %v7495_v49 }
 0x31f   :  { %5346 = vmatprep.subr.bf16.mxu0 %v7498_v63 }
 0x322   :  { %5348 = vmatpush1.bf16.msra.mxu0 %v7501_v14 }
 0x323   :  { %5350 = vmatprep.subr.bf16.mxu0 %v7504_v37 }
 0x326   :  { %5352 = vmatpush1.bf16.msra.mxu0 %v7507_v46 }
 0x327   :  { %5386 = vmatprep.subr.bf16.mxu0 %v7463_v25 }
 0x3c5   :  { %v1135_v52 = vpop.f32.mrb[4].mxu0  ;;  %v1206_v11 = vpop.f32.mrb[4].mxu1 }
 0x3c6   :  { %v6255_v59 = vadd.f32 %v1135_v52, %v7373_v21  ;;  %v1137_v17 = vpop.f32.mrb[5].mxu0  ;;  %v1208_v18 = vpop.f32.mrb[5].mxu1  ;;  %v6271_v40 = vadd.f32 %v1206_v11, %v7385_v51  ;;  %v1513_v52 = vld [vmem:[#allocation11 + $0x70] sm:$0xff] }
 0x3c7   :  { %v6256_v26 = vadd.f32 %v1137_v17, %v7377_v24  ;;  %v6272_v48 = vadd.f32 %v1208_v18, %v7389_v53  ;;  %v7550_v11 = vpack.c.bf16 %v1513_v52, %v1509_v45  ;;  %v1522_v17 = vld [vmem:[#allocation11 + $0xb8] sm:$0xff]  ;;  %v1553_v45 = vld [vmem:[#allocation11 + $0x1b0] sm:$0xff] }
 0x3c8   :  { %v5010_v33 = vmul.f32 -1.442695, %v6255_v59  ;;  %v5012_v55 = vmul.f32 -1.442695, %v6271_v40  ;;  %v1518_v59 = vld [vmem:[#allocation11 + $0x98] sm:$0xff] }
 0x3c9   :  { %v5011_v39 = vmul.f32 -1.442695, %v6256_v26  ;;  %v7554_v18 = vpack.c.bf16 %v1522_v17, %v1518_v59  ;;  %v1517_v26 = vld [vmem:[#allocation11 + $0x90] sm:$0xff]  ;;  %v1526_v40 = vld [vmem:[#allocation11 + $0xd8] sm:$0xff]  ;;  %v7580_v17 = vpack.c.bf16 %v1553_v45, %v1549_v7 }
 0x3ca   :  { %6427 = vpow2.f32 %v5010_v33  ;;  %v1521_v33 = vld [vmem:[#allocation11 + $0xb0] sm:$0xff]  ;;  %v1558_v52 = vld [vmem:[#allocation11 + $0x1d8] sm:$0xff] }
 0x3cb   :  { %6429 = vpow2.f32 %v5011_v39  ;;  %v7556_v39 = vpack.c.bf16 %v1521_v33, %v1517_v26  ;;  %v1562_v59 = vld [vmem:[#allocation11 + $0x1f8] sm:$0xff]  ;;  %v1557_v33 = vld [vmem:[#allocation11 + $0x1d0] sm:$0xff] }
 0x3cc   :  { %6431 = vtanh.f32 %v6272_v48  ;;  %v1530_v48 = vld [vmem:[#allocation11 + $0xf8] sm:$0xff]  ;;  %v7583_v26 = vpack.c.bf16 %v1562_v59, %v1558_v52 }
 0x3cd   :  { %6433 = vpow2.f32 %v5012_v55  ;;  %v7560_v55 = vpack.c.bf16 %v1530_v48, %v1526_v40  ;;  %v1561_v40 = vld [vmem:[#allocation11 + $0x1f0] sm:$0xff] }
 0x3ce   :  { %v7586_v48 = vpack.c.bf16 %v1561_v40, %v1557_v33 }
 0x3d4   :  { %v6428_v62 = vpop.eup %6427 }
 0x3d5   :  { %v1224_v2 = vadd.f32 1.0, %v6428_v62  ;;  %v6430_v61 = vpop.eup %6429  ;;  %v1525_v62 = vld [vmem:[#allocation11 + $0xd0] sm:$0xff] }
 0x3d6   :  { %v1225_v3 = vadd.f32 1.0, %v6430_v61  ;;  %v6432_v6 = vpop.eup %6431 }
 0x3d7   :  { %6435 = vrcp.f32 %v1224_v2  ;;  %v6434_v9 = vpop.eup %6433  ;;  %v1529_v2 = vld [vmem:[#allocation11 + $0xf0] sm:$0xff] }
 0x3d8   :  { %6437 = vrcp.f32 %v1225_v3  ;;  %v1226_v31 = vadd.f32 1.0, %v6434_v9  ;;  %v7562_v61 = vpack.c.bf16 %v1529_v2, %v1525_v62  ;;  %v1534_v3 = vld [vmem:[#allocation11 + $0x118] sm:$0xff] }
 0x3da   :  { %6439 = vrcp.f32 %v1226_v31  ;;  %v1542_v31 = vld [vmem:[#allocation11 + $0x158] sm:$0xff] }
 0x3e1   :  { %v6436_v27 = vpop.eup %6435 }
 0x3e2   :  { %v1235_v19 = vmul.f32 %v6436_v27, %v6432_v6  ;;  %v6438_v30 = vpop.eup %6437  ;;  %v1538_v6 = vld [vmem:[#allocation11 + $0x138] sm:$0xff]  ;;  %v1533_v27 = vld [vmem:[#allocation11 + $0x110] sm:$0xff] }
 0x3e3   :  { %v1234_v15 = vmul.f32 %v6438_v30, %v7439_v54  ;;  %v1502_v54 = vld [vmem:[#allocation11 + $0x18] sm:$0xff]  ;;  %v7566_v9 = vpack.c.bf16 %v1538_v6, %v1534_v3 }
 0x3e4   :  { %v6440_v23 = vpop.eup %6439  ;;  %v7542_v50 = vpack.c.bf16 %v1506_v43, %v1502_v54  ;;  %v1545_v54 = vld [vmem:[#allocation11 + $0x170] sm:$0xff] }
 0x3e5   :  { %v7517_v16 = vadd.f32 %v1235_v19, %v1234_v15  ;;  %v1537_v19 = vld [vmem:[#allocation11 + $0x130] sm:$0xff]  ;;  %v1546_v15 = vld [vmem:[#allocation11 + $0x178] sm:$0xff] }
 0x3e6   :  { %5418 = vmatprep.subr.bf16.mxu1 %v7542_v50  ;;  %v7568_v30 = vpack.c.bf16 %v1537_v19, %v1533_v27 }
 0x3e7   :  { %6441 = vtanh.f32 %v7517_v16 }
 0x3f1   :  { %v6442_v29 = vpop.eup %6441 }
 0x3f2   :  { %v7520_v42 = vmul.f32 %v6442_v29, %v6440_v23  ;;  %v7572_v23 = vpack.c.bf16 %v1546_v15, %v1542_v31  ;;  %v1541_v29 = vld [vmem:[#allocation11 + $0x150] sm:$0xff] }
 0x3f3   :  { %v7574_v43 = vpack.c.bf16 %v1545_v54, %v1541_v29 }
 0x3f4   :  { %1381 = vmatmul.mubr.f32.vlgmr.msra.gmra.mrb[6].mxu0 %v7520_v42  ;;  %1452 = vmatmul.mubr.f32.vlgmr.msra.gmra.mrb[6].mxu1 %v7520_v42 }
 0x3f5   :  { %5388 = vmatpush1.bf16.msra.mxu0 %v7465_v34  ;;  %1627 = vmatprep.mubr.f32.mxu0 %v6967_v0 }
 0x3f6   :  { %5390 = vmatprep.subr.bf16.mxu0 %v7469_v47  ;;  %1698 = vmatprep.mubr.f32.mxu1 %v6967_v0 }
 0x3f7   :  { %5420 = vmatpush1.bf16.msra.mxu1 %v7544_v1 }
 0x3f8   :  { %5422 = vmatprep.subr.bf16.mxu1 %v7548_v38 }
 0x3f9   :  { %5392 = vmatpush1.bf16.msra.mxu0 %v7471_v58 }
 0x3fa   :  { %5394 = vmatprep.subr.bf16.mxu0 %v7475_v5 }
 0x3fb   :  { %5424 = vmatpush1.bf16.msra.mxu1 %v7550_v11 }
 0x3fc   :  { %5426 = vmatprep.subr.bf16.mxu1 %v7554_v18 }
 0x3fd   :  { %5396 = vmatpush1.bf16.msra.mxu0 %v7477_v4 }
 0x3fe   :  { %5398 = vmatprep.subr.bf16.mxu0 %v7481_v10 }
 0x3ff   :  { %5428 = vmatpush1.bf16.msra.mxu1 %v7556_v39 }
 0x400   :  { %5430 = vmatprep.subr.bf16.mxu1 %v7560_v55 }
 0x401   :  { %5400 = vmatpush1.bf16.msra.mxu0 %v7483_v28 }
 0x402   :  { %5402 = vmatprep.subr.bf16.mxu0 %v7487_v35 }
 0x403   :  { %5432 = vmatpush1.bf16.msra.mxu1 %v7562_v61 }
 0x404   :  { %5434 = vmatprep.subr.bf16.mxu1 %v7566_v9 }
 0x405   :  { %5404 = vmatpush1.bf16.msra.mxu0 %v7489_v22 }
 0x406   :  { %5406 = vmatprep.subr.bf16.mxu0 %v7493_v32 }
 0x407   :  { %5436 = vmatpush1.bf16.msra.mxu1 %v7568_v30 }
 0x408   :  { %5438 = vmatprep.subr.bf16.mxu1 %v7572_v23 }
 0x409   :  { %5408 = vmatpush1.bf16.msra.mxu0 %v7495_v49 }
 0x40a   :  { %5410 = vmatprep.subr.bf16.mxu0 %v7498_v63 }
 0x40b   :  { %5440 = vmatpush1.bf16.msra.mxu1 %v7574_v43 }
 0x40c   :  { %5442 = vmatprep.subr.bf16.mxu1 %v7577_v8 }
 0x40d   :  { %5412 = vmatpush1.bf16.msra.mxu0 %v7501_v14 }
 0x40e   :  { %5414 = vmatprep.subr.bf16.mxu0 %v7504_v37 }
 0x40f   :  { %5444 = vmatpush1.bf16.msra.mxu1 %v7580_v17 }
 0x410   :  { %5446 = vmatprep.subr.bf16.mxu1 %v7583_v26 }
 0x411   :  { %5416 = vmatpush1.bf16.msra.mxu0 %v7507_v46 }
 0x412   :  { %5450 = vmatprep.subr.bf16.mxu0 %v7463_v25 }
 0x413   :  { %5448 = vmatpush1.bf16.msra.mxu1 %v7586_v48 }
 0x414   :  { %5482 = vmatprep.subr.bf16.mxu1 %v7542_v50 }
 0x4c7   :  { %v1382_v62 = vpop.f32.mrb[6].mxu0  ;;  %v1453_v2 = vpop.f32.mrb[6].mxu1 }
 0x4c8   :  { %v6257_v3 = vadd.f32 %v1382_v62, %v7373_v21  ;;  %v1384_v6 = vpop.f32.mrb[7].mxu0  ;;  %v1455_v27 = vpop.f32.mrb[7].mxu1  ;;  %v6273_v29 = vadd.f32 %v1453_v2, %v7385_v51 }
 0x4c9   :  { %v6258_v19 = vadd.f32 %v1384_v6, %v7377_v24  ;;  %v6274_v54 = vadd.f32 %v1455_v27, %v7389_v53 }
 0x4ca   :  { %v5013_v31 = vmul.f32 -1.442695, %v6257_v3  ;;  %v5015_v56 = vmul.f32 -1.442695, %v6273_v29 }
 0x4cb   :  { %v5014_v15 = vmul.f32 -1.442695, %v6258_v19 }
 0x4cc   :  { %6443 = vpow2.f32 %v5013_v31 }
 0x4cd   :  { %6445 = vpow2.f32 %v5014_v15 }
 0x4ce   :  { %6447 = vtanh.f32 %v6274_v54 }
 0x4cf   :  { %6449 = vpow2.f32 %v5015_v56 }
 0x4d6   :  { %v6444_v57 = vpop.eup %6443 }
 0x4d7   :  { %v1471_v7 = vadd.f32 1.0, %v6444_v57  ;;  %v6446_v45 = vpop.eup %6445 }
 0x4d8   :  { %v1472_v52 = vadd.f32 1.0, %v6446_v45  ;;  %v6448_v59 = vpop.eup %6447 }
 0x4d9   :  { %6451 = vrcp.f32 %v1471_v7  ;;  %v6450_v33 = vpop.eup %6449 }
 0x4da   :  { %6453 = vrcp.f32 %v1472_v52  ;;  %v1473_v6 = vadd.f32 1.0, %v6450_v33 }
 0x4dc   :  { %6455 = vrcp.f32 %v1473_v6 }
 0x4e3   :  { %v6452_v40 = vpop.eup %6451 }
 0x4e4   :  { %v1482_v62 = vmul.f32 %v6452_v40, %v6448_v59  ;;  %v6454_v3 = vpop.eup %6453 }
 0x4e5   :  { %v1481_v19 = vmul.f32 %v6454_v3, %v7517_v16 }
 0x4e6   :  { %v6456_v27 = vpop.eup %6455 }
 0x4e7   :  { %v7596_v2 = vadd.f32 %v1482_v62, %v1481_v19 }
 0x4e9   :  { %6457 = vtanh.f32 %v7596_v2 }
 0x4f3   :  { %v6458_v31 = vpop.eup %6457 }
 0x4f4   :  { %v7599_v15 = vmul.f32 %v6458_v31, %v6456_v27 }
 0x4f6   :  { %1628 = vmatmul.mubr.f32.vlgmr.msra.gmra.mrb[8].mxu0 %v7599_v15  ;;  %1699 = vmatmul.mubr.f32.vlgmr.msra.gmra.mrb[8].mxu1 %v7599_v15 }
 0x4f7   :  { %5452 = vmatpush1.bf16.msra.mxu0 %v7465_v34  ;;  %5484 = vmatpush1.bf16.msra.mxu1 %v7544_v1 }
 0x4f8   :  { %5454 = vmatprep.subr.bf16.mxu0 %v7469_v47  ;;  %5486 = vmatprep.subr.bf16.mxu1 %v7548_v38 }
 0x4f9   :  { %1874 = vmatprep.mubr.f32.mxu0 %v6967_v0  ;;  %1945 = vmatprep.mubr.f32.mxu1 %v6967_v0 }
 0x4fb   :  { %5456 = vmatpush1.bf16.msra.mxu0 %v7471_v58  ;;  %5488 = vmatpush1.bf16.msra.mxu1 %v7550_v11 }
 0x4fc   :  { %5458 = vmatprep.subr.bf16.mxu0 %v7475_v5  ;;  %5490 = vmatprep.subr.bf16.mxu1 %v7554_v18 }
 0x4ff   :  { %5460 = vmatpush1.bf16.msra.mxu0 %v7477_v4  ;;  %5492 = vmatpush1.bf16.msra.mxu1 %v7556_v39 }
 0x500   :  { %5462 = vmatprep.subr.bf16.mxu0 %v7481_v10  ;;  %5494 = vmatprep.subr.bf16.mxu1 %v7560_v55 }
 0x503   :  { %5464 = vmatpush1.bf16.msra.mxu0 %v7483_v28  ;;  %5496 = vmatpush1.bf16.msra.mxu1 %v7562_v61 }
 0x504   :  { %5466 = vmatprep.subr.bf16.mxu0 %v7487_v35  ;;  %5498 = vmatprep.subr.bf16.mxu1 %v7566_v9 }
 0x507   :  { %5468 = vmatpush1.bf16.msra.mxu0 %v7489_v22  ;;  %5500 = vmatpush1.bf16.msra.mxu1 %v7568_v30 }
 0x508   :  { %5470 = vmatprep.subr.bf16.mxu0 %v7493_v32  ;;  %5502 = vmatprep.subr.bf16.mxu1 %v7572_v23 }
 0x50b   :  { %5472 = vmatpush1.bf16.msra.mxu0 %v7495_v49  ;;  %5504 = vmatpush1.bf16.msra.mxu1 %v7574_v43 }
 0x50c   :  { %5474 = vmatprep.subr.bf16.mxu0 %v7498_v63  ;;  %5506 = vmatprep.subr.bf16.mxu1 %v7577_v8 }
 0x50f   :  { %5476 = vmatpush1.bf16.msra.mxu0 %v7501_v14  ;;  %5508 = vmatpush1.bf16.msra.mxu1 %v7580_v17 }
 0x510   :  { %5478 = vmatprep.subr.bf16.mxu0 %v7504_v37  ;;  %5510 = vmatprep.subr.bf16.mxu1 %v7583_v26 }
 0x513   :  { %5480 = vmatpush1.bf16.msra.mxu0 %v7507_v46  ;;  %5512 = vmatpush1.bf16.msra.mxu1 %v7586_v48 }
 0x514   :  { %5514 = vmatprep.subr.bf16.mxu0 %v7463_v25  ;;  %5546 = vmatprep.subr.bf16.mxu1 %v7542_v50 }
 0x5c9   :  { %v1629_v16 = vpop.f32.mrb[8].mxu0  ;;  %v1700_v29 = vpop.f32.mrb[8].mxu1 }
 0x5ca   :  { %v6259_v54 = vadd.f32 %v1629_v16, %v7373_v21  ;;  %v1631_v56 = vpop.f32.mrb[9].mxu0  ;;  %v1702_v57 = vpop.f32.mrb[9].mxu1  ;;  %v6275_v59 = vadd.f32 %v1700_v29, %v7385_v51 }
 0x5cb   :  { %v6260_v7 = vadd.f32 %v1631_v56, %v7377_v24  ;;  %v6276_v33 = vadd.f32 %v1702_v57, %v7389_v53 }
 0x5cc   :  { %v5016_v45 = vmul.f32 -1.442695, %v6259_v54  ;;  %v5018_v40 = vmul.f32 -1.442695, %v6275_v59 }
 0x5cd   :  { %v5017_v52 = vmul.f32 -1.442695, %v6260_v7 }
 0x5ce   :  { %6459 = vpow2.f32 %v5016_v45 }
 0x5cf   :  { %6461 = vpow2.f32 %v5017_v52 }
 0x5d0   :  { %6463 = vtanh.f32 %v6276_v33 }
 0x5d1   :  { %6465 = vpow2.f32 %v5018_v40 }
 0x5d8   :  { %v6460_v25 = vpop.eup %6459 }
 0x5d9   :  { %v1718_v62 = vadd.f32 1.0, %v6460_v25  ;;  %v6462_v3 = vpop.eup %6461 }
 0x5da   :  { %v1719_v6 = vadd.f32 1.0, %v6462_v3  ;;  %v6464_v19 = vpop.eup %6463 }
 0x5db   :  { %6467 = vrcp.f32 %v1718_v62  ;;  %v6466_v27 = vpop.eup %6465 }
 0x5dc   :  { %6469 = vrcp.f32 %v1719_v6  ;;  %v1720_v56 = vadd.f32 1.0, %v6466_v27 }
 0x5de   :  { %6471 = vrcp.f32 %v1720_v56  ;;  %v2265_v56 = vld [vmem:[#allocation11 + $0xc8] sm:$0xff] }
 0x5e5   :  { %v6468_v31 = vpop.eup %6467 }
 0x5e6   :  { %v1729_v16 = vmul.f32 %v6468_v31, %v6464_v19  ;;  %v6470_v54 = vpop.eup %6469 }
 0x5e7   :  { %v1728_v7 = vmul.f32 %v6470_v54, %v7596_v2 }
 0x5e8   :  { %v6472_v57 = vpop.eup %6471 }
 0x5e9   :  { %v7642_v29 = vadd.f32 %v1729_v16, %v1728_v7  ;;  %v2260_v16 = vld [vmem:[#allocation11 + $0xa0] sm:$0xff]  ;;  %v2269_v7 = vld [vmem:[#allocation11 + $0xe8] sm:$0xff] }
 0x5eb   :  { %6473 = vtanh.f32 %v7642_v29 }
 0x5f5   :  { %v6474_v45 = vpop.eup %6473 }
 0x5f6   :  { %v7645_v52 = vmul.f32 %v6474_v45, %v6472_v57  ;;  %v2264_v57 = vld [vmem:[#allocation11 + $0xc0] sm:$0xff] }
 0x5f7   :  { %v2268_v45 = vld [vmem:[#allocation11 + $0xe0] sm:$0xff] }
 0x5f8   :  { %1875 = vmatmul.mubr.f32.vlgmr.msra.gmra.mrb[10].mxu0 %v7645_v52  ;;  %1946 = vmatmul.mubr.f32.vlgmr.msra.gmra.mrb[10].mxu1 %v7645_v52 }
 0x5f9   :  { %5516 = vmatpush1.bf16.msra.mxu0 %v7465_v34  ;;  %5548 = vmatpush1.bf16.msra.mxu1 %v7544_v1 }
 0x5fa   :  { %5518 = vmatprep.subr.bf16.mxu0 %v7469_v47  ;;  %5550 = vmatprep.subr.bf16.mxu1 %v7548_v38 }
 0x5fb   :  { %2121 = vmatprep.mubr.f32.mxu0 %v6967_v0  ;;  %2192 = vmatprep.mubr.f32.mxu1 %v6967_v0 }
 0x5fd   :  { %5520 = vmatpush1.bf16.msra.mxu0 %v7471_v58  ;;  %5552 = vmatpush1.bf16.msra.mxu1 %v7550_v11 }
 0x5fe   :  { %5522 = vmatprep.subr.bf16.mxu0 %v7475_v5  ;;  %5554 = vmatprep.subr.bf16.mxu1 %v7554_v18 }
 0x601   :  { %5524 = vmatpush1.bf16.msra.mxu0 %v7477_v4  ;;  %5556 = vmatpush1.bf16.msra.mxu1 %v7556_v39 }
 0x602   :  { %5526 = vmatprep.subr.bf16.mxu0 %v7481_v10  ;;  %5558 = vmatprep.subr.bf16.mxu1 %v7560_v55 }
 0x605   :  { %5528 = vmatpush1.bf16.msra.mxu0 %v7483_v28  ;;  %5560 = vmatpush1.bf16.msra.mxu1 %v7562_v61 }
 0x606   :  { %5530 = vmatprep.subr.bf16.mxu0 %v7487_v35  ;;  %5562 = vmatprep.subr.bf16.mxu1 %v7566_v9 }
 0x609   :  { %5532 = vmatpush1.bf16.msra.mxu0 %v7489_v22  ;;  %5564 = vmatpush1.bf16.msra.mxu1 %v7568_v30 }
 0x60a   :  { %5534 = vmatprep.subr.bf16.mxu0 %v7493_v32  ;;  %5566 = vmatprep.subr.bf16.mxu1 %v7572_v23 }
 0x60d   :  { %5536 = vmatpush1.bf16.msra.mxu0 %v7495_v49  ;;  %5568 = vmatpush1.bf16.msra.mxu1 %v7574_v43 }
 0x60e   :  { %5538 = vmatprep.subr.bf16.mxu0 %v7498_v63  ;;  %5570 = vmatprep.subr.bf16.mxu1 %v7577_v8 }
 0x611   :  { %5540 = vmatpush1.bf16.msra.mxu0 %v7501_v14  ;;  %5572 = vmatpush1.bf16.msra.mxu1 %v7580_v17 }
 0x612   :  { %5542 = vmatprep.subr.bf16.mxu0 %v7504_v37  ;;  %5574 = vmatprep.subr.bf16.mxu1 %v7583_v26 }
 0x615   :  { %5544 = vmatpush1.bf16.msra.mxu0 %v7507_v46  ;;  %5576 = vmatpush1.bf16.msra.mxu1 %v7586_v48 }
 0x616   :  { %5610 = vmatprep.subr.bf16.mxu1 %v7542_v50 }
 0x6cb   :  { %v1876_v34 = vpop.f32.mrb[10].mxu0  ;;  %v1947_v47 = vpop.f32.mrb[10].mxu1 }
 0x6cc   :  { %v6261_v58 = vadd.f32 %v1876_v34, %v7373_v21  ;;  %v1878_v5 = vpop.f32.mrb[11].mxu0  ;;  %v1949_v4 = vpop.f32.mrb[11].mxu1  ;;  %v6277_v22 = vadd.f32 %v1947_v47, %v7385_v51  ;;  %v5591_v34 = vpack.c.bf16 %v2268_v45, %v2264_v57  ;;  %v2273_v47 = vld [vmem:[#allocation11 + $0x108] sm:$0xff] }
 0x6cd   :  { %v6262_v10 = vadd.f32 %v1878_v5, %v7377_v24  ;;  %v6278_v32 = vadd.f32 %v1949_v4, %v7389_v53  ;;  %v2272_v4 = vld [vmem:[#allocation11 + $0x100] sm:$0xff] }
 0x6ce   :  { %v5019_v28 = vmul.f32 -1.442695, %v6261_v58  ;;  %v5021_v49 = vmul.f32 -1.442695, %v6277_v22  ;;  %v2277_v58 = vld [vmem:[#allocation11 + $0x128] sm:$0xff] }
 0x6cf   :  { %v5020_v35 = vmul.f32 -1.442695, %v6262_v10  ;;  %v5593_v5 = vpack.c.bf16 %v2277_v58, %v2273_v47  ;;  %v2276_v10 = vld [vmem:[#allocation11 + $0x120] sm:$0xff]  ;;  %v2285_v22 = vld [vmem:[#allocation11 + $0x168] sm:$0xff] }
 0x6d0   :  { %6475 = vpow2.f32 %v5019_v28  ;;  %v5595_v28 = vpack.c.bf16 %v2276_v10, %v2272_v4 }
 0x6d1   :  { %6477 = vpow2.f32 %v5020_v35  ;;  %v2281_v35 = vld [vmem:[#allocation11 + $0x148] sm:$0xff] }
 0x6d2   :  { %6479 = vtanh.f32 %v6278_v32  ;;  %v5597_v32 = vpack.c.bf16 %v2285_v22, %v2281_v35  ;;  %v2486_v35 = vld [vmem:[#allocation14] sm:$0xff] }
 0x6d3   :  { %6481 = vpow2.f32 %v5021_v49  ;;  %v2280_v49 = vld [vmem:[#allocation11 + $0x140] sm:$0xff] }
 0x6d4   :  { %v2490_v22 = vld [vmem:[#allocation14 + $0x20] sm:$0xff] }
 0x6da   :  { %v6476_v63 = vpop.eup %6475 }
 0x6db   :  { %v1965_v14 = vadd.f32 1.0, %v6476_v63  ;;  %v6478_v37 = vpop.eup %6477  ;;  %v2284_v63 = vld [vmem:[#allocation11 + $0x160] sm:$0xff] }
 0x6dc   :  { %v1966_v46 = vadd.f32 1.0, %v6478_v37  ;;  %v6480_v50 = vpop.eup %6479  ;;  %v2289_v37 = vld [vmem:[#allocation11 + $0x188] sm:$0xff] }
 0x6dd   :  { %6483 = vrcp.f32 %v1965_v14  ;;  %v6482_v2 = vpop.eup %6481  ;;  %v5599_v14 = vpack.c.bf16 %v2284_v63, %v2280_v49  ;;  %v2492_v49 = vld [vmem:[#allocation14 + $0x30] sm:$0xff]  ;;  %v2495_v63 = vld [vmem:[#allocation14 + $0x48] sm:$0xff] }
 0x6de   :  { %6485 = vrcp.f32 %v1966_v46  ;;  %v1967_v25 = vadd.f32 1.0, %v6482_v2  ;;  %v2293_v46 = vld [vmem:[#allocation11 + $0x1a8] sm:$0xff] }
 0x6df   :  { %v5601_v2 = vpack.c.bf16 %v2293_v46, %v2289_v37  ;;  %v2497_v37 = vld [vmem:[#allocation14 + $0x58] sm:$0xff] }
 0x6e0   :  { %6487 = vrcp.f32 %v1967_v25  ;;  %v2501_v46 = vld [vmem:[#allocation14 + $0x78] sm:$0xff] }
 0x6e7   :  { %v6484_v59 = vpop.eup %6483 }
 0x6e8   :  { %v1976_v33 = vmul.f32 %v6484_v59, %v6480_v50  ;;  %v6486_v40 = vpop.eup %6485  ;;  %v2288_v50 = vld [vmem:[#allocation11 + $0x180] sm:$0xff] }
 0x6e9   :  { %v1975_v62 = vmul.f32 %v6486_v40, %v7642_v29  ;;  %v5589_v29 = vpack.c.bf16 %v2269_v7, %v2265_v56  ;;  %v2292_v59 = vld [vmem:[#allocation11 + $0x1a0] sm:$0xff]  ;;  %v2301_v40 = vld [vmem:[#allocation11 + $0x1e8] sm:$0xff] }
 0x6ea   :  { %v6488_v6 = vpop.eup %6487  ;;  %v5603_v25 = vpack.c.bf16 %v2292_v59, %v2288_v50  ;;  %v5643_v59 = vpack.c.bf16 %v2490_v22, %v2486_v35 }
 0x6eb   :  { %v7687_v3 = vadd.f32 %v1976_v33, %v1975_v62  ;;  %v2297_v33 = vld [vmem:[#allocation11 + $0x1c8] sm:$0xff] }
 0x6ec   :  { %v5605_v62 = vpack.c.bf16 %v2301_v40, %v2297_v33  ;;  %v2494_v40 = vld [vmem:[#allocation14 + $0x40] sm:$0xff] }
 0x6ed   :  { %6489 = vtanh.f32 %v7687_v3 }
 0x6f7   :  { %v6490_v19 = vpop.eup %6489 }
 0x6f8   :  { %v7690_v27 = vmul.f32 %v6490_v19, %v6488_v6  ;;  %v2296_v6 = vld [vmem:[#allocation11 + $0x1c0] sm:$0xff] }
 0x6f9   :  { %v2300_v19 = vld [vmem:[#allocation11 + $0x1e0] sm:$0xff] }
 0x6fa   :  { %2122 = vmatmul.mubr.f32.vlgmr.msra.gmra.mrb[12].mxu0 %v7690_v27  ;;  %2193 = vmatmul.mubr.f32.vlgmr.msra.gmra.mrb[12].mxu1 %v7690_v27 }
 0x6fb   :  { %5612 = vmatpush1.bf16.msra.mxu1 %v7544_v1  ;;  %2368 = vmatprep.mubr.f32.mxu0 %v6967_v0  ;;  %v2241_v1 = vld [vmem:[#allocation11 + $0x8] sm:$0xff] }
 0x6fc   :  { %5614 = vmatprep.subr.bf16.mxu1 %v7548_v38  ;;  %2439 = vmatprep.mubr.f32.mxu1 %v6967_v0  ;;  %v2245_v38 = vld [vmem:[#allocation11 + $0x28] sm:$0xff] }
 0x6ff   :  { %5616 = vmatpush1.bf16.msra.mxu1 %v7550_v11  ;;  %v5577_v11 = vpack.c.bf16 %v2245_v38, %v2241_v1  ;;  %v2487_v1 = vld [vmem:[#allocation14 + $0x8] sm:$0xff] }
 0x700   :  { %5618 = vmatprep.subr.bf16.mxu1 %v7554_v18  ;;  %v2240_v18 = vld [vmem:[#allocation11] sm:$0xff]  ;;  %v2491_v38 = vld [vmem:[#allocation14 + $0x28] sm:$0xff] }
 0x701   :  { %5578 = vmatprep.subr.bf16.mxu0 %v5577_v11  ;;  %v2489_v11 = vld [vmem:[#allocation14 + $0x18] sm:$0xff] }
 0x703   :  { %5620 = vmatpush1.bf16.msra.mxu1 %v7556_v39  ;;  %v2244_v39 = vld [vmem:[#allocation11 + $0x20] sm:$0xff] }
 0x704   :  { %5622 = vmatprep.subr.bf16.mxu1 %v7560_v55  ;;  %v5579_v55 = vpack.c.bf16 %v2244_v39, %v2240_v18  ;;  %v2493_v18 = vld [vmem:[#allocation14 + $0x38] sm:$0xff] }
 0x705   :  { %v5673_v39 = vpack.c.bf16 %v2493_v18, %v2489_v11  ;;  %v2507_v11 = vld [vmem:[#allocation14 + $0xa8] sm:$0xff]  ;;  %v2505_v18 = vld [vmem:[#allocation14 + $0x98] sm:$0xff] }
 0x706   :  { %5580 = vmatpush1.bf16.msra.mxu0 %v5579_v55  ;;  %v5607_v55 = vpack.c.bf16 %v2300_v19, %v2296_v6  ;;  %v5677_v6 = vpack.c.bf16 %v2501_v46, %v2497_v37  ;;  %v2496_v19 = vld [vmem:[#allocation14 + $0x50] sm:$0xff] }
 0x707   :  { %5624 = vmatpush1.bf16.msra.mxu1 %v7562_v61  ;;  %v2249_v61 = vld [vmem:[#allocation11 + $0x48] sm:$0xff]  ;;  %v2520_v37 = vld [vmem:[#allocation14 + $0x110] sm:$0xff] }
 0x708   :  { %5626 = vmatprep.subr.bf16.mxu1 %v7566_v9  ;;  %v2253_v9 = vld [vmem:[#allocation11 + $0x68] sm:$0xff]  ;;  %v2524_v46 = vld [vmem:[#allocation14 + $0x130] sm:$0xff] }
 0x70b   :  { %5628 = vmatpush1.bf16.msra.mxu1 %v7568_v30  ;;  %v5581_v30 = vpack.c.bf16 %v2253_v9, %v2249_v61  ;;  %v5641_v61 = vpack.c.bf16 %v2491_v38, %v2487_v1  ;;  %v2500_v1 = vld [vmem:[#allocation14 + $0x70] sm:$0xff]  ;;  %v2503_v38 = vld [vmem:[#allocation14 + $0x88] sm:$0xff] }
 0x70c   :  { %5630 = vmatprep.subr.bf16.mxu1 %v7572_v23  ;;  %v2248_v23 = vld [vmem:[#allocation11 + $0x40] sm:$0xff] }
 0x70d   :  { %5582 = vmatprep.subr.bf16.mxu0 %v5581_v30 }
 0x70f   :  { %5632 = vmatpush1.bf16.msra.mxu1 %v7574_v43  ;;  %v2252_v43 = vld [vmem:[#allocation11 + $0x60] sm:$0xff] }
 0x710   :  { %5634 = vmatprep.subr.bf16.mxu1 %v7577_v8  ;;  %v5583_v8 = vpack.c.bf16 %v2252_v43, %v2248_v23 }
 0x712   :  { %5584 = vmatpush1.bf16.msra.mxu0 %v5583_v8 }
 0x713   :  { %5636 = vmatpush1.bf16.msra.mxu1 %v7580_v17  ;;  %v2257_v17 = vld [vmem:[#allocation11 + $0x88] sm:$0xff] }
 0x714   :  { %5638 = vmatprep.subr.bf16.mxu1 %v7583_v26  ;;  %v2261_v26 = vld [vmem:[#allocation11 + $0xa8] sm:$0xff] }
 0x715   :  { %v5585_v31 = vpack.c.bf16 %v2261_v26, %v2257_v17 }
 0x717   :  { %5640 = vmatpush1.bf16.msra.mxu1 %v7586_v48  ;;  %v2256_v48 = vld [vmem:[#allocation11 + $0x80] sm:$0xff]  ;;  %5586 = vmatprep.subr.bf16.mxu0 %v5585_v31 }
 0x718   :  { %v5587_v54 = vpack.c.bf16 %v2260_v16, %v2256_v48  ;;  %5674 = vmatprep.subr.bf16.mxu1 %v5673_v39  ;;  %v2509_v39 = vld [vmem:[#allocation14 + $0xb8] sm:$0xff] }
 0x71a   :  { %5588 = vmatpush1.bf16.msra.mxu0 %v5587_v54 }
 0x71b   :  { %5590 = vmatprep.subr.bf16.mxu0 %v5589_v29 }
 0x71e   :  { %5592 = vmatpush1.bf16.msra.mxu0 %v5591_v34 }
 0x71f   :  { %5594 = vmatprep.subr.bf16.mxu0 %v5593_v5 }
 0x722   :  { %5596 = vmatpush1.bf16.msra.mxu0 %v5595_v28 }
 0x723   :  { %5598 = vmatprep.subr.bf16.mxu0 %v5597_v32  ;;  %v2488_v32 = vld [vmem:[#allocation14 + $0x10] sm:$0xff] }
 0x724   :  { %v5675_v33 = vpack.c.bf16 %v2492_v49, %v2488_v32  ;;  %v2518_v32 = vld [vmem:[#allocation14 + $0x100] sm:$0xff] }
 0x725   :  { %v2522_v49 = vld [vmem:[#allocation14 + $0x120] sm:$0xff] }
 0x726   :  { %5600 = vmatpush1.bf16.msra.mxu0 %v5599_v14  ;;  %v2499_v14 = vld [vmem:[#allocation14 + $0x68] sm:$0xff] }
 0x727   :  { %5602 = vmatprep.subr.bf16.mxu0 %v5601_v2 }
 0x72a   :  { %5604 = vmatpush1.bf16.msra.mxu0 %v5603_v25  ;;  %v2498_v25 = vld [vmem:[#allocation14 + $0x60] sm:$0xff] }
 0x72b   :  { %5606 = vmatprep.subr.bf16.mxu0 %v5605_v62  ;;  %v5645_v62 = vpack.c.bf16 %v2499_v14, %v2495_v63 }
 0x72e   :  { %5608 = vmatpush1.bf16.msra.mxu0 %v5607_v55  ;;  %v5647_v55 = vpack.c.bf16 %v2498_v25, %v2494_v40  ;;  %v5659_v40 = vpack.c.bf16 %v2522_v49, %v2518_v32  ;;  %v5691_v25 = vpack.c.bf16 %v2524_v46, %v2520_v37  ;;  %v2840_v49 = vld [vmem:[#allocation15 + $0x10] sm:$0xff]  ;;  %v2851_v37 = vld [vmem:[#allocation15 + $0x68] sm:$0xff]  ;;  %v2849_v46 = vld [vmem:[#allocation15 + $0x58] sm:$0xff] }
 0x72f   :  { %5642 = vmatprep.subr.bf16.mxu0 %v5641_v61  ;;  %v5679_v61 = vpack.c.bf16 %v2500_v1, %v2496_v19 }
 0x7cd   :  { %v2123_v9 = vpop.f32.mrb[12].mxu0  ;;  %v2194_v30 = vpop.f32.mrb[12].mxu1 }
 0x7ce   :  { %v6263_v23 = vadd.f32 %v2123_v9, %v7373_v21  ;;  %v2125_v43 = vpop.f32.mrb[13].mxu0  ;;  %v2196_v8 = vpop.f32.mrb[13].mxu1  ;;  %v6279_v48 = vadd.f32 %v2194_v30, %v7385_v51  ;;  %v2502_v9 = vld [vmem:[#allocation14 + $0x80] sm:$0xff] }
 0x7cf   :  { %v6264_v17 = vadd.f32 %v2125_v43, %v7377_v24  ;;  %v6280_v16 = vadd.f32 %v2196_v8, %v7389_v53  ;;  %v2506_v30 = vld [vmem:[#allocation14 + $0xa0] sm:$0xff]  ;;  %v5681_v43 = vpack.c.bf16 %v2509_v39, %v2505_v18  ;;  %v2504_v8 = vld [vmem:[#allocation14 + $0x90] sm:$0xff]  ;;  %v2535_v18 = vld [vmem:[#allocation14 + $0x188] sm:$0xff] }
 0x7d0   :  { %v5022_v26 = vmul.f32 -1.442695, %v6263_v23  ;;  %v5024_v54 = vmul.f32 -1.442695, %v6279_v48  ;;  %v5649_v23 = vpack.c.bf16 %v2507_v11, %v2503_v38  ;;  %v2513_v48 = vld [vmem:[#allocation14 + $0xd8] sm:$0xff]  ;;  %v2528_v38 = vld [vmem:[#allocation14 + $0x150] sm:$0xff] }
 0x7d1   :  { %v5023_v31 = vmul.f32 -1.442695, %v6264_v17  ;;  %v2508_v17 = vld [vmem:[#allocation14 + $0xb0] sm:$0xff]  ;;  %v2539_v39 = vld [vmem:[#allocation14 + $0x1a8] sm:$0xff] }
 0x7d2   :  { %6491 = vpow2.f32 %v5022_v26  ;;  %v2511_v26 = vld [vmem:[#allocation14 + $0xc8] sm:$0xff]  ;;  %v2532_v11 = vld [vmem:[#allocation14 + $0x170] sm:$0xff] }
 0x7d3   :  { %6493 = vpow2.f32 %v5023_v31  ;;  %v2515_v31 = vld [vmem:[#allocation14 + $0xe8] sm:$0xff] }
 0x7d4   :  { %6495 = vtanh.f32 %v6280_v16  ;;  %v2517_v16 = vld [vmem:[#allocation14 + $0xf8] sm:$0xff] }
 0x7d5   :  { %6497 = vpow2.f32 %v5024_v54  ;;  %v5651_v54 = vpack.c.bf16 %v2506_v30, %v2502_v9  ;;  %v5695_v30 = vpack.c.bf16 %v2532_v11, %v2528_v38  ;;  %v2859_v38 = vld [vmem:[#allocation15 + $0xa8] sm:$0xff]  ;;  %v2857_v11 = vld [vmem:[#allocation15 + $0x98] sm:$0xff] }
 0x7dc   :  { %v6492_v56 = vpop.eup %6491 }
 0x7dd   :  { %v2212_v7 = vadd.f32 1.0, %v6492_v56  ;;  %v6494_v29 = vpop.eup %6493  ;;  %v5683_v56 = vpack.c.bf16 %v2508_v17, %v2504_v8  ;;  %v5665_v8 = vpack.c.bf16 %v2539_v39, %v2535_v18  ;;  %v2854_v39 = vld [vmem:[#allocation15 + $0x80] sm:$0xff] }
 0x7de   :  { %v2213_v57 = vadd.f32 1.0, %v6494_v29  ;;  %v6496_v45 = vpop.eup %6495  ;;  %v2514_v29 = vld [vmem:[#allocation14 + $0xe0] sm:$0xff] }
 0x7df   :  { %6499 = vrcp.f32 %v2212_v7  ;;  %v6498_v34 = vpop.eup %6497  ;;  %v2510_v7 = vld [vmem:[#allocation14 + $0xc0] sm:$0xff] }
 0x7e0   :  { %6501 = vrcp.f32 %v2213_v57  ;;  %v2214_v4 = vadd.f32 1.0, %v6498_v34  ;;  %v5653_v57 = vpack.c.bf16 %v2515_v31, %v2511_v26  ;;  %v2512_v34 = vld [vmem:[#allocation14 + $0xd0] sm:$0xff]  ;;  %v5655_v35 = vpack.c.bf16 %v2514_v29, %v2510_v7 }
 0x7e1   :  { %v2536_v26 = vld [vmem:[#allocation14 + $0x190] sm:$0xff] }
 0x7e2   :  { %6503 = vrcp.f32 %v2214_v4  ;;  %v2521_v4 = vld [vmem:[#allocation14 + $0x118] sm:$0xff]  ;;  %v2540_v31 = vld [vmem:[#allocation14 + $0x1b0] sm:$0xff] }
 0x7e3   :  { %v5699_v29 = vpack.c.bf16 %v2540_v31, %v2536_v26  ;;  %v2867_v26 = vld [vmem:[#allocation15 + $0xe8] sm:$0xff]  ;;  %v2865_v31 = vld [vmem:[#allocation15 + $0xd8] sm:$0xff] }
 0x7e9   :  { %v6500_v47 = vpop.eup %6499 }
 0x7ea   :  { %v2223_v58 = vmul.f32 %v6500_v47, %v6496_v45  ;;  %v6502_v5 = vpop.eup %6501  ;;  %v5685_v45 = vpack.c.bf16 %v2517_v16, %v2513_v48  ;;  %v2516_v47 = vld [vmem:[#allocation14 + $0xf0] sm:$0xff]  ;;  %v2543_v48 = vld [vmem:[#allocation14 + $0x1c8] sm:$0xff] }
 0x7eb   :  { %v2222_v10 = vmul.f32 %v6502_v5, %v7687_v3  ;;  %v2523_v5 = vld [vmem:[#allocation14 + $0x128] sm:$0xff]  ;;  %v5687_v22 = vpack.c.bf16 %v2516_v47, %v2512_v34  ;;  %v2546_v47 = vld [vmem:[#allocation14 + $0x1e0] sm:$0xff] }
 0x7ec   :  { %v6504_v50 = vpop.eup %6503  ;;  %v2547_v16 = vld [vmem:[#allocation14 + $0x1e8] sm:$0xff] }
 0x7ed   :  { %v7716_v28 = vadd.f32 %v2223_v58, %v2222_v10  ;;  %v2519_v58 = vld [vmem:[#allocation14 + $0x108] sm:$0xff]  ;;  %v2525_v10 = vld [vmem:[#allocation14 + $0x138] sm:$0xff] }
 0x7ee   :  { %v5657_v63 = vpack.c.bf16 %v2523_v5, %v2519_v58  ;;  %v5689_v14 = vpack.c.bf16 %v2525_v10, %v2521_v4  ;;  %v2544_v58 = vld [vmem:[#allocation14 + $0x1d0] sm:$0xff] }
 0x7ef   :  { %6505 = vtanh.f32 %v7716_v28  ;;  %v2548_v5 = vld [vmem:[#allocation14 + $0x1f0] sm:$0xff] }
 0x7f0   :  { %v5703_v10 = vpack.c.bf16 %v2548_v5, %v2544_v58  ;;  %v2875_v58 = vld [vmem:[#allocation15 + $0x128] sm:$0xff]  ;;  %v2873_v5 = vld [vmem:[#allocation15 + $0x118] sm:$0xff] }
 0x7f9   :  { %v6506_v2 = vpop.eup %6505 }
 0x7fa   :  { %v7719_v3 = vmul.f32 %v6506_v2, %v6504_v50  ;;  %v2527_v50 = vld [vmem:[#allocation14 + $0x148] sm:$0xff] }
 0x7fb   :  { %v2531_v2 = vld [vmem:[#allocation14 + $0x168] sm:$0xff] }
 0x7fc   :  { %2369 = vmatmul.mubr.f32.vlgmr.msra.gmra.mrb[14].mxu0 %v7719_v3  ;;  %2440 = vmatmul.mubr.f32.vlgmr.msra.gmra.mrb[14].mxu1 %v7719_v3  ;;  %v5661_v19 = vpack.c.bf16 %v2531_v2, %v2527_v50  ;;  %v2846_v2 = vld [vmem:[#allocation15 + $0x40] sm:$0xff] }
 0x7fd   :  { %5644 = vmatpush1.bf16.msra.mxu0 %v5643_v59  ;;  %5676 = vmatpush1.bf16.msra.mxu1 %v5675_v33  ;;  %v2529_v59 = vld [vmem:[#allocation14 + $0x158] sm:$0xff] }
 0x7fe   :  { %5646 = vmatprep.subr.bf16.mxu0 %v5645_v62  ;;  %5678 = vmatprep.subr.bf16.mxu1 %v5677_v6  ;;  %v2533_v33 = vld [vmem:[#allocation14 + $0x178] sm:$0xff]  ;;  %v2526_v62 = vld [vmem:[#allocation14 + $0x140] sm:$0xff] }
 0x7ff   :  { %2636 = vmatprep.mubr.f32.mxu0 %v6967_v0  ;;  %2749 = vmatprep.mubr.f32.mxu1 %v6967_v0  ;;  %v2530_v6 = vld [vmem:[#allocation14 + $0x160] sm:$0xff]  ;;  %v5693_v1 = vpack.c.bf16 %v2533_v33, %v2529_v59  ;;  %v2853_v33 = vld [vmem:[#allocation15 + $0x78] sm:$0xff] }
 0x800   :  { %v5663_v9 = vpack.c.bf16 %v2530_v6, %v2526_v62  ;;  %v2850_v59 = vld [vmem:[#allocation15 + $0x60] sm:$0xff]  ;;  %v2848_v62 = vld [vmem:[#allocation15 + $0x50] sm:$0xff] }
 0x801   :  { %5648 = vmatpush1.bf16.msra.mxu0 %v5647_v55  ;;  %5680 = vmatpush1.bf16.msra.mxu1 %v5679_v61  ;;  %v2537_v55 = vld [vmem:[#allocation14 + $0x198] sm:$0xff]  ;;  %v2852_v6 = vld [vmem:[#allocation15 + $0x70] sm:$0xff] }
 0x802   :  { %5650 = vmatprep.subr.bf16.mxu0 %v5649_v23  ;;  %5682 = vmatprep.subr.bf16.mxu1 %v5681_v43  ;;  %v2541_v61 = vld [vmem:[#allocation14 + $0x1b8] sm:$0xff]  ;;  %v2534_v23 = vld [vmem:[#allocation14 + $0x180] sm:$0xff] }
 0x803   :  { %v2538_v43 = vld [vmem:[#allocation14 + $0x1a0] sm:$0xff]  ;;  %v5697_v17 = vpack.c.bf16 %v2541_v61, %v2537_v55  ;;  %v2861_v61 = vld [vmem:[#allocation15 + $0xb8] sm:$0xff] }
 0x804   :  { %v5667_v7 = vpack.c.bf16 %v2538_v43, %v2534_v23  ;;  %v2858_v55 = vld [vmem:[#allocation15 + $0xa0] sm:$0xff]  ;;  %v2856_v23 = vld [vmem:[#allocation15 + $0x90] sm:$0xff] }
 0x805   :  { %5652 = vmatpush1.bf16.msra.mxu0 %v5651_v54  ;;  %5684 = vmatpush1.bf16.msra.mxu1 %v5683_v56  ;;  %v2545_v54 = vld [vmem:[#allocation14 + $0x1d8] sm:$0xff]  ;;  %v2860_v43 = vld [vmem:[#allocation15 + $0xb0] sm:$0xff] }
 0x806   :  { %5654 = vmatprep.subr.bf16.mxu0 %v5653_v57  ;;  %5686 = vmatprep.subr.bf16.mxu1 %v5685_v45  ;;  %v2549_v56 = vld [vmem:[#allocation14 + $0x1f8] sm:$0xff]  ;;  %v2542_v57 = vld [vmem:[#allocation14 + $0x1c0] sm:$0xff]  ;;  %v5669_v45 = vpack.c.bf16 %v2547_v16, %v2543_v48 }
 0x807   :  { %v5701_v34 = vpack.c.bf16 %v2549_v56, %v2545_v54  ;;  %v5671_v4 = vpack.c.bf16 %v2546_v47, %v2542_v57  ;;  %v2862_v16 = vld [vmem:[#allocation15 + $0xc0] sm:$0xff]  ;;  %v2869_v56 = vld [vmem:[#allocation15 + $0xf8] sm:$0xff]  ;;  %v2864_v57 = vld [vmem:[#allocation15 + $0xd0] sm:$0xff] }
 0x808   :  { %v2866_v54 = vld [vmem:[#allocation15 + $0xe0] sm:$0xff]  ;;  %v2871_v47 = vld [vmem:[#allocation15 + $0x108] sm:$0xff] }
 0x809   :  { %5656 = vmatpush1.bf16.msra.mxu0 %v5655_v35  ;;  %5688 = vmatpush1.bf16.msra.mxu1 %v5687_v22  ;;  %v2842_v35 = vld [vmem:[#allocation15 + $0x20] sm:$0xff] }
 0x80a   :  { %5658 = vmatprep.subr.bf16.mxu0 %v5657_v63  ;;  %5690 = vmatprep.subr.bf16.mxu1 %v5689_v14  ;;  %v2844_v63 = vld [vmem:[#allocation15 + $0x30] sm:$0xff]  ;;  %v2847_v14 = vld [vmem:[#allocation15 + $0x48] sm:$0xff] }
 0x80b   :  { %v7765_v50 = vpack.c.bf16 %v2851_v37, %v2847_v14  ;;  %v2883_v14 = vld [vmem:[#allocation15 + $0x168] sm:$0xff]  ;;  %v2878_v37 = vld [vmem:[#allocation15 + $0x140] sm:$0xff] }
 0x80d   :  { %5660 = vmatpush1.bf16.msra.mxu0 %v5659_v40  ;;  %5692 = vmatpush1.bf16.msra.mxu1 %v5691_v25  ;;  %v7767_v40 = vpack.c.bf16 %v2850_v59, %v2846_v2  ;;  %v7769_v25 = vpack.c.bf16 %v2853_v33, %v2849_v46  ;;  %v2882_v46 = vld [vmem:[#allocation15 + $0x160] sm:$0xff]  ;;  %v2881_v33 = vld [vmem:[#allocation15 + $0x158] sm:$0xff] }
 0x80e   :  { %5662 = vmatprep.subr.bf16.mxu0 %v5661_v19  ;;  %5694 = vmatprep.subr.bf16.mxu1 %v5693_v1  ;;  %v7772_v19 = vpack.c.bf16 %v2852_v6, %v2848_v62  ;;  %v2855_v1 = vld [vmem:[#allocation15 + $0x88] sm:$0xff]  ;;  %v7814_v59 = vpack.c.bf16 %v2882_v46, %v2878_v37  ;;  %v2885_v62 = vld [vmem:[#allocation15 + $0x178] sm:$0xff]  ;;  %v2880_v6 = vld [vmem:[#allocation15 + $0x150] sm:$0xff] }
 0x80f   :  { %v7777_v18 = vpack.c.bf16 %v2859_v38, %v2855_v1  ;;  %v7817_v1 = vpack.c.bf16 %v2885_v62, %v2881_v33  ;;  %v2884_v38 = vld [vmem:[#allocation15 + $0x170] sm:$0xff] }
 0x811   :  { %5664 = vmatpush1.bf16.msra.mxu0 %v5663_v9  ;;  %5696 = vmatpush1.bf16.msra.mxu1 %v5695_v30  ;;  %v7779_v9 = vpack.c.bf16 %v2858_v55, %v2854_v39  ;;  %v7781_v30 = vpack.c.bf16 %v2861_v61, %v2857_v11  ;;  %v2887_v11 = vld [vmem:[#allocation15 + $0x188] sm:$0xff]  ;;  %v7820_v55 = vpack.c.bf16 %v2884_v38, %v2880_v6 }
 0x812   :  { %5666 = vmatprep.subr.bf16.mxu0 %v5665_v8  ;;  %5698 = vmatprep.subr.bf16.mxu1 %v5697_v17  ;;  %v7784_v8 = vpack.c.bf16 %v2860_v43, %v2856_v23  ;;  %v2863_v17 = vld [vmem:[#allocation15 + $0xc8] sm:$0xff]  ;;  %v2886_v23 = vld [vmem:[#allocation15 + $0x180] sm:$0xff] }
 0x813   :  { %v7789_v48 = vpack.c.bf16 %v2867_v26, %v2863_v17  ;;  %v2891_v39 = vld [vmem:[#allocation15 + $0x1a8] sm:$0xff]  ;;  %v2890_v43 = vld [vmem:[#allocation15 + $0x1a0] sm:$0xff]  ;;  %v2889_v17 = vld [vmem:[#allocation15 + $0x198] sm:$0xff] }
 0x814   :  { %v7822_v61 = vpack.c.bf16 %v2891_v39, %v2887_v11  ;;  %v2893_v26 = vld [vmem:[#allocation15 + $0x1b8] sm:$0xff] }
 0x815   :  { %5668 = vmatpush1.bf16.msra.mxu0 %v5667_v7  ;;  %5700 = vmatpush1.bf16.msra.mxu1 %v5699_v29  ;;  %v7791_v7 = vpack.c.bf16 %v2866_v54, %v2862_v16  ;;  %v7793_v29 = vpack.c.bf16 %v2869_v56, %v2865_v31  ;;  %v2888_v31 = vld [vmem:[#allocation15 + $0x190] sm:$0xff]  ;;  %v7826_v54 = vpack.c.bf16 %v2890_v43, %v2886_v23 }
 0x816   :  { %5670 = vmatprep.subr.bf16.mxu0 %v5669_v45  ;;  %5702 = vmatprep.subr.bf16.mxu1 %v5701_v34  ;;  %v2868_v45 = vld [vmem:[#allocation15 + $0xf0] sm:$0xff]  ;;  %v7828_v56 = vpack.c.bf16 %v2893_v26, %v2889_v17 }
 0x817   :  { %v7796_v34 = vpack.c.bf16 %v2868_v45, %v2864_v57  ;;  %v2892_v16 = vld [vmem:[#allocation15 + $0x1b0] sm:$0xff]  ;;  %v2895_v57 = vld [vmem:[#allocation15 + $0x1c8] sm:$0xff] }
 0x818   :  { %v2899_v45 = vld [vmem:[#allocation15 + $0x1e8] sm:$0xff] }
 0x819   :  { %5672 = vmatpush1.bf16.msra.mxu0 %v5671_v4  ;;  %5704 = vmatpush1.bf16.msra.mxu1 %v5703_v10  ;;  %v7801_v4 = vpack.c.bf16 %v2875_v58, %v2871_v47  ;;  %v2870_v10 = vld [vmem:[#allocation15 + $0x100] sm:$0xff]  ;;  %v7832_v47 = vpack.c.bf16 %v2892_v16, %v2888_v31  ;;  %v7834_v58 = vpack.c.bf16 %v2899_v45, %v2895_v57 }
 0x81c   :  { %2637 = vmatmul.mubr.f32.vlgmr.msra.gmra.mrb[16].mxu0 %v7397_v36  ;;  %2750 = vmatmul.mubr.f32.vlgmr.msra.gmra.mrb[18].mxu1 %v7397_v36  ;;  %v2839_v36 = vld [vmem:[#allocation15 + $0x8] sm:$0xff] }
 0x81d   :  { %2642 = vmatprep.mubr.f32.mxu0 %v6967_v0  ;;  %2755 = vmatprep.mubr.f32.mxu1 %v6967_v0 }
 0x820   :  { %2643 = vmatmul.mubr.f32.gmra.mrb[18].mxu0 %v7442_v60  ;;  %2756 = vmatmul.mubr.f32.gmra.mrb[20].mxu1 %v7442_v60  ;;  %v2843_v60 = vld [vmem:[#allocation15 + $0x28] sm:$0xff] }
 0x821   :  { %2648 = vmatprep.mubr.f32.mxu0 %v6967_v0  ;;  %2761 = vmatprep.mubr.f32.mxu1 %v6967_v0 }
 0x824   :  { %2649 = vmatmul.mubr.f32.gmra.mrb[20].mxu0 %v7520_v42  ;;  %2762 = vmatmul.mubr.f32.gmra.mrb[22].mxu1 %v7520_v42  ;;  %v2841_v42 = vld [vmem:[#allocation15 + $0x18] sm:$0xff] }
 0x825   :  { %2654 = vmatprep.mubr.f32.mxu0 %v6967_v0  ;;  %2767 = vmatprep.mubr.f32.mxu1 %v6967_v0 }
 0x828   :  { %2655 = vmatmul.mubr.f32.gmra.mrb[22].mxu0 %v7599_v15  ;;  %2768 = vmatmul.mubr.f32.gmra.mrb[24].mxu1 %v7599_v15  ;;  %v7753_v15 = vpack.c.bf16 %v2843_v60, %v2839_v36  ;;  %v2874_v36 = vld [vmem:[#allocation15 + $0x120] sm:$0xff]  ;;  %v2877_v60 = vld [vmem:[#allocation15 + $0x138] sm:$0xff] }
 0x829   :  { %2660 = vmatprep.mubr.f32.mxu0 %v6967_v0  ;;  %2773 = vmatprep.mubr.f32.mxu1 %v6967_v0 }
 0x82a   :  { %5706 = vmatprep.subr.bf16.mxu0 %v7753_v15 }
 0x82c   :  { %2661 = vmatmul.mubr.f32.gmra.mrb[24].mxu0 %v7645_v52  ;;  %2774 = vmatmul.mubr.f32.gmra.mrb[26].mxu1 %v7645_v52  ;;  %v2838_v52 = vld [vmem:[#allocation15] sm:$0xff] }
 0x82d   :  { %2666 = vmatprep.mubr.f32.mxu0 %v6967_v0  ;;  %2779 = vmatprep.mubr.f32.mxu1 %v6967_v0  ;;  %v7755_v22 = vpack.c.bf16 %v2842_v35, %v2838_v52  ;;  %v7805_v52 = vpack.c.bf16 %v2877_v60, %v2873_v5  ;;  %v2872_v35 = vld [vmem:[#allocation15 + $0x110] sm:$0xff]  ;;  %v2897_v5 = vld [vmem:[#allocation15 + $0x1d8] sm:$0xff]  ;;  %v2898_v60 = vld [vmem:[#allocation15 + $0x1e0] sm:$0xff] }
 0x82f   :  { %5708 = vmatpush1.bf16.msra.mxu0 %v7755_v22 }
 0x830   :  { %2667 = vmatmul.mubr.f32.gmra.mrb[26].mxu0 %v7690_v27  ;;  %2780 = vmatmul.mubr.f32.gmra.mrb[28].mxu1 %v7690_v27  ;;  %v2845_v27 = vld [vmem:[#allocation15 + $0x38] sm:$0xff] }
 0x831   :  { %2672 = vmatprep.mubr.f32.mxu0 %v6967_v0  ;;  %2785 = vmatprep.mubr.f32.mxu1 %v6967_v0  ;;  %v7757_v32 = vpack.c.bf16 %v2845_v27, %v2841_v42  ;;  %v7803_v42 = vpack.c.bf16 %v2874_v36, %v2870_v10  ;;  %v2876_v27 = vld [vmem:[#allocation15 + $0x130] sm:$0xff]  ;;  %v2901_v10 = vld [vmem:[#allocation15 + $0x1f8] sm:$0xff]  ;;  %v2894_v36 = vld [vmem:[#allocation15 + $0x1c0] sm:$0xff] }
 0x832   :  { %5710 = vmatprep.subr.bf16.mxu0 %v7765_v50 }
 0x833   :  { %5738 = vmatprep.subr.bf16.mxu1 %v7757_v32  ;;  %5712 = vmatpush1.bf16.msra.mxu0 %v7767_v40 }
 0x834   :  { %2673 = vmatmul.mubr.f32.gmra.mrb[28].mxu0 %v7719_v3  ;;  %2786 = vmatmul.mubr.f32.gmra.mrb[30].mxu1 %v7719_v3  ;;  %v7760_v3 = vpack.c.bf16 %v2844_v63, %v2840_v49  ;;  %v2879_v49 = vld [vmem:[#allocation15 + $0x148] sm:$0xff]  ;;  %v7808_v63 = vpack.c.bf16 %v2876_v27, %v2872_v35  ;;  %v7840_v35 = vpack.c.bf16 %v2901_v10, %v2897_v5  ;;  %v2896_v27 = vld [vmem:[#allocation15 + $0x1d0] sm:$0xff] }
 0x835   :  { %2678 = vmatprep.mubr.f32.mxu0 %v6967_v0  ;;  %2791 = vmatprep.mubr.f32.mxu1 %v6967_v0  ;;  %v7812_v2 = vpack.c.bf16 %v2883_v14, %v2879_v49  ;;  %v7842_v49 = vpack.c.bf16 %v2898_v60, %v2894_v36  ;;  %v2900_v14 = vld [vmem:[#allocation15 + $0x1f0] sm:$0xff] }
 0x836   :  { %5740 = vmatpush1.bf16.msra.mxu1 %v7760_v3  ;;  %5714 = vmatprep.subr.bf16.mxu0 %v7777_v18  ;;  %v7845_v37 = vpack.c.bf16 %v2900_v14, %v2896_v27 }
 0x837   :  { %5742 = vmatprep.subr.bf16.mxu1 %v7769_v25  ;;  %5716 = vmatpush1.bf16.msra.mxu0 %v7779_v9 }
 0x838   :  { %5718 = vmatprep.subr.bf16.mxu0 %v7789_v48 }
 0x83a   :  { %5744 = vmatpush1.bf16.msra.mxu1 %v7772_v19 }
 0x83b   :  { %5746 = vmatprep.subr.bf16.mxu1 %v7781_v30  ;;  %5720 = vmatpush1.bf16.msra.mxu0 %v7791_v7 }
 0x83c   :  { %5722 = vmatprep.subr.bf16.mxu0 %v7801_v4 }
 0x83e   :  { %5748 = vmatpush1.bf16.msra.mxu1 %v7784_v8 }
 0x83f   :  { %5750 = vmatprep.subr.bf16.mxu1 %v7793_v29  ;;  %5724 = vmatpush1.bf16.msra.mxu0 %v7803_v42 }
 0x840   :  { %5726 = vmatprep.subr.bf16.mxu0 %v7812_v2 }
 0x842   :  { %5752 = vmatpush1.bf16.msra.mxu1 %v7796_v34 }
 0x843   :  { %5754 = vmatprep.subr.bf16.mxu1 %v7805_v52  ;;  %5728 = vmatpush1.bf16.msra.mxu0 %v7814_v59 }
 0x844   :  { %5730 = vmatprep.subr.bf16.mxu0 %v7822_v61 }
 0x846   :  { %5756 = vmatpush1.bf16.msra.mxu1 %v7808_v63 }
 0x847   :  { %5758 = vmatprep.subr.bf16.mxu1 %v7817_v1  ;;  %5732 = vmatpush1.bf16.msra.mxu0 %v7826_v54 }
 0x848   :  { %5734 = vmatprep.subr.bf16.mxu0 %v7834_v58 }
 0x84a   :  { %5760 = vmatpush1.bf16.msra.mxu1 %v7820_v55 }
 0x84b   :  { %5762 = vmatprep.subr.bf16.mxu1 %v7828_v56  ;;  %5736 = vmatpush1.bf16.msra.mxu0 %v7842_v49 }
 0x84c   :  { %5770 = vmatprep.subr.bf16.mxu0 %v7753_v15 }
 0x84e   :  { %5764 = vmatpush1.bf16.msra.mxu1 %v7832_v47 }
 0x84f   :  { %5766 = vmatprep.subr.bf16.mxu1 %v7840_v35 }
 0x852   :  { %5768 = vmatpush1.bf16.msra.mxu1 %v7845_v37 }
 0x853   :  { %5802 = vmatprep.subr.bf16.mxu1 %v7757_v32 }
 0x8cf   :  { %v2370_v46 = vpop.f32.mrb[14].mxu0  ;;  %v2441_v33 = vpop.f32.mrb[14].mxu1 }
 0x8d0   :  { %v6265_v62 = vadd.f32 %v2370_v46, %v7373_v21  ;;  %v2372_v6 = vpop.f32.mrb[15].mxu0  ;;  %v2443_v38 = vpop.f32.mrb[15].mxu1  ;;  %v6281_v43 = vadd.f32 %v2441_v33, %v7385_v51  ;;  %v7858_v33 = vld [vmem:[#allocation18 + $0x8] sm:$0xff] }
 0x8d1   :  { %v6266_v11 = vadd.f32 %v2372_v6, %v7377_v24  ;;  %v6282_v17 = vadd.f32 %v2443_v38, %v7389_v53 }
 0x8d2   :  { %v5025_v39 = vmul.f32 -1.442695, %v6265_v62  ;;  %v5027_v26 = vmul.f32 -1.442695, %v6281_v43 }
 0x8d3   :  { %v5026_v23 = vmul.f32 -1.442695, %v6266_v11 }
 0x8d4   :  { %6507 = vpow2.f32 %v5025_v39 }
 0x8d5   :  { %6509 = vpow2.f32 %v5026_v23 }
 0x8d6   :  { %6511 = vtanh.f32 %v6282_v17 }
 0x8d7   :  { %6513 = vpow2.f32 %v5027_v26 }
 0x8de   :  { %v6508_v31 = vpop.eup %6507 }
 0x8df   :  { %v2459_v16 = vadd.f32 1.0, %v6508_v31  ;;  %v6510_v57 = vpop.eup %6509 }
 0x8e0   :  { %v2460_v21 = vadd.f32 1.0, %v6510_v57  ;;  %v6512_v45 = vpop.eup %6511 }
 0x8e1   :  { %6515 = vrcp.f32 %v2459_v16  ;;  %v6514_v5 = vpop.eup %6513 }
 0x8e2   :  { %6517 = vrcp.f32 %v2460_v21  ;;  %v2461_v60 = vadd.f32 1.0, %v6514_v5 }
 0x8e4   :  { %6519 = vrcp.f32 %v2461_v60 }
 0x8eb   :  { %v6516_v24 = vpop.eup %6515 }
 0x8ec   :  { %v2470_v10 = vmul.f32 %v6516_v24, %v6512_v45  ;;  %v6518_v36 = vpop.eup %6517 }
 0x8ed   :  { %v2469_v27 = vmul.f32 %v6518_v36, %v7716_v28  ;;  %v2550_v28 = vld [vmem:[#allocation17] sm:$0xf] }
 0x8ee   :  { %v6520_v53 = vpop.eup %6519  ;;  %v7898_v62 = vrot.slane %v2550_v28, %v202_v13  ;;  %v7902_v6 = vrot.slane %v2550_v28, %v206_v20  ;;  %v7908_v16 = vrot.slane %v2550_v28, %v210_v41  ;;  %v7912_v13 = vrot.slane %v2550_v28, %v214_v44 }
 0x8ef   :  { %v2471_v51 = vadd.f32 %v2470_v10, %v2469_v27 }
 0x8f1   :  { %4926 = vst [vmem:[#allocation26] sm:$0xff] %v2471_v51  ;;  %6521 = vtanh.f32 %v2471_v51 }
 0x8fb   :  { %v6522_v14 = vpop.eup %6521 }
 0x8fc   :  { %v2473_v46 = vmul.f32 %v6522_v14, %v6520_v53 }
 0x8fe   :  { %2679 = vmatmul.mubr.f32.gmra.mrb[30].mxu0 %v2473_v46  ;;  %4922 = vst [vmem:[#allocation24] sm:$0xff] %v2473_v46  ;;  %2792 = vmatmul.mubr.f32.gmra.mrb[32].mxu1 %v2473_v46 }
 0x8ff   :  { %2966 = vmatprep.mubr.f32.mxu0 %v6967_v0  ;;  %3037 = vmatprep.mubr.f32.mxu1 %v6967_v0 }
 0x902   :  { %2967 = vmatmul.mubr.f32.vlgmr.msra.gmra.mrb[16].mxu0 %v7858_v33  ;;  %3038 = vmatmul.mubr.f32.vlgmr.msra.gmra.mrb[18].mxu1 %v7858_v33 }
 0x903   :  { %5772 = vmatpush1.bf16.msra.mxu0 %v7755_v22  ;;  %5804 = vmatpush1.bf16.msra.mxu1 %v7760_v3 }
 0x904   :  { %5774 = vmatprep.subr.bf16.mxu0 %v7765_v50  ;;  %5806 = vmatprep.subr.bf16.mxu1 %v7769_v25 }
 0x905   :  { %3209 = vmatprep.mubr.f32.mxu0 %v6967_v0  ;;  %3280 = vmatprep.mubr.f32.mxu1 %v6967_v0 }
 0x907   :  { %5776 = vmatpush1.bf16.msra.mxu0 %v7767_v40  ;;  %5808 = vmatpush1.bf16.msra.mxu1 %v7772_v19 }
 0x908   :  { %5778 = vmatprep.subr.bf16.mxu0 %v7777_v18  ;;  %5810 = vmatprep.subr.bf16.mxu1 %v7781_v30 }
 0x90b   :  { %5780 = vmatpush1.bf16.msra.mxu0 %v7779_v9  ;;  %5812 = vmatpush1.bf16.msra.mxu1 %v7784_v8 }
 0x90c   :  { %5782 = vmatprep.subr.bf16.mxu0 %v7789_v48  ;;  %5814 = vmatprep.subr.bf16.mxu1 %v7793_v29 }
 0x90f   :  { %5784 = vmatpush1.bf16.msra.mxu0 %v7791_v7  ;;  %5816 = vmatpush1.bf16.msra.mxu1 %v7796_v34 }
 0x910   :  { %5786 = vmatprep.subr.bf16.mxu0 %v7801_v4  ;;  %5818 = vmatprep.subr.bf16.mxu1 %v7805_v52 }
 0x913   :  { %5788 = vmatpush1.bf16.msra.mxu0 %v7803_v42  ;;  %5820 = vmatpush1.bf16.msra.mxu1 %v7808_v63 }
 0x914   :  { %5790 = vmatprep.subr.bf16.mxu0 %v7812_v2  ;;  %5822 = vmatprep.subr.bf16.mxu1 %v7817_v1 }
 0x917   :  { %5792 = vmatpush1.bf16.msra.mxu0 %v7814_v59  ;;  %5824 = vmatpush1.bf16.msra.mxu1 %v7820_v55 }
 0x918   :  { %5794 = vmatprep.subr.bf16.mxu0 %v7822_v61  ;;  %5826 = vmatprep.subr.bf16.mxu1 %v7828_v56 }
 0x91b   :  { %5796 = vmatpush1.bf16.msra.mxu0 %v7826_v54  ;;  %5828 = vmatpush1.bf16.msra.mxu1 %v7832_v47 }
 0x91c   :  { %5798 = vmatprep.subr.bf16.mxu0 %v7834_v58  ;;  %5830 = vmatprep.subr.bf16.mxu1 %v7840_v35 }
 0x91f   :  { %5800 = vmatpush1.bf16.msra.mxu0 %v7842_v49  ;;  %5832 = vmatpush1.bf16.msra.mxu1 %v7845_v37 }
 0x920   :  { %5834 = vmatprep.subr.bf16.mxu0 %v7753_v15  ;;  %5866 = vmatprep.subr.bf16.mxu1 %v7757_v32 }
 0x9d5   :  { %v2968_v38 = vpop.f32.mrb[16].mxu0  ;;  %v3039_v11 = vpop.f32.mrb[18].mxu1 }
 0x9d6   :  { %v6283_v39 = vadd.f32 %v2968_v38, %v7898_v62  ;;  %v2970_v23 = vpop.f32.mrb[17].mxu0  ;;  %v3041_v43 = vpop.f32.mrb[19].mxu1  ;;  %v6299_v20 = vadd.f32 %v3039_v11, %v7908_v16 }
 0x9d7   :  { %v6284_v17 = vadd.f32 %v2970_v23, %v7902_v6  ;;  %v6300_v57 = vadd.f32 %v3041_v43, %v7912_v13 }
 0x9d8   :  { %v5028_v26 = vmul.f32 -1.442695, %v6283_v39  ;;  %v5030_v21 = vmul.f32 -1.442695, %v6299_v20 }
 0x9d9   :  { %v5029_v31 = vmul.f32 -1.442695, %v6284_v17 }
 0x9da   :  { %6523 = vpow2.f32 %v5028_v26 }
 0x9db   :  { %6525 = vpow2.f32 %v5029_v31 }
 0x9dc   :  { %6527 = vtanh.f32 %v6300_v57 }
 0x9dd   :  { %6529 = vpow2.f32 %v5030_v21 }
 0x9e4   :  { %v6524_v45 = vpop.eup %6523 }
 0x9e5   :  { %v3057_v5 = vadd.f32 1.0, %v6524_v45  ;;  %v6526_v24 = vpop.eup %6525 }
 0x9e6   :  { %v3058_v10 = vadd.f32 1.0, %v6526_v24  ;;  %v6528_v41 = vpop.eup %6527 }
 0x9e7   :  { %6531 = vrcp.f32 %v3057_v5  ;;  %v6530_v36 = vpop.eup %6529 }
 0x9e8   :  { %6533 = vrcp.f32 %v3058_v10  ;;  %v3059_v44 = vadd.f32 1.0, %v6530_v36 }
 0x9ea   :  { %6535 = vrcp.f32 %v3059_v44 }
 0x9f1   :  { %v6532_v60 = vpop.eup %6531 }
 0x9f2   :  { %v3068_v27 = vmul.f32 %v6532_v60, %v6528_v41  ;;  %v6534_v12 = vpop.eup %6533 }
 0x9f3   :  { %v3067_v51 = vmul.f32 %v6534_v12, %v7858_v33 }
 0x9f4   :  { %v6536_v14 = vpop.eup %6535 }
 0x9f5   :  { %v7917_v53 = vadd.f32 %v3068_v27, %v3067_v51 }
 0x9f7   :  { %6537 = vtanh.f32 %v7917_v53 }
 0xa01   :  { %v6538_v46 = vpop.eup %6537 }
 0xa02   :  { %v7920_v28 = vmul.f32 %v6538_v46, %v6536_v14  ;;  %v3810_v46 = vld [vmem:[#allocation15] sm:$0xff] }
 0xa04   :  { %3210 = vmatmul.mubr.f32.vlgmr.msra.gmra.mrb[18].mxu0 %v7920_v28  ;;  %3281 = vmatmul.mubr.f32.vlgmr.msra.gmra.mrb[20].mxu1 %v7920_v28 }
 0xa05   :  { %5836 = vmatpush1.bf16.msra.mxu0 %v7755_v22  ;;  %5868 = vmatpush1.bf16.msra.mxu1 %v7760_v3 }
 0xa06   :  { %5838 = vmatprep.subr.bf16.mxu0 %v7765_v50  ;;  %5870 = vmatprep.subr.bf16.mxu1 %v7769_v25 }
 0xa07   :  { %3452 = vmatprep.mubr.f32.mxu0 %v6967_v0  ;;  %3523 = vmatprep.mubr.f32.mxu1 %v6967_v0 }
 0xa09   :  { %5840 = vmatpush1.bf16.msra.mxu0 %v7767_v40  ;;  %5872 = vmatpush1.bf16.msra.mxu1 %v7772_v19 }
 0xa0a   :  { %5842 = vmatprep.subr.bf16.mxu0 %v7777_v18  ;;  %5874 = vmatprep.subr.bf16.mxu1 %v7781_v30 }
 0xa0d   :  { %5844 = vmatpush1.bf16.msra.mxu0 %v7779_v9  ;;  %5876 = vmatpush1.bf16.msra.mxu1 %v7784_v8 }
 0xa0e   :  { %5846 = vmatprep.subr.bf16.mxu0 %v7789_v48  ;;  %5878 = vmatprep.subr.bf16.mxu1 %v7793_v29 }
 0xa11   :  { %5848 = vmatpush1.bf16.msra.mxu0 %v7791_v7  ;;  %5880 = vmatpush1.bf16.msra.mxu1 %v7796_v34 }
 0xa12   :  { %5850 = vmatprep.subr.bf16.mxu0 %v7801_v4  ;;  %5882 = vmatprep.subr.bf16.mxu1 %v7805_v52 }
 0xa15   :  { %5852 = vmatpush1.bf16.msra.mxu0 %v7803_v42  ;;  %5884 = vmatpush1.bf16.msra.mxu1 %v7808_v63 }
 0xa16   :  { %5854 = vmatprep.subr.bf16.mxu0 %v7812_v2  ;;  %5886 = vmatprep.subr.bf16.mxu1 %v7817_v1 }
 0xa19   :  { %5856 = vmatpush1.bf16.msra.mxu0 %v7814_v59  ;;  %5888 = vmatpush1.bf16.msra.mxu1 %v7820_v55 }
 0xa1a   :  { %5858 = vmatprep.subr.bf16.mxu0 %v7822_v61  ;;  %5890 = vmatprep.subr.bf16.mxu1 %v7828_v56 }
 0xa1d   :  { %5860 = vmatpush1.bf16.msra.mxu0 %v7826_v54  ;;  %5892 = vmatpush1.bf16.msra.mxu1 %v7832_v47 }
 0xa1e   :  { %5862 = vmatprep.subr.bf16.mxu0 %v7834_v58  ;;  %5894 = vmatprep.subr.bf16.mxu1 %v7840_v35 }
 0xa21   :  { %5864 = vmatpush1.bf16.msra.mxu0 %v7842_v49  ;;  %5896 = vmatpush1.bf16.msra.mxu1 %v7845_v37 }
 0xa22   :  { %5898 = vmatprep.subr.bf16.mxu0 %v7753_v15  ;;  %5930 = vmatprep.subr.bf16.mxu1 %v7757_v32 }
 0xad7   :  { %v3211_v33 = vpop.f32.mrb[18].mxu0  ;;  %v3282_v38 = vpop.f32.mrb[20].mxu1 }
 0xad8   :  { %v6285_v11 = vadd.f32 %v3211_v33, %v7898_v62  ;;  %v3213_v39 = vpop.f32.mrb[19].mxu0  ;;  %v3284_v23 = vpop.f32.mrb[21].mxu1  ;;  %v6301_v31 = vadd.f32 %v3282_v38, %v7908_v16  ;;  %v3814_v33 = vld [vmem:[#allocation15 + $0x20] sm:$0xff] }
 0xad9   :  { %v6286_v43 = vadd.f32 %v3213_v39, %v7902_v6  ;;  %v6302_v20 = vadd.f32 %v3284_v23, %v7912_v13  ;;  %v3812_v39 = vld [vmem:[#allocation15 + $0x10] sm:$0xff] }
 0xada   :  { %v5031_v17 = vmul.f32 -1.442695, %v6285_v11  ;;  %v5033_v57 = vmul.f32 -1.442695, %v6301_v31  ;;  %v8020_v11 = vpack.c.bf16 %v3814_v33, %v3810_v46  ;;  %v3816_v23 = vld [vmem:[#allocation15 + $0x30] sm:$0xff]  ;;  %v3821_v31 = vld [vmem:[#allocation15 + $0x58] sm:$0xff] }
 0xadb   :  { %v5032_v26 = vmul.f32 -1.442695, %v6286_v43  ;;  %v8023_v43 = vpack.c.bf16 %v3816_v23, %v3812_v39  ;;  %v3851_v33 = vld [vmem:[#allocation15 + $0x148] sm:$0xff]  ;;  %v3853_v23 = vld [vmem:[#allocation15 + $0x158] sm:$0xff] }
 0xadc   :  { %6539 = vpow2.f32 %v5031_v17  ;;  %v3819_v17 = vld [vmem:[#allocation15 + $0x48] sm:$0xff] }
 0xadd   :  { %6541 = vpow2.f32 %v5032_v26  ;;  %v3823_v26 = vld [vmem:[#allocation15 + $0x68] sm:$0xff] }
 0xade   :  { %6543 = vtanh.f32 %v6302_v20  ;;  %v8028_v20 = vpack.c.bf16 %v3823_v26, %v3819_v17  ;;  %v3855_v39 = vld [vmem:[#allocation15 + $0x168] sm:$0xff]  ;;  %v3857_v26 = vld [vmem:[#allocation15 + $0x178] sm:$0xff] }
 0xadf   :  { %6545 = vpow2.f32 %v5033_v57  ;;  %v3825_v57 = vld [vmem:[#allocation15 + $0x78] sm:$0xff]  ;;  %v8076_v17 = vpack.c.bf16 %v3855_v39, %v3851_v33 }
 0xae6   :  { %v6540_v15 = vpop.eup %6539 }
 0xae7   :  { %v3300_v21 = vadd.f32 1.0, %v6540_v15  ;;  %v6542_v32 = vpop.eup %6541  ;;  %v3818_v15 = vld [vmem:[#allocation15 + $0x40] sm:$0xff] }
 0xae8   :  { %v3301_v45 = vadd.f32 1.0, %v6542_v32  ;;  %v6544_v5 = vpop.eup %6543  ;;  %v8030_v32 = vpack.c.bf16 %v3825_v57, %v3821_v31  ;;  %v3850_v31 = vld [vmem:[#allocation15 + $0x140] sm:$0xff] }
 0xae9   :  { %6547 = vrcp.f32 %v3300_v21  ;;  %v6546_v24 = vpop.eup %6545  ;;  %v3822_v21 = vld [vmem:[#allocation15 + $0x60] sm:$0xff] }
 0xaea   :  { %6549 = vrcp.f32 %v3301_v45  ;;  %v3302_v60 = vadd.f32 1.0, %v6546_v24  ;;  %v8032_v45 = vpack.c.bf16 %v3822_v21, %v3818_v15  ;;  %v3824_v24 = vld [vmem:[#allocation15 + $0x70] sm:$0xff]  ;;  %v3854_v57 = vld [vmem:[#allocation15 + $0x160] sm:$0xff]  ;;  %v8078_v15 = vpack.c.bf16 %v3857_v26, %v3853_v23 }
 0xaeb   :  { %v8080_v21 = vpack.c.bf16 %v3854_v57, %v3850_v31 }
 0xaec   :  { %6551 = vrcp.f32 %v3302_v60  ;;  %v3829_v60 = vld [vmem:[#allocation15 + $0x98] sm:$0xff] }
 0xaf3   :  { %v6548_v10 = vpop.eup %6547 }
 0xaf4   :  { %v3311_v41 = vmul.f32 %v6548_v10, %v6544_v5  ;;  %v6550_v36 = vpop.eup %6549  ;;  %v3820_v5 = vld [vmem:[#allocation15 + $0x50] sm:$0xff] }
 0xaf5   :  { %v3310_v27 = vmul.f32 %v6550_v36, %v7917_v53  ;;  %v3817_v53 = vld [vmem:[#allocation15 + $0x38] sm:$0xff]  ;;  %v8035_v10 = vpack.c.bf16 %v3824_v24, %v3820_v5  ;;  %v3831_v36 = vld [vmem:[#allocation15 + $0xa8] sm:$0xff]  ;;  %v3852_v5 = vld [vmem:[#allocation15 + $0x150] sm:$0xff] }
 0xaf6   :  { %v6552_v44 = vpop.eup %6551  ;;  %v3856_v24 = vld [vmem:[#allocation15 + $0x170] sm:$0xff] }
 0xaf7   :  { %v7963_v12 = vadd.f32 %v3311_v41, %v3310_v27  ;;  %v3827_v41 = vld [vmem:[#allocation15 + $0x88] sm:$0xff] }
 0xaf8   :  { %v8040_v27 = vpack.c.bf16 %v3831_v36, %v3827_v41  ;;  %v3859_v41 = vld [vmem:[#allocation15 + $0x188] sm:$0xff]  ;;  %v8083_v36 = vpack.c.bf16 %v3856_v24, %v3852_v5 }
 0xaf9   :  { %6553 = vtanh.f32 %v7963_v12 }
 0xb03   :  { %v6554_v51 = vpop.eup %6553 }
 0xb04   :  { %v7966_v14 = vmul.f32 %v6554_v51, %v6552_v44  ;;  %v3826_v44 = vld [vmem:[#allocation15 + $0x80] sm:$0xff] }
 0xb05   :  { %v3830_v51 = vld [vmem:[#allocation15 + $0xa0] sm:$0xff] }
 0xb06   :  { %3453 = vmatmul.mubr.f32.vlgmr.msra.gmra.mrb[20].mxu0 %v7966_v14  ;;  %3524 = vmatmul.mubr.f32.vlgmr.msra.gmra.mrb[22].mxu1 %v7966_v14 }
 0xb07   :  { %5900 = vmatpush1.bf16.msra.mxu0 %v7755_v22  ;;  %5932 = vmatpush1.bf16.msra.mxu1 %v7760_v3 }
 0xb08   :  { %5902 = vmatprep.subr.bf16.mxu0 %v7765_v50  ;;  %5934 = vmatprep.subr.bf16.mxu1 %v7769_v25 }
 0xb09   :  { %3695 = vmatprep.mubr.f32.mxu0 %v6967_v0  ;;  %3766 = vmatprep.mubr.f32.mxu1 %v6967_v0 }
 0xb0b   :  { %5904 = vmatpush1.bf16.msra.mxu0 %v7767_v40  ;;  %5936 = vmatpush1.bf16.msra.mxu1 %v7772_v19 }
 0xb0c   :  { %5906 = vmatprep.subr.bf16.mxu0 %v7777_v18  ;;  %5938 = vmatprep.subr.bf16.mxu1 %v7781_v30 }
 0xb0f   :  { %5908 = vmatpush1.bf16.msra.mxu0 %v7779_v9  ;;  %5940 = vmatpush1.bf16.msra.mxu1 %v7784_v8 }
 0xb10   :  { %5910 = vmatprep.subr.bf16.mxu0 %v7789_v48  ;;  %5942 = vmatprep.subr.bf16.mxu1 %v7793_v29 }
 0xb13   :  { %5912 = vmatpush1.bf16.msra.mxu0 %v7791_v7  ;;  %5944 = vmatpush1.bf16.msra.mxu1 %v7796_v34 }
 0xb14   :  { %5914 = vmatprep.subr.bf16.mxu0 %v7801_v4  ;;  %5946 = vmatprep.subr.bf16.mxu1 %v7805_v52 }
 0xb17   :  { %5916 = vmatpush1.bf16.msra.mxu0 %v7803_v42  ;;  %5948 = vmatpush1.bf16.msra.mxu1 %v7808_v63 }
 0xb18   :  { %5918 = vmatprep.subr.bf16.mxu0 %v7812_v2  ;;  %5950 = vmatprep.subr.bf16.mxu1 %v7817_v1 }
 0xb1b   :  { %5920 = vmatpush1.bf16.msra.mxu0 %v7814_v59  ;;  %5952 = vmatpush1.bf16.msra.mxu1 %v7820_v55 }
 0xb1c   :  { %5922 = vmatprep.subr.bf16.mxu0 %v7822_v61  ;;  %5954 = vmatprep.subr.bf16.mxu1 %v7828_v56 }
 0xb1f   :  { %5924 = vmatpush1.bf16.msra.mxu0 %v7826_v54  ;;  %5956 = vmatpush1.bf16.msra.mxu1 %v7832_v47 }
 0xb20   :  { %5926 = vmatprep.subr.bf16.mxu0 %v7834_v58  ;;  %5958 = vmatprep.subr.bf16.mxu1 %v7840_v35  ;;  %v3811_v58 = vld [vmem:[#allocation15 + $0x8] sm:$0xff] }
 0xb21   :  { %v3815_v35 = vld [vmem:[#allocation15 + $0x28] sm:$0xff] }
 0xb23   :  { %5928 = vmatpush1.bf16.msra.mxu0 %v7842_v49  ;;  %5960 = vmatpush1.bf16.msra.mxu1 %v7845_v37  ;;  %v3813_v49 = vld [vmem:[#allocation15 + $0x18] sm:$0xff]  ;;  %v8016_v37 = vpack.c.bf16 %v3815_v35, %v3811_v58 }
 0xb24   :  { %v8018_v38 = vpack.c.bf16 %v3817_v53, %v3813_v49  ;;  %v3844_v49 = vld [vmem:[#allocation15 + $0x110] sm:$0xff] }
 0xb25   :  { %5962 = vmatprep.subr.bf16.mxu0 %v8016_v37  ;;  %v3848_v53 = vld [vmem:[#allocation15 + $0x130] sm:$0xff] }
 0xb26   :  { %5994 = vmatprep.subr.bf16.mxu1 %v8018_v38  ;;  %v8071_v46 = vpack.c.bf16 %v3848_v53, %v3844_v49  ;;  %v3872_v49 = vld [vmem:[#allocation15 + $0x1f0] sm:$0xff] }
 0xbd9   :  { %v3454_v22 = vpop.f32.mrb[20].mxu0  ;;  %v3525_v3 = vpop.f32.mrb[22].mxu1 }
 0xbda   :  { %v6287_v50 = vadd.f32 %v3454_v22, %v7898_v62  ;;  %v3456_v40 = vpop.f32.mrb[21].mxu0  ;;  %v3527_v25 = vpop.f32.mrb[23].mxu1  ;;  %v6303_v30 = vadd.f32 %v3525_v3, %v7908_v16  ;;  %v8044_v3 = vpack.c.bf16 %v3830_v51, %v3826_v44  ;;  %v3865_v44 = vld [vmem:[#allocation15 + $0x1b8] sm:$0xff] }
 0xbdb   :  { %v6288_v19 = vadd.f32 %v3456_v40, %v7902_v6  ;;  %v6304_v8 = vadd.f32 %v3527_v25, %v7912_v13  ;;  %v3832_v40 = vld [vmem:[#allocation15 + $0xb0] sm:$0xff] }
 0xbdc   :  { %v5034_v18 = vmul.f32 -1.442695, %v6287_v50  ;;  %v5036_v48 = vmul.f32 -1.442695, %v6303_v30  ;;  %v3828_v50 = vld [vmem:[#allocation15 + $0x90] sm:$0xff] }
 0xbdd   :  { %v5035_v9 = vmul.f32 -1.442695, %v6288_v19  ;;  %v8047_v25 = vpack.c.bf16 %v3832_v40, %v3828_v50  ;;  %v3835_v19 = vld [vmem:[#allocation15 + $0xc8] sm:$0xff]  ;;  %v3858_v40 = vld [vmem:[#allocation15 + $0x180] sm:$0xff] }
 0xbde   :  { %6555 = vpow2.f32 %v5034_v18  ;;  %v3839_v18 = vld [vmem:[#allocation15 + $0xe8] sm:$0xff] }
 0xbdf   :  { %6557 = vpow2.f32 %v5035_v9  ;;  %v3837_v9 = vld [vmem:[#allocation15 + $0xd8] sm:$0xff]  ;;  %v8052_v30 = vpack.c.bf16 %v3839_v18, %v3835_v19  ;;  %v3862_v19 = vld [vmem:[#allocation15 + $0x1a0] sm:$0xff]  ;;  %v3860_v18 = vld [vmem:[#allocation15 + $0x190] sm:$0xff] }
 0xbe0   :  { %6559 = vtanh.f32 %v6304_v8  ;;  %v3841_v8 = vld [vmem:[#allocation15 + $0xf8] sm:$0xff] }
 0xbe1   :  { %6561 = vpow2.f32 %v5036_v48  ;;  %v3834_v48 = vld [vmem:[#allocation15 + $0xc0] sm:$0xff] }
 0xbe8   :  { %v6556_v7 = vpop.eup %6555 }
 0xbe9   :  { %v3543_v29 = vadd.f32 1.0, %v6556_v7  ;;  %v6558_v34 = vpop.eup %6557  ;;  %v3838_v7 = vld [vmem:[#allocation15 + $0xe0] sm:$0xff] }
 0xbea   :  { %v3544_v4 = vadd.f32 1.0, %v6558_v34  ;;  %v6560_v42 = vpop.eup %6559  ;;  %v8056_v34 = vpack.c.bf16 %v3838_v7, %v3834_v48  ;;  %v3867_v48 = vld [vmem:[#allocation15 + $0x1c8] sm:$0xff] }
 0xbeb   :  { %6563 = vrcp.f32 %v3543_v29  ;;  %v6562_v52 = vpop.eup %6561  ;;  %v8054_v29 = vpack.c.bf16 %v3841_v8, %v3837_v9  ;;  %v8092_v9 = vpack.c.bf16 %v3862_v19, %v3858_v40  ;;  %v3864_v8 = vld [vmem:[#allocation15 + $0x1b0] sm:$0xff]  ;;  %v3871_v7 = vld [vmem:[#allocation15 + $0x1e8] sm:$0xff] }
 0xbec   :  { %6565 = vrcp.f32 %v3544_v4  ;;  %v3545_v1 = vadd.f32 1.0, %v6562_v52  ;;  %v3836_v4 = vld [vmem:[#allocation15 + $0xd0] sm:$0xff] }
 0xbee   :  { %6567 = vrcp.f32 %v3545_v1 }
 0xbf5   :  { %v6564_v63 = vpop.eup %6563 }
 0xbf6   :  { %v3554_v2 = vmul.f32 %v6564_v63, %v6560_v42  ;;  %v6566_v59 = vpop.eup %6565  ;;  %v3840_v42 = vld [vmem:[#allocation15 + $0xf0] sm:$0xff]  ;;  %v3843_v63 = vld [vmem:[#allocation15 + $0x108] sm:$0xff] }
 0xbf7   :  { %v3553_v55 = vmul.f32 %v6566_v59, %v7963_v12  ;;  %v3833_v12 = vld [vmem:[#allocation15 + $0xb8] sm:$0xff]  ;;  %v8059_v52 = vpack.c.bf16 %v3840_v42, %v3836_v4  ;;  %v8096_v4 = vpack.c.bf16 %v3864_v8, %v3860_v18  ;;  %v8098_v42 = vpack.c.bf16 %v3871_v7, %v3867_v48 }
 0xbf8   :  { %v6568_v54 = vpop.eup %6567  ;;  %v8042_v22 = vpack.c.bf16 %v3833_v12, %v3829_v60  ;;  %v3845_v59 = vld [vmem:[#allocation15 + $0x118] sm:$0xff]  ;;  %v3863_v60 = vld [vmem:[#allocation15 + $0x1a8] sm:$0xff] }
 0xbf9   :  { %v8007_v61 = vadd.f32 %v3554_v2, %v3553_v55  ;;  %v3847_v2 = vld [vmem:[#allocation15 + $0x128] sm:$0xff]  ;;  %v3849_v55 = vld [vmem:[#allocation15 + $0x138] sm:$0xff]  ;;  %v8087_v51 = vpack.c.bf16 %v3863_v60, %v3859_v41 }
 0xbfa   :  { %v8064_v1 = vpack.c.bf16 %v3847_v2, %v3843_v63  ;;  %v8066_v58 = vpack.c.bf16 %v3849_v55, %v3845_v59  ;;  %v3861_v12 = vld [vmem:[#allocation15 + $0x198] sm:$0xff]  ;;  %v3866_v59 = vld [vmem:[#allocation15 + $0x1c0] sm:$0xff] }
 0xbfb   :  { %6569 = vtanh.f32 %v8007_v61  ;;  %v8089_v50 = vpack.c.bf16 %v3865_v44, %v3861_v12  ;;  %v3869_v63 = vld [vmem:[#allocation15 + $0x1d8] sm:$0xff] }
 0xbfc   :  { %v3873_v2 = vld [vmem:[#allocation15 + $0x1f8] sm:$0xff] }
 0xbfd   :  { %v8100_v55 = vpack.c.bf16 %v3873_v2, %v3869_v63 }
 0xc05   :  { %v6570_v56 = vpop.eup %6569 }
 0xc06   :  { %v8010_v47 = vmul.f32 %v6570_v56, %v6568_v54  ;;  %v3842_v54 = vld [vmem:[#allocation15 + $0x100] sm:$0xff] }
 0xc07   :  { %v3846_v56 = vld [vmem:[#allocation15 + $0x120] sm:$0xff] }
 0xc08   :  { %3696 = vmatmul.mubr.f32.vlgmr.msra.gmra.mrb[22].mxu0 %v8010_v47  ;;  %3767 = vmatmul.mubr.f32.vlgmr.msra.gmra.mrb[24].mxu1 %v8010_v47  ;;  %v8068_v35 = vpack.c.bf16 %v3846_v56, %v3842_v54  ;;  %v3870_v54 = vld [vmem:[#allocation15 + $0x1e0] sm:$0xff]  ;;  %v3868_v56 = vld [vmem:[#allocation15 + $0x1d0] sm:$0xff] }
 0xc09   :  { %3938 = vmatprep.mubr.f32.mxu0 %v6967_v0  ;;  %4009 = vmatprep.mubr.f32.mxu1 %v6967_v0  ;;  %v8103_v53 = vpack.c.bf16 %v3870_v54, %v3866_v59  ;;  %v8107_v33 = vpack.c.bf16 %v3872_v49, %v3868_v56 }
 0xc0a   :  { %5964 = vmatpush1.bf16.msra.mxu0 %v8020_v11  ;;  %5996 = vmatpush1.bf16.msra.mxu1 %v8023_v43 }
 0xc0b   :  { %5966 = vmatprep.subr.bf16.mxu0 %v8028_v20  ;;  %5998 = vmatprep.subr.bf16.mxu1 %v8030_v32 }
 0xc0e   :  { %5968 = vmatpush1.bf16.msra.mxu0 %v8032_v45  ;;  %6000 = vmatpush1.bf16.msra.mxu1 %v8035_v10 }
 0xc0f   :  { %5970 = vmatprep.subr.bf16.mxu0 %v8040_v27  ;;  %6002 = vmatprep.subr.bf16.mxu1 %v8042_v22 }
 0xc12   :  { %5972 = vmatpush1.bf16.msra.mxu0 %v8044_v3  ;;  %6004 = vmatpush1.bf16.msra.mxu1 %v8047_v25 }
 0xc13   :  { %5974 = vmatprep.subr.bf16.mxu0 %v8052_v30  ;;  %6006 = vmatprep.subr.bf16.mxu1 %v8054_v29 }
 0xc16   :  { %5976 = vmatpush1.bf16.msra.mxu0 %v8056_v34  ;;  %6008 = vmatpush1.bf16.msra.mxu1 %v8059_v52 }
 0xc17   :  { %5978 = vmatprep.subr.bf16.mxu0 %v8064_v1  ;;  %6010 = vmatprep.subr.bf16.mxu1 %v8066_v58 }
 0xc1a   :  { %5980 = vmatpush1.bf16.msra.mxu0 %v8068_v35  ;;  %6012 = vmatpush1.bf16.msra.mxu1 %v8071_v46 }
 0xc1b   :  { %5982 = vmatprep.subr.bf16.mxu0 %v8076_v17  ;;  %6014 = vmatprep.subr.bf16.mxu1 %v8078_v15 }
 0xc1e   :  { %5984 = vmatpush1.bf16.msra.mxu0 %v8080_v21  ;;  %6016 = vmatpush1.bf16.msra.mxu1 %v8083_v36 }
 0xc1f   :  { %5986 = vmatprep.subr.bf16.mxu0 %v8087_v51  ;;  %6018 = vmatprep.subr.bf16.mxu1 %v8089_v50 }
 0xc22   :  { %5988 = vmatpush1.bf16.msra.mxu0 %v8092_v9  ;;  %6020 = vmatpush1.bf16.msra.mxu1 %v8096_v4 }
 0xc23   :  { %5990 = vmatprep.subr.bf16.mxu0 %v8098_v42  ;;  %6022 = vmatprep.subr.bf16.mxu1 %v8100_v55 }
 0xc26   :  { %5992 = vmatpush1.bf16.msra.mxu0 %v8103_v53  ;;  %6024 = vmatpush1.bf16.msra.mxu1 %v8107_v33 }
 0xc27   :  { %6026 = vmatprep.subr.bf16.mxu0 %v8016_v37  ;;  %6058 = vmatprep.subr.bf16.mxu1 %v8018_v38 }
 0xcdb   :  { %v3697_v39 = vpop.f32.mrb[22].mxu0  ;;  %v3768_v23 = vpop.f32.mrb[24].mxu1 }
 0xcdc   :  { %v6289_v26 = vadd.f32 %v3697_v39, %v7898_v62  ;;  %v3699_v31 = vpop.f32.mrb[23].mxu0  ;;  %v3770_v57 = vpop.f32.mrb[25].mxu1  ;;  %v6305_v60 = vadd.f32 %v3768_v23, %v7908_v16 }
 0xcdd   :  { %v6290_v5 = vadd.f32 %v3699_v31, %v7902_v6  ;;  %v6306_v12 = vadd.f32 %v3770_v57, %v7912_v13 }
 0xcde   :  { %v5037_v24 = vmul.f32 -1.442695, %v6289_v26  ;;  %v5039_v44 = vmul.f32 -1.442695, %v6305_v60 }
 0xcdf   :  { %v5038_v41 = vmul.f32 -1.442695, %v6290_v5 }
 0xce0   :  { %6571 = vpow2.f32 %v5037_v24 }
 0xce1   :  { %6573 = vpow2.f32 %v5038_v41 }
 0xce2   :  { %6575 = vtanh.f32 %v6306_v12 }
 0xce3   :  { %6577 = vpow2.f32 %v5039_v44 }
 0xcea   :  { %v6572_v40 = vpop.eup %6571 }
 0xceb   :  { %v3786_v19 = vadd.f32 1.0, %v6572_v40  ;;  %v6574_v18 = vpop.eup %6573 }
 0xcec   :  { %v3787_v8 = vadd.f32 1.0, %v6574_v18  ;;  %v6576_v48 = vpop.eup %6575 }
 0xced   :  { %6579 = vrcp.f32 %v3786_v19  ;;  %v6578_v7 = vpop.eup %6577 }
 0xcee   :  { %6581 = vrcp.f32 %v3787_v8  ;;  %v3788_v54 = vadd.f32 1.0, %v6578_v7 }
 0xcf0   :  { %6583 = vrcp.f32 %v3788_v54 }
 0xcf7   :  { %v6580_v63 = vpop.eup %6579 }
 0xcf8   :  { %v3797_v2 = vmul.f32 %v6580_v63, %v6576_v48  ;;  %v6582_v59 = vpop.eup %6581 }
 0xcf9   :  { %v3796_v56 = vmul.f32 %v6582_v59, %v8007_v61 }
 0xcfa   :  { %v6584_v39 = vpop.eup %6583 }
 0xcfb   :  { %v8119_v49 = vadd.f32 %v3797_v2, %v3796_v56 }
 0xcfd   :  { %6585 = vtanh.f32 %v8119_v49 }
 0xd07   :  { %v6586_v23 = vpop.eup %6585 }
 0xd08   :  { %v8122_v26 = vmul.f32 %v6586_v23, %v6584_v39 }
 0xd0a   :  { %3939 = vmatmul.mubr.f32.vlgmr.msra.gmra.mrb[24].mxu0 %v8122_v26  ;;  %4010 = vmatmul.mubr.f32.vlgmr.msra.gmra.mrb[26].mxu1 %v8122_v26 }
 0xd0b   :  { %6028 = vmatpush1.bf16.msra.mxu0 %v8020_v11  ;;  %6060 = vmatpush1.bf16.msra.mxu1 %v8023_v43 }
 0xd0c   :  { %6030 = vmatprep.subr.bf16.mxu0 %v8028_v20  ;;  %6062 = vmatprep.subr.bf16.mxu1 %v8030_v32 }
 0xd0d   :  { %4181 = vmatprep.mubr.f32.mxu0 %v6967_v0  ;;  %4252 = vmatprep.mubr.f32.mxu1 %v6967_v0 }
 0xd0f   :  { %6032 = vmatpush1.bf16.msra.mxu0 %v8032_v45  ;;  %6064 = vmatpush1.bf16.msra.mxu1 %v8035_v10 }
 0xd10   :  { %6034 = vmatprep.subr.bf16.mxu0 %v8040_v27  ;;  %6066 = vmatprep.subr.bf16.mxu1 %v8042_v22 }
 0xd13   :  { %6036 = vmatpush1.bf16.msra.mxu0 %v8044_v3  ;;  %6068 = vmatpush1.bf16.msra.mxu1 %v8047_v25 }
 0xd14   :  { %6038 = vmatprep.subr.bf16.mxu0 %v8052_v30  ;;  %6070 = vmatprep.subr.bf16.mxu1 %v8054_v29 }
 0xd17   :  { %6040 = vmatpush1.bf16.msra.mxu0 %v8056_v34  ;;  %6072 = vmatpush1.bf16.msra.mxu1 %v8059_v52 }
 0xd18   :  { %6042 = vmatprep.subr.bf16.mxu0 %v8064_v1  ;;  %6074 = vmatprep.subr.bf16.mxu1 %v8066_v58 }
 0xd1b   :  { %6044 = vmatpush1.bf16.msra.mxu0 %v8068_v35  ;;  %6076 = vmatpush1.bf16.msra.mxu1 %v8071_v46 }
 0xd1c   :  { %6046 = vmatprep.subr.bf16.mxu0 %v8076_v17  ;;  %6078 = vmatprep.subr.bf16.mxu1 %v8078_v15 }
 0xd1f   :  { %6048 = vmatpush1.bf16.msra.mxu0 %v8080_v21  ;;  %6080 = vmatpush1.bf16.msra.mxu1 %v8083_v36 }
 0xd20   :  { %6050 = vmatprep.subr.bf16.mxu0 %v8087_v51  ;;  %6082 = vmatprep.subr.bf16.mxu1 %v8089_v50 }
 0xd23   :  { %6052 = vmatpush1.bf16.msra.mxu0 %v8092_v9  ;;  %6084 = vmatpush1.bf16.msra.mxu1 %v8096_v4 }
 0xd24   :  { %6054 = vmatprep.subr.bf16.mxu0 %v8098_v42  ;;  %6086 = vmatprep.subr.bf16.mxu1 %v8100_v55 }
 0xd27   :  { %6056 = vmatpush1.bf16.msra.mxu0 %v8103_v53  ;;  %6088 = vmatpush1.bf16.msra.mxu1 %v8107_v33 }
 0xd28   :  { %6090 = vmatprep.subr.bf16.mxu0 %v8016_v37  ;;  %6122 = vmatprep.subr.bf16.mxu1 %v8018_v38 }
 0xddd   :  { %v3940_v61 = vpop.f32.mrb[24].mxu0  ;;  %v4011_v31 = vpop.f32.mrb[26].mxu1 }
 0xdde   :  { %v6291_v57 = vadd.f32 %v3940_v61, %v7898_v62  ;;  %v3942_v5 = vpop.f32.mrb[25].mxu0  ;;  %v4013_v24 = vpop.f32.mrb[27].mxu1  ;;  %v6307_v44 = vadd.f32 %v4011_v31, %v7908_v16 }
 0xddf   :  { %v6292_v41 = vadd.f32 %v3942_v5, %v7902_v6  ;;  %v6308_v40 = vadd.f32 %v4013_v24, %v7912_v13 }
 0xde0   :  { %v5040_v60 = vmul.f32 -1.442695, %v6291_v57  ;;  %v5042_v19 = vmul.f32 -1.442695, %v6307_v44 }
 0xde1   :  { %v5041_v12 = vmul.f32 -1.442695, %v6292_v41 }
 0xde2   :  { %6587 = vpow2.f32 %v5040_v60 }
 0xde3   :  { %6589 = vpow2.f32 %v5041_v12 }
 0xde4   :  { %6591 = vtanh.f32 %v6308_v40 }
 0xde5   :  { %6593 = vpow2.f32 %v5042_v19 }
 0xdec   :  { %v6588_v18 = vpop.eup %6587 }
 0xded   :  { %v4029_v8 = vadd.f32 1.0, %v6588_v18  ;;  %v6590_v48 = vpop.eup %6589 }
 0xdee   :  { %v4030_v7 = vadd.f32 1.0, %v6590_v48  ;;  %v6592_v63 = vpop.eup %6591 }
 0xdef   :  { %6595 = vrcp.f32 %v4029_v8  ;;  %v6594_v2 = vpop.eup %6593 }
 0xdf0   :  { %6597 = vrcp.f32 %v4030_v7  ;;  %v4031_v39 = vadd.f32 1.0, %v6594_v2 }
 0xdf2   :  { %6599 = vrcp.f32 %v4031_v39 }
 0xdf9   :  { %v6596_v59 = vpop.eup %6595 }
 0xdfa   :  { %v4040_v54 = vmul.f32 %v6596_v59, %v6592_v63  ;;  %v6598_v56 = vpop.eup %6597 }
 0xdfb   :  { %v4039_v23 = vmul.f32 %v6598_v56, %v8119_v49 }
 0xdfc   :  { %v6600_v31 = vpop.eup %6599 }
 0xdfd   :  { %v8165_v61 = vadd.f32 %v4040_v54, %v4039_v23 }
 0xdff   :  { %6601 = vtanh.f32 %v8165_v61 }
 0xe09   :  { %v6602_v57 = vpop.eup %6601 }
 0xe0a   :  { %v8168_v5 = vmul.f32 %v6602_v57, %v6600_v31 }
 0xe0c   :  { %4182 = vmatmul.mubr.f32.vlgmr.msra.gmra.mrb[26].mxu0 %v8168_v5  ;;  %4253 = vmatmul.mubr.f32.vlgmr.msra.gmra.mrb[28].mxu1 %v8168_v5 }
 0xe0d   :  { %6092 = vmatpush1.bf16.msra.mxu0 %v8020_v11  ;;  %6124 = vmatpush1.bf16.msra.mxu1 %v8023_v43 }
 0xe0e   :  { %6094 = vmatprep.subr.bf16.mxu0 %v8028_v20  ;;  %6126 = vmatprep.subr.bf16.mxu1 %v8030_v32 }
 0xe0f   :  { %4424 = vmatprep.mubr.f32.mxu0 %v6967_v0  ;;  %4495 = vmatprep.mubr.f32.mxu1 %v6967_v0 }
 0xe11   :  { %6096 = vmatpush1.bf16.msra.mxu0 %v8032_v45  ;;  %6128 = vmatpush1.bf16.msra.mxu1 %v8035_v10 }
 0xe12   :  { %6098 = vmatprep.subr.bf16.mxu0 %v8040_v27  ;;  %6130 = vmatprep.subr.bf16.mxu1 %v8042_v22 }
 0xe15   :  { %6100 = vmatpush1.bf16.msra.mxu0 %v8044_v3  ;;  %6132 = vmatpush1.bf16.msra.mxu1 %v8047_v25 }
 0xe16   :  { %6102 = vmatprep.subr.bf16.mxu0 %v8052_v30  ;;  %6134 = vmatprep.subr.bf16.mxu1 %v8054_v29 }
 0xe19   :  { %6104 = vmatpush1.bf16.msra.mxu0 %v8056_v34  ;;  %6136 = vmatpush1.bf16.msra.mxu1 %v8059_v52 }
 0xe1a   :  { %6106 = vmatprep.subr.bf16.mxu0 %v8064_v1  ;;  %6138 = vmatprep.subr.bf16.mxu1 %v8066_v58 }
 0xe1d   :  { %6108 = vmatpush1.bf16.msra.mxu0 %v8068_v35  ;;  %6140 = vmatpush1.bf16.msra.mxu1 %v8071_v46 }
 0xe1e   :  { %6110 = vmatprep.subr.bf16.mxu0 %v8076_v17  ;;  %6142 = vmatprep.subr.bf16.mxu1 %v8078_v15 }
 0xe21   :  { %6112 = vmatpush1.bf16.msra.mxu0 %v8080_v21  ;;  %6144 = vmatpush1.bf16.msra.mxu1 %v8083_v36 }
 0xe22   :  { %6114 = vmatprep.subr.bf16.mxu0 %v8087_v51  ;;  %6146 = vmatprep.subr.bf16.mxu1 %v8089_v50 }
 0xe25   :  { %6116 = vmatpush1.bf16.msra.mxu0 %v8092_v9  ;;  %6148 = vmatpush1.bf16.msra.mxu1 %v8096_v4 }
 0xe26   :  { %6118 = vmatprep.subr.bf16.mxu0 %v8098_v42  ;;  %6150 = vmatprep.subr.bf16.mxu1 %v8100_v55 }
 0xe29   :  { %6120 = vmatpush1.bf16.msra.mxu0 %v8103_v53  ;;  %6152 = vmatpush1.bf16.msra.mxu1 %v8107_v33 }
 0xe2a   :  { %6154 = vmatprep.subr.bf16.mxu0 %v8016_v37  ;;  %6186 = vmatprep.subr.bf16.mxu1 %v8018_v38 }
 0xedf   :  { %v4183_v49 = vpop.f32.mrb[26].mxu0  ;;  %v4254_v24 = vpop.f32.mrb[28].mxu1 }
 0xee0   :  { %v6293_v41 = vadd.f32 %v4183_v49, %v7898_v62  ;;  %v4185_v60 = vpop.f32.mrb[27].mxu0  ;;  %v4256_v12 = vpop.f32.mrb[29].mxu1  ;;  %v6309_v18 = vadd.f32 %v4254_v24, %v7908_v16 }
 0xee1   :  { %v6294_v44 = vadd.f32 %v4185_v60, %v7902_v6  ;;  %v6310_v8 = vadd.f32 %v4256_v12, %v7912_v13  ;;  %v4788_v60 = vld [vmem:[#allocation20 + $0x20] sm:$0xff]  ;;  %v4789_v12 = vld [vmem:[#allocation20 + $0x28] sm:$0xff] }
 0xee2   :  { %v5043_v40 = vmul.f32 -1.442695, %v6293_v41  ;;  %v5045_v48 = vmul.f32 -1.442695, %v6309_v18 }
 0xee3   :  { %v5044_v19 = vmul.f32 -1.442695, %v6294_v44  ;;  %v6225_v44 = vpack.c.bf16 %v4789_v12, %v4788_v60 }
 0xee4   :  { %6603 = vpow2.f32 %v5043_v40  ;;  %v4790_v40 = vld [vmem:[#allocation20 + $0x30] sm:$0xff] }
 0xee5   :  { %6605 = vpow2.f32 %v5044_v19  ;;  %v4791_v19 = vld [vmem:[#allocation20 + $0x38] sm:$0xff] }
 0xee6   :  { %6607 = vtanh.f32 %v6310_v8  ;;  %v6229_v18 = vpack.c.bf16 %v4791_v19, %v4790_v40  ;;  %v4792_v8 = vld [vmem:[#allocation20 + $0x40] sm:$0xff] }
 0xee7   :  { %6609 = vpow2.f32 %v5045_v48  ;;  %v4793_v48 = vld [vmem:[#allocation20 + $0x48] sm:$0xff] }
 0xeee   :  { %v6604_v37 = vpop.eup %6603 }
 0xeef   :  { %v4272_v7 = vadd.f32 1.0, %v6604_v37  ;;  %v6606_v38 = vpop.eup %6605  ;;  %v6233_v37 = vpack.c.bf16 %v4793_v48, %v4792_v8 }
 0xef0   :  { %v4273_v63 = vadd.f32 1.0, %v6606_v38  ;;  %v6608_v2 = vpop.eup %6607  ;;  %v4795_v38 = vld [vmem:[#allocation20 + $0x58] sm:$0xff] }
 0xef1   :  { %6611 = vrcp.f32 %v4272_v7  ;;  %v6610_v59 = vpop.eup %6609  ;;  %v4794_v7 = vld [vmem:[#allocation20 + $0x50] sm:$0xff] }
 0xef2   :  { %6613 = vrcp.f32 %v4273_v63  ;;  %v4274_v23 = vadd.f32 1.0, %v6610_v59  ;;  %v6237_v63 = vpack.c.bf16 %v4795_v38, %v4794_v7  ;;  %v4797_v59 = vld [vmem:[#allocation20 + $0x68] sm:$0xff] }
 0xef4   :  { %6615 = vrcp.f32 %v4274_v23 }
 0xefb   :  { %v6612_v54 = vpop.eup %6611 }
 0xefc   :  { %v4283_v56 = vmul.f32 %v6612_v54, %v6608_v2  ;;  %v6614_v39 = vpop.eup %6613  ;;  %v4796_v2 = vld [vmem:[#allocation20 + $0x60] sm:$0xff]  ;;  %v4798_v54 = vld [vmem:[#allocation20 + $0x70] sm:$0xff] }
 0xefd   :  { %v4282_v31 = vmul.f32 %v6614_v39, %v8165_v61 }
 0xefe   :  { %v6616_v49 = vpop.eup %6615 }
 0xeff   :  { %v8211_v57 = vadd.f32 %v4283_v56, %v4282_v31  ;;  %v4799_v56 = vld [vmem:[#allocation20 + $0x78] sm:$0xff] }
 0xf00   :  { %v6245_v39 = vpack.c.bf16 %v4799_v56, %v4798_v54 }
 0xf01   :  { %6617 = vtanh.f32 %v8211_v57 }
 0xf0b   :  { %v6618_v24 = vpop.eup %6617 }
 0xf0c   :  { %v8214_v41 = vmul.f32 %v6618_v24, %v6616_v49 }
 0xf0e   :  { %4425 = vmatmul.mubr.f32.vlgmr.msra.gmra.mrb[28].mxu0 %v8214_v41  ;;  %4496 = vmatmul.mubr.f32.vlgmr.msra.gmra.mrb[30].mxu1 %v8214_v41 }
 0xf0f   :  { %6156 = vmatpush1.bf16.msra.mxu0 %v8020_v11  ;;  %6188 = vmatpush1.bf16.msra.mxu1 %v8023_v43  ;;  %v4785_v11 = vld [vmem:[#allocation20 + $0x8] sm:$0xff] }
 0xf10   :  { %6158 = vmatprep.subr.bf16.mxu0 %v8028_v20  ;;  %6190 = vmatprep.subr.bf16.mxu1 %v8030_v32 }
 0xf11   :  { %4667 = vmatprep.mubr.f32.mxu0 %v6967_v0  ;;  %4738 = vmatprep.mubr.f32.mxu1 %v6967_v0  ;;  %v4784_v0 = vld [vmem:[#allocation20] sm:$0xff] }
 0xf12   :  { %v6217_v43 = vpack.c.bf16 %v4785_v11, %v4784_v0 }
 0xf13   :  { %6160 = vmatpush1.bf16.msra.mxu0 %v8032_v45  ;;  %6192 = vmatpush1.bf16.msra.mxu1 %v8035_v10 }
 0xf14   :  { %6162 = vmatprep.subr.bf16.mxu0 %v8040_v27  ;;  %6194 = vmatprep.subr.bf16.mxu1 %v8042_v22 }
 0xf17   :  { %6164 = vmatpush1.bf16.msra.mxu0 %v8044_v3  ;;  %6196 = vmatpush1.bf16.msra.mxu1 %v8047_v25 }
 0xf18   :  { %6166 = vmatprep.subr.bf16.mxu0 %v8052_v30  ;;  %6198 = vmatprep.subr.bf16.mxu1 %v8054_v29 }
 0xf1b   :  { %6168 = vmatpush1.bf16.msra.mxu0 %v8056_v34  ;;  %6200 = vmatpush1.bf16.msra.mxu1 %v8059_v52 }
 0xf1c   :  { %6170 = vmatprep.subr.bf16.mxu0 %v8064_v1  ;;  %6202 = vmatprep.subr.bf16.mxu1 %v8066_v58 }
 0xf1f   :  { %6172 = vmatpush1.bf16.msra.mxu0 %v8068_v35  ;;  %6204 = vmatpush1.bf16.msra.mxu1 %v8071_v46 }
 0xf20   :  { %6174 = vmatprep.subr.bf16.mxu0 %v8076_v17  ;;  %6206 = vmatprep.subr.bf16.mxu1 %v8078_v15 }
 0xf23   :  { %6176 = vmatpush1.bf16.msra.mxu0 %v8080_v21  ;;  %6208 = vmatpush1.bf16.msra.mxu1 %v8083_v36 }
 0xf24   :  { %6178 = vmatprep.subr.bf16.mxu0 %v8087_v51  ;;  %6210 = vmatprep.subr.bf16.mxu1 %v8089_v50 }
 0xf27   :  { %6180 = vmatpush1.bf16.msra.mxu0 %v8092_v9  ;;  %6212 = vmatpush1.bf16.msra.mxu1 %v8096_v4  ;;  %v4786_v4 = vld [vmem:[#allocation20 + $0x10] sm:$0xff] }
 0xf28   :  { %6182 = vmatprep.subr.bf16.mxu0 %v8098_v42  ;;  %6214 = vmatprep.subr.bf16.mxu1 %v8100_v55  ;;  %v4787_v42 = vld [vmem:[#allocation20 + $0x18] sm:$0xff] }
 0xf29   :  { %v6221_v61 = vpack.c.bf16 %v4787_v42, %v4786_v4 }
 0xf2b   :  { %6184 = vmatpush1.bf16.msra.mxu0 %v8103_v53  ;;  %6216 = vmatpush1.bf16.msra.mxu1 %v8107_v33 }
 0xf2c   :  { %6218 = vmatprep.subr.bf16.mxu0 %v6217_v43 }
 0xfe1   :  { %v4426_v20 = vpop.f32.mrb[28].mxu0  ;;  %v4497_v32 = vpop.f32.mrb[30].mxu1 }
 0xfe2   :  { %v6295_v45 = vadd.f32 %v4426_v20, %v7898_v62  ;;  %v4428_v10 = vpop.f32.mrb[29].mxu0  ;;  %v4499_v27 = vpop.f32.mrb[31].mxu1  ;;  %v6311_v30 = vadd.f32 %v4497_v32, %v7908_v16 }
 0xfe3   :  { %v6296_v22 = vadd.f32 %v4428_v10, %v7902_v6  ;;  %v6312_v29 = vadd.f32 %v4499_v27, %v7912_v13 }
 0xfe4   :  { %v5046_v3 = vmul.f32 -1.442695, %v6295_v45  ;;  %v5048_v34 = vmul.f32 -1.442695, %v6311_v30 }
 0xfe5   :  { %v5047_v25 = vmul.f32 -1.442695, %v6296_v22 }
 0xfe6   :  { %6619 = vpow2.f32 %v5046_v3  ;;  %v8268_v3 = vld [vmem:[#allocation21] ss:$0 sm:$0xff] }
 0xfe7   :  { %6621 = vpow2.f32 %v5047_v25 }
 0xfe8   :  { %6623 = vtanh.f32 %v6312_v29 }
 0xfe9   :  { %6625 = vpow2.f32 %v5048_v34 }
 0xff0   :  { %v6620_v52 = vpop.eup %6619 }
 0xff1   :  { %v4515_v1 = vadd.f32 1.0, %v6620_v52  ;;  %v6622_v58 = vpop.eup %6621 }
 0xff2   :  { %v4516_v35 = vadd.f32 1.0, %v6622_v58  ;;  %v6624_v46 = vpop.eup %6623 }
 0xff3   :  { %6627 = vrcp.f32 %v4515_v1  ;;  %v6626_v17 = vpop.eup %6625 }
 0xff4   :  { %6629 = vrcp.f32 %v4516_v35  ;;  %v4517_v51 = vadd.f32 1.0, %v6626_v17 }
 0xff6   :  { %6631 = vrcp.f32 %v4517_v51 }
 0xffd   :  { %v6628_v15 = vpop.eup %6627 }
 0xffe   :  { %v4526_v21 = vmul.f32 %v6628_v15, %v6624_v46  ;;  %v6630_v36 = vpop.eup %6629 }
 0xfff   :  { %v4525_v50 = vmul.f32 %v6630_v36, %v8211_v57 }
0x1000   :  { %v6632_v55 = vpop.eup %6631 }
0x1001   :  { %v8255_v9 = vadd.f32 %v4526_v21, %v4525_v50 }
0x1003   :  { %6633 = vtanh.f32 %v8255_v9 }
0x100d   :  { %v6634_v53 = vpop.eup %6633 }
0x100e   :  { %v4529_v33 = vmul.f32 %v6634_v53, %v6632_v55 }
0x1010   :  { %4668 = vmatmul.mubr.f32.vlgmr.msra.gmra.mrb[30].mxu0 %v4529_v33  ;;  %4739 = vmatmul.mubr.f32.vlgmr.msra.gmra.mrb[32].mxu1 %v4529_v33 }
0x1011   :  { %6220 = vmatpush3.bf16.msra.mxu0 %v6217_v43  ;;  %5109 = vmatprep.mubr.f32.mxu0 %v7920_v28  ;;  %v6241_v28 = vpack.c.bf16 %v4797_v59, %v4796_v2 }
0x1012   :  { %6222 = vmatprep.subr.bf16.mxu0 %v6221_v61 }
0x1015   :  { %6224 = vmatpush3.bf16.msra.mxu0 %v6221_v61 }
0x1016   :  { %6226 = vmatprep.subr.bf16.mxu0 %v6225_v44 }
0x1019   :  { %6228 = vmatpush3.bf16.msra.mxu0 %v6225_v44 }
0x101a   :  { %6230 = vmatprep.subr.bf16.mxu0 %v6229_v18 }
0x101d   :  { %6232 = vmatpush3.bf16.msra.mxu0 %v6229_v18 }
0x101e   :  { %6234 = vmatprep.subr.bf16.mxu0 %v6233_v37 }
0x1021   :  { %6236 = vmatpush3.bf16.msra.mxu0 %v6233_v37 }
0x1022   :  { %6238 = vmatprep.subr.bf16.mxu0 %v6237_v63 }
0x1025   :  { %6240 = vmatpush3.bf16.msra.mxu0 %v6237_v63 }
0x1026   :  { %6242 = vmatprep.subr.bf16.mxu0 %v6241_v28 }
0x1029   :  { %6244 = vmatpush3.bf16.msra.mxu0 %v6241_v28 }
0x102a   :  { %6246 = vmatprep.subr.bf16.mxu0 %v6245_v39 }
0x102d   :  { %6248 = vmatpush3.bf16.msra.mxu0 %v6245_v39 }
0x1030   :  { %5110 = vmatmul.mubr.f32.vlgmr.msra.gmra.mrb[32].mxu0 %v7966_v14 }
0x1031   :  { %5112 = vmatprep.mubr.f32.mxu0 %v8010_v47 }
0x1034   :  { %5113 = vmatmul.mubr.f32.gmra.mrb[34].mxu0 %v8122_v26 }
0x1035   :  { %5115 = vmatprep.mubr.f32.mxu0 %v8168_v5 }
0x1038   :  { %5116 = vmatmul.mubr.f32.gmra.mrb[36].mxu0 %v8214_v41 }
0x1039   :  { %5118 = vmatprep.mubr.f32.mxu0 %v4529_v33 }
0x10e3   :  { %v4669_v23 = vpop.f32.mrb[30].mxu0  ;;  %v4740_v31 = vpop.f32.mrb[32].mxu1 }
0x10e4   :  { %v6297_v57 = vadd.f32 %v4669_v23, %v7898_v62  ;;  %v4671_v49 = vpop.f32.mrb[31].mxu0  ;;  %v4742_v24 = vpop.f32.mrb[33].mxu1  ;;  %v6313_v14 = vadd.f32 %v4740_v31, %v7908_v16 }
0x10e5   :  { %v6298_v0 = vadd.f32 %v4671_v49, %v7902_v6  ;;  %v6314_v47 = vadd.f32 %v4742_v24, %v7912_v13 }
0x10e6   :  { %v5049_v11 = vmul.f32 -1.442695, %v6297_v57  ;;  %v5051_v26 = vmul.f32 -1.442695, %v6313_v14 }
0x10e7   :  { %v5050_v43 = vmul.f32 -1.442695, %v6298_v0 }
0x10e8   :  { %6635 = vpow2.f32 %v5049_v11 }
0x10e9   :  { %6637 = vpow2.f32 %v5050_v43 }
0x10ea   :  { %6639 = vtanh.f32 %v6314_v47 }
0x10eb   :  { %6641 = vpow2.f32 %v5051_v26 }
0x10f2   :  { %v6636_v5 = vpop.eup %6635 }
0x10f3   :  { %v4758_v41 = vadd.f32 1.0, %v6636_v5  ;;  %v6638_v20 = vpop.eup %6637 }
0x10f4   :  { %v4759_v62 = vadd.f32 1.0, %v6638_v20  ;;  %v6640_v32 = vpop.eup %6639 }
0x10f5   :  { %6643 = vrcp.f32 %v4758_v41  ;;  %v6642_v45 = vpop.eup %6641 }
0x10f6   :  { %6645 = vrcp.f32 %v4759_v62  ;;  %v4760_v22 = vadd.f32 1.0, %v6642_v45 }
0x10f8   :  { %6647 = vrcp.f32 %v4760_v22 }
0x10ff   :  { %v6644_v6 = vpop.eup %6643 }
0x1100   :  { %v4769_v10 = vmul.f32 %v6644_v6, %v6640_v32  ;;  %v6646_v27 = vpop.eup %6645 }
0x1101   :  { %v4768_v16 = vmul.f32 %v6646_v27, %v8255_v9 }
0x1102   :  { %v6648_v36 = vpop.eup %6647 }
0x1103   :  { %v5111_v13 = vpop.f32.mrb[32].mxu0  ;;  %v4770_v25 = vadd.f32 %v4769_v10, %v4768_v16 }
0x1104   :  { %v4879_v30 = vadd.f32 %v5111_v13, %v8268_v3  ;;  %v4873_v29 = vpop.f32.mrb[33].mxu0 }
0x1105   :  { %v4874_v34 = vadd.f32 %v8268_v3, %v4873_v29  ;;  %4927 = vst [vmem:[#allocation26 + $0x8] sm:$0xff] %v4770_v25  ;;  %6649 = vtanh.f32 %v4770_v25 }
0x1106   :  { %4913 = vst [vmem:[#allocation23 + $0x8] sm:$0xff] %v4879_v30 }
0x1107   :  { %4912 = vst [vmem:[#allocation23] sm:$0xff] %v4874_v34  ;;  %v5114_v52 = vpop.f32.mrb[34].mxu0 }
0x1108   :  { %v4889_v1 = vadd.f32 %v5114_v52, %v8268_v3  ;;  %v4883_v58 = vpop.f32.mrb[35].mxu0 }
0x1109   :  { %v4884_v35 = vadd.f32 %v8268_v3, %v4883_v58 }
0x110a   :  { %4915 = vst [vmem:[#allocation23 + $0x18] sm:$0xff] %v4889_v1 }
0x110b   :  { %4914 = vst [vmem:[#allocation23 + $0x10] sm:$0xff] %v4884_v35  ;;  %v5117_v46 = vpop.f32.mrb[36].mxu0 }
0x110c   :  { %v4899_v17 = vadd.f32 %v5117_v46, %v8268_v3  ;;  %v4893_v15 = vpop.f32.mrb[37].mxu0 }
0x110d   :  { %v4894_v21 = vadd.f32 %v8268_v3, %v4893_v15 }
0x110e   :  { %4917 = vst [vmem:[#allocation23 + $0x28] sm:$0xff] %v4899_v17 }
0x110f   :  { %4916 = vst [vmem:[#allocation23 + $0x20] sm:$0xff] %v4894_v21  ;;  %v6650_v51 = vpop.eup %6649 }
0x1110   :  { %v4772_v50 = vmul.f32 %v6650_v51, %v6648_v36 }
0x1112   :  { %5119 = vmatmul.mubr.f32.gmra.mrb[38].mxu0 %v4772_v50  ;;  %4923 = vst [vmem:[#allocation24 + $0x8] sm:$0xff] %v4772_v50 }
0x1113   :  { %6882 = shalt.err (!%p6879_p0)
}
0x1114   :  { %s6883_s7 = scalar_lea.hbm %s8335_s11, 256 }
0x1115   :  { %p6884_p1 = scmp.ne.s32.totalorder %s8335_s11, %s6883_s7  ;;  %p6887_p2 = scmp.lt.u32.totalorder %s6883_s7, %s8335_s11 }
0x1117   :  { %p6889_p3 = pnand %p6887_p2, %p6884_p1 }
0x1119   :  { %6892 = shalt.err (!%p6889_p3)
}
0x111a   :  { %4951 = dma.vmem_to_hbm [thread:$0]  %s4946_s13, 256, %s8335_s11, [#allocation25], %s6960_s20, %s6960_s20, %s6961_s19  }
0x111b   :  { %s6969_s15 = smov [#allocation26]  }
0x111c   :  { %s4957_s21 = sshll.u32 %s6969_s15, 4  ;;  %s4958_s21 = int_to_ptr.vmem [resolvable:$true] %s4957_s21 }
0x111d   :  { %s6893_s23 = scalar_lea.vmem %s4958_s21, 256  ;;  %p6898_p5 = scmp.lt.s32.totalorder %s4958_s21, %s4958_s21 }
0x111e   :  { %p6894_p4 = scmp.ne.s32.totalorder %s4958_s21, %s6893_s23  ;;  %p6899_p6 = scmp.lt.s32.totalorder %s6893_s23, %s6893_s23 }
0x1120   :  { %p6900_p7 = por %p6899_p6, %p6898_p5 }
0x1122   :  { %p6901_p8 = pnand %p6900_p7, %p6894_p4 }
0x1124   :  { %6904 = shalt.err (!%p6901_p8)
}
0x1125   :  { %s6905_s25 = scalar_lea.hbm %s8336_s12, 256 }
0x1126   :  { %p6906_p9 = scmp.ne.s32.totalorder %s8336_s12, %s6905_s25  ;;  %p6909_p10 = scmp.lt.u32.totalorder %s6905_s25, %s8336_s12 }
0x1128   :  { %p6911_p11 = pnand %p6909_p10, %p6906_p9 }
0x112a   :  { %6914 = shalt.err (!%p6911_p11)
}
0x112b   :  { %4963 = dma.vmem_to_hbm [thread:$0]  %s4958_s21, 256, %s8336_s12, [#allocation25], %s6960_s20, %s6960_s20, %s6961_s19  }
0x112c   :  { %s6970_s8 = smov [#allocation23]  }
0x112d   :  { %s4933_s3 = sshll.u32 %s6970_s8, 4  ;;  %s4934_s3 = int_to_ptr.vmem [resolvable:$true] %s4933_s3 }
0x112e   :  { %s6915_s4 = scalar_lea.vmem %s4934_s3, 1024  ;;  %p6920_p13 = scmp.lt.s32.totalorder %s4934_s3, %s4934_s3 }
0x112f   :  { %p6916_p12 = scmp.ne.s32.totalorder %s4934_s3, %s6915_s4  ;;  %p6921_p0 = scmp.lt.s32.totalorder %s6915_s4, %s6915_s4 }
0x1131   :  { %p6922_p1 = por %p6921_p0, %p6920_p13 }
0x1133   :  { %p6923_p2 = pnand %p6922_p1, %p6916_p12 }
0x11e5   :  { %v5120_v9 = vpop.f32.mrb[38].mxu0 }
0x11e6   :  { %v4909_v4 = vadd.f32 %v5120_v9, %v8268_v3  ;;  %v4903_v42 = vpop.f32.mrb[39].mxu0 }
0x11e7   :  { %v4904_v55 = vadd.f32 %v8268_v3, %v4903_v42 }
0x11e8   :  { %4919 = vst [vmem:[#allocation23 + $0x38] sm:$0xff] %v4909_v4 }
0x11e9   :  { %4918 = vst [vmem:[#allocation23 + $0x30] sm:$0xff] %v4904_v55 }
0x11ea   :  { %6926 = shalt.err (!%p6923_p2)
}
0x11eb   :  { %s6927_s13 = scalar_lea.hbm %s8334_s10, 1024 }
0x11ec   :  { %p6928_p3 = scmp.ne.s32.totalorder %s8334_s10, %s6927_s13  ;;  %p6931_p4 = scmp.lt.u32.totalorder %s6927_s13, %s8334_s10 }
0x11ee   :  { %p6933_p5 = pnand %p6931_p4, %p6928_p3 }
0x11f0   :  { %6936 = shalt.err (!%p6933_p5)
}
0x11f1   :  { %4939 = dma.vmem_to_hbm [thread:$0]  %s4934_s3, 1024, %s8334_s10, [#allocation8], %s6960_s20, %s6960_s20, %s6961_s19  }
0x11f2   :  { %6949 = dma.done.wait [#allocation8], 1024  }
0x11f3   :  { %6950 = vsyncadd [#allocation8], 4294966272 }
0x11f4   :  { %6951 = dma.done.wait [#allocation25], 512  }
0x11f5   :  { %6952 = vsyncadd [#allocation25], 4294966784 }
0x11f6   :  { %4973 = vsyncpa [#allocation7], 1 }
0x11f7   :  { %4974 = vsyncpa [#allocation10], 1 }
0x11f8   :  { %4975 = vsyncpa [#allocation13], 1 }
0x11f9   :  { %4976 = vsyncpa [#allocation16], 1 }
0x11fa   :  { %4977 = vsyncpa [#allocation19], 1 }
0x11fb   :  { %4978 = vsyncpa [#allocation22], 1 }
0x11fc   :  { %4979 = vsyncpa [#allocation8], 1 }
0x11fd   :  { %4980 = vsyncpa [#allocation25], 1 }

</bundles_post_ra>
